<compile_context>
chip_gen: v6e
topology: v6e:2x2x1
jax: 0.10.0
libtpu: 0.0.40
codegen_flags: <defaults>
</compile_context>

<pallas_src>
import functools

import jax
import jax.numpy as jnp
from jax.experimental import pallas as pl
from jax.experimental.pallas import tpu as pltpu


def _round_up(x, m):
    return (x + m - 1) // m * m


def _attention_kernel(node_ref, u_ref, w1a_ref, w1b_ref, b1_ref,
                      w2_ref, b2_ref, w3_ref, b3_ref, att_ref, *, n_valid):
    """One batch tile of TB independent attention problems.

    node_ref : (TB, N_pad, E)   neighbor embeddings
    u_ref    : (TB, E)          one u_rep row per problem
    w1a/w1b  : (E, E)           split att1 weight (node half / u_rep half)
    b1,b2,w3 : (1, E)           biases and att3 weight row
    b3_ref   : (1,)  in SMEM    att3 bias (scalar)
    att_ref  : (N_pad, TB)      softmax output, batch in the lane dim
    """
    tb, n_pad, e = node_ref.shape

    node = node_ref[...].reshape(tb * n_pad, e)                          # (TB*N, E)

    # Layer 1 with the concat fused away:
    #   h1 = relu(node1 @ w1a + (u_rep @ w1b + b1))
    uw = jnp.dot(u_ref[...], w1b_ref[...],
                 preferred_element_type=jnp.float32) + b1_ref[...]       # (TB, E)
    h1 = jnp.dot(node, w1a_ref[...], preferred_element_type=jnp.float32)
    h1 = h1.reshape(tb, n_pad, e) + uw[:, None, :]
    h1 = jnp.maximum(h1, 0.0).reshape(tb * n_pad, e)

    # Layer 2.
    h2 = jnp.dot(h1, w2_ref[...], preferred_element_type=jnp.float32) + b2_ref[...]
    h2 = jnp.maximum(h2, 0.0)                                            # (TB*N, E)

    # Layer 3 as VPU multiply + lane reduction (w3 stored as a (1, E) row).
    logits = jnp.sum(h2.reshape(tb, n_pad, e) * w3_ref[...], axis=2)     # (TB, N)
    logits = logits + b3_ref[0]

    # Lane-dense orientation: neighbors in sublanes, batch in lanes.
    logits = logits.T                                                    # (N, TB)

    if n_valid < n_pad:     # mask padded neighbor rows (static trace-time check)
        neigh = jax.lax.broadcasted_iota(jnp.int32, logits.shape, 0)
        logits = jnp.where(neigh < n_valid, logits, jnp.float32(-1e30))

    # Softmax over the neighbor axis (dim 0 of each problem).
    m = jnp.max(logits, axis=0, keepdims=True)                           # (1, TB)
    ex = jnp.exp(logits - m)
    denom = jnp.sum(ex, axis=0, keepdims=True)                           # (1, TB)
    att_ref[...] = ex * pl.reciprocal(denom, approx=False)               # (N, TB)


@functools.partial(jax.jit, static_argnames=("num_neighs",))
def attention_forward_batched(node1_b, u_rep_b, params, num_neighs):
    """node1_b: (B, N, E), u_rep_b: (B, E)  ->  (B, N, 1) softmax attention."""
    b, n, e = node1_b.shape
    assert n == num_neighs
    w1a, w1b, b1, w2, b2, w3, b3 = params

    n_pad = _round_up(n, 8)
    tb = 128 if b >= 128 else _round_up(b, 8)   # batch tile = output lane width
    b_pad = _round_up(b, tb)

    node_p, u_p = node1_b, u_rep_b
    if n_pad != n or b_pad != b:
        node_p = jnp.pad(node1_b, ((0, b_pad - b), (0, n_pad - n), (0, 0)))
        u_p = jnp.pad(u_rep_b, ((0, b_pad - b), (0, 0)))

    out = pl.pallas_call(
        functools.partial(_attention_kernel, n_valid=num_neighs),
        out_shape=jax.ShapeDtypeStruct((n_pad, b_pad), jnp.float32),
        grid=(b_pad // tb,),
        in_specs=[
            pl.BlockSpec((tb, n_pad, e), lambda i: (i, 0, 0)),   # node1 tile
            pl.BlockSpec((tb, e), lambda i: (i, 0)),             # u_rep tile
            pl.BlockSpec((e, e), lambda i: (0, 0)),              # w1a (resident)
            pl.BlockSpec((e, e), lambda i: (0, 0)),              # w1b (resident)
            pl.BlockSpec((1, e), lambda i: (0, 0)),              # b1
            pl.BlockSpec((e, e), lambda i: (0, 0)),              # w2  (resident)
            pl.BlockSpec((1, e), lambda i: (0, 0)),              # b2
            pl.BlockSpec((1, e), lambda i: (0, 0)),              # w3 row
            pl.BlockSpec(memory_space=pltpu.MemorySpace.SMEM),   # b3 scalar
        ],
        out_specs=pl.BlockSpec((n_pad, tb), lambda i: (0, i)),   # lane-dense out
        compiler_params=pltpu.CompilerParams(
            dimension_semantics=("parallel",)),
    )(node_p, u_p, w1a, w1b, b1, w2, b2, w3, b3)

    att = out[:n, :b]                                            # (N, B)
    return jnp.transpose(att).reshape(b, n, 1)                   # (B, N, 1)


def attention_forward(node1, u_rep, params, num_neighs):
    """Module-faithful single-problem API: node1 (N, E), u_rep (1, E) -> (N, 1)."""
    att = attention_forward_batched(node1[None, ...], u_rep.reshape(1, -1),
                                    params, num_neighs)
    return att[0]


def init_params(key, embed_dim):
    """nn.Linear-style init; att1's weight is stored pre-split as w1a/w1b."""
    ks = jax.random.split(key, 7)
    e = embed_dim

    def uni(k, shape, fan_in):
        bound = float(1.0 / (fan_in ** 0.5))
        return jax.random.uniform(k, shape, jnp.float32, -bound, bound)

    w1a = uni(ks[0], (e, e), 2 * e)     # att1 weight, node1 half (fan_in = 2E)
    w1b = uni(ks[1], (e, e), 2 * e)     # att1 weight, u_rep half
    b1 = uni(ks[2], (1, e), 2 * e)
    w2 = uni(ks[3], (e, e), e)          # att2
    b2 = uni(ks[4], (1, e), e)
    w3 = uni(ks[5], (1, e), e)          # att3 weight as a (1, E) row
    b3 = uni(ks[6], (1,), e)            # att3 bias (scalar)
    return (w1a, w1b, b1, w2, b2, w3, b3)


def reference_forward(node1, u_rep, params, num_neighs):
    """Pure-JAX reference mirroring the PyTorch module exactly."""
    w1a, w1b, b1, w2, b2, w3, b3 = params
    uv = jnp.broadcast_to(u_rep.reshape(1, -1), (num_neighs, node1.shape[1]))
    x = jnp.concatenate([node1, uv], axis=1)             # (N, 2E)
    w1 = jnp.concatenate([w1a, w1b], axis=0)             # (2E, E)
    x = jax.nn.relu(x @ w1 + b1)
    x = jax.nn.relu(x @ w2 + b2)
    x = x @ w3.T + b3.reshape(1, 1)                      # (N, 1)
    return jax.nn.softmax(x, axis=0)


if __name__ == "__main__":
    embed_dim = 32
    num_neighs = 8
    batch = 256        # many independent attention problems per pallas_call

    key = jax.random.PRNGKey(0)
    k_node, k_u, k_params = jax.random.split(key, 3)

    node1_b = jax.random.normal(k_node, (batch, num_neighs, embed_dim),
                                jnp.float32)
    u_rep_b = jax.random.normal(k_u, (batch, embed_dim), jnp.float32)
    params = init_params(k_params, embed_dim)

    # Batched path (realistic GNN use: one call for many user/item pairs).
    att_b = attention_forward_batched(node1_b, u_rep_b, params, num_neighs)
    att_b = jax.block_until_ready(att_b)
    assert att_b.shape == (batch, num_neighs, 1)

    ref_b = jax.vmap(
        lambda nd, ur: reference_forward(nd, ur, params, num_neighs))(
            node1_b, u_rep_b)
    assert jnp.allclose(att_b, ref_b, atol=1e-4, rtol=1e-4)
    assert jnp.allclose(jnp.sum(att_b, axis=1), 1.0, atol=1e-5)

    # Module-faithful single-problem path (exercises the padded small-batch case).
    att1 = attention_forward(node1_b[0], u_rep_b[0][None, :], params, num_neighs)
    att1 = jax.block_until_ready(att1)
    assert att1.shape == (num_neighs, 1)
    assert jnp.allclose(att1, ref_b[0], atol=1e-4, rtol=1e-4)

    print("KERNEL_OK")
</pallas_src>

<mosaic_0001>
module attributes {stable_mosaic.version = 11 : i64} {
  func.func @_attention_kernel(%arg0: i32, %arg1: memref<128x8x32xf32, #tpu.memory_space<vmem>>, %arg2: memref<128x32xf32, #tpu.memory_space<vmem>>, %arg3: memref<32x32xf32, #tpu.memory_space<vmem>>, %arg4: memref<32x32xf32, #tpu.memory_space<vmem>>, %arg5: memref<1x32xf32, #tpu.memory_space<vmem>>, %arg6: memref<32x32xf32, #tpu.memory_space<vmem>>, %arg7: memref<1x32xf32, #tpu.memory_space<vmem>>, %arg8: memref<1x32xf32, #tpu.memory_space<vmem>>, %arg9: memref<1xf32, #tpu.memory_space<smem>>, %arg10: memref<8x128xf32, #tpu.memory_space<vmem>>) attributes {dimension_semantics = [#tpu.dimension_semantics<parallel>], iteration_bounds = array<i64: 2>, scalar_prefetch = 0 : i64, scratch_operands = 0 : i64, tpu.core_type = #tpu.core_type<tc>, window_params = [{transform_indices = @transform_0, window_bounds = array<i64: 128, 8, 32>}, {transform_indices = @transform_1, window_bounds = array<i64: 128, 32>}, {pipeline_mode = #tpu.pipeline_mode<synchronous>, transform_indices = @transform_2, window_bounds = array<i64: 32, 32>}, {pipeline_mode = #tpu.pipeline_mode<synchronous>, transform_indices = @transform_3, window_bounds = array<i64: 32, 32>}, {pipeline_mode = #tpu.pipeline_mode<synchronous>, transform_indices = @transform_4, window_bounds = array<i64: 1, 32>}, {pipeline_mode = #tpu.pipeline_mode<synchronous>, transform_indices = @transform_5, window_bounds = array<i64: 32, 32>}, {pipeline_mode = #tpu.pipeline_mode<synchronous>, transform_indices = @transform_6, window_bounds = array<i64: 1, 32>}, {pipeline_mode = #tpu.pipeline_mode<synchronous>, transform_indices = @transform_7, window_bounds = array<i64: 1, 32>}, {transform_indices = @transform_8, window_bounds = array<i64: 1>}, {transform_indices = @transform_9, window_bounds = array<i64: 8, 128>}]} {
    %c0 = arith.constant 0 : index
    %c0_0 = arith.constant 0 : index
    %c0_1 = arith.constant 0 : index
    %0 = vector.load %arg1[%c0, %c0_0, %c0_1] : memref<128x8x32xf32, #tpu.memory_space<vmem>>, vector<128x8x32xf32>
    %1 = vector.shape_cast %0 : vector<128x8x32xf32> to vector<1024x32xf32>
    %c0_2 = arith.constant 0 : index
    %c0_3 = arith.constant 0 : index
    %2 = vector.load %arg2[%c0_2, %c0_3] : memref<128x32xf32, #tpu.memory_space<vmem>>, vector<128x32xf32>
    %c0_4 = arith.constant 0 : index
    %c0_5 = arith.constant 0 : index
    %3 = vector.load %arg4[%c0_4, %c0_5] : memref<32x32xf32, #tpu.memory_space<vmem>>, vector<32x32xf32>
    %cst = arith.constant dense<0.000000e+00> : vector<128x32xf32>
    %4 = tpu.matmul %2, %3, %cst {dimension_numbers = #tpu.dot_dimension_numbers<[1], [0], [0], [1], [0, 0, 1, 1], [], []>} : vector<128x32xf32>, vector<32x32xf32>, vector<128x32xf32> -> vector<128x32xf32>
    %c0_6 = arith.constant 0 : index
    %c0_7 = arith.constant 0 : index
    %5 = vector.load %arg5[%c0_6, %c0_7] : memref<1x32xf32, #tpu.memory_space<vmem>>, vector<1x32xf32>
    %6 = vector.broadcast %5 : vector<1x32xf32> to vector<128x32xf32>
    %7 = arith.addf %4, %6 : vector<128x32xf32>
    %c0_8 = arith.constant 0 : index
    %c0_9 = arith.constant 0 : index
    %8 = vector.load %arg3[%c0_8, %c0_9] : memref<32x32xf32, #tpu.memory_space<vmem>>, vector<32x32xf32>
    %cst_10 = arith.constant dense<0.000000e+00> : vector<1024x32xf32>
    %9 = tpu.matmul %1, %8, %cst_10 {dimension_numbers = #tpu.dot_dimension_numbers<[1], [0], [0], [1], [0, 0, 1, 1], [], []>} : vector<1024x32xf32>, vector<32x32xf32>, vector<1024x32xf32> -> vector<1024x32xf32>
    %10 = vector.shape_cast %9 : vector<1024x32xf32> to vector<128x8x32xf32>
    %11 = vector.shape_cast %7 : vector<128x32xf32> to vector<128x1x32xf32>
    %12 = vector.broadcast %11 : vector<128x1x32xf32> to vector<128x8x32xf32>
    %13 = arith.addf %10, %12 : vector<128x8x32xf32>
    %cst_11 = arith.constant 0.000000e+00 : f32
    %14 = vector.broadcast %cst_11 : f32 to vector<128x8x32xf32>
    %15 = arith.maximumf %13, %14 : vector<128x8x32xf32>
    %16 = vector.shape_cast %15 : vector<128x8x32xf32> to vector<1024x32xf32>
    %c0_12 = arith.constant 0 : index
    %c0_13 = arith.constant 0 : index
    %17 = vector.load %arg6[%c0_12, %c0_13] : memref<32x32xf32, #tpu.memory_space<vmem>>, vector<32x32xf32>
    %cst_14 = arith.constant dense<0.000000e+00> : vector<1024x32xf32>
    %18 = tpu.matmul %16, %17, %cst_14 {dimension_numbers = #tpu.dot_dimension_numbers<[1], [0], [0], [1], [0, 0, 1, 1], [], []>} : vector<1024x32xf32>, vector<32x32xf32>, vector<1024x32xf32> -> vector<1024x32xf32>
    %c0_15 = arith.constant 0 : index
    %c0_16 = arith.constant 0 : index
    %19 = vector.load %arg7[%c0_15, %c0_16] : memref<1x32xf32, #tpu.memory_space<vmem>>, vector<1x32xf32>
    %20 = vector.broadcast %19 : vector<1x32xf32> to vector<1024x32xf32>
    %21 = arith.addf %18, %20 : vector<1024x32xf32>
    %cst_17 = arith.constant 0.000000e+00 : f32
    %22 = vector.broadcast %cst_17 : f32 to vector<1024x32xf32>
    %23 = arith.maximumf %21, %22 : vector<1024x32xf32>
    %24 = vector.shape_cast %23 : vector<1024x32xf32> to vector<128x8x32xf32>
    %c0_18 = arith.constant 0 : index
    %c0_19 = arith.constant 0 : index
    %25 = vector.load %arg8[%c0_18, %c0_19] : memref<1x32xf32, #tpu.memory_space<vmem>>, vector<1x32xf32>
    %26 = vector.shape_cast %25 : vector<1x32xf32> to vector<1x1x32xf32>
    %27 = vector.broadcast %26 : vector<1x1x32xf32> to vector<128x8x32xf32>
    %28 = arith.mulf %24, %27 : vector<128x8x32xf32>
    %cst_20 = arith.constant dense<0.000000e+00> : vector<128x8xf32>
    %29 = vector.multi_reduction <add>, %28, %cst_20 [2] : vector<128x8x32xf32> to vector<128x8xf32>
    %c0_21 = arith.constant 0 : index
    %30 = memref.load %arg9[%c0_21] : memref<1xf32, #tpu.memory_space<smem>>
    %31 = vector.broadcast %30 : f32 to vector<128x8xf32>
    %32 = arith.addf %29, %31 : vector<128x8xf32>
    %33 = tpu.transpose %32, [1, 0] : vector<128x8xf32> -> vector<8x128xf32>
    %cst_22 = arith.constant dense<0xFF800000> : vector<128xf32>
    %34 = vector.multi_reduction <maximumf>, %33, %cst_22 [0] : vector<8x128xf32> to vector<128xf32>
    %35 = vector.shape_cast %34 : vector<128xf32> to vector<1x128xf32>
    %36 = vector.broadcast %35 : vector<1x128xf32> to vector<8x128xf32>
    %37 = arith.subf %33, %36 : vector<8x128xf32>
    %38 = math.exp %37 : vector<8x128xf32>
    %cst_23 = arith.constant dense<0.000000e+00> : vector<128xf32>
    %39 = vector.multi_reduction <add>, %38, %cst_23 [0] : vector<8x128xf32> to vector<128xf32>
    %40 = vector.shape_cast %39 : vector<128xf32> to vector<1x128xf32>
    %41 = tpu.reciprocal %40 : vector<1x128xf32> -> vector<1x128xf32>
    %42 = vector.broadcast %41 : vector<1x128xf32> to vector<8x128xf32>
    %43 = arith.mulf %38, %42 : vector<8x128xf32>
    %c0_24 = arith.constant 0 : index
    %c0_25 = arith.constant 0 : index
    %44 = vector.load %arg10[%c0_24, %c0_25] : memref<8x128xf32, #tpu.memory_space<vmem>>, vector<8x128xf32>
    tpu.vector_store %arg10[%c0_24, %c0_25], %43 {strides = array<i32>} : memref<8x128xf32, #tpu.memory_space<vmem>>, vector<8x128xf32>,
    return
  }
  func.func @transform_0(%arg0: i32) -> (i32, i32, i32) {
    %c0_i32 = arith.constant 0 : i32
    %c0_i32_0 = arith.constant 0 : i32
    %c0_i32_1 = arith.constant 0 : i32
    return %arg0, %c0_i32, %c0_i32_0 : i32, i32, i32
  }
  func.func @transform_1(%arg0: i32) -> (i32, i32) {
    %c0_i32 = arith.constant 0 : i32
    %c0_i32_0 = arith.constant 0 : i32
    return %arg0, %c0_i32 : i32, i32
  }
  func.func @transform_2(%arg0: i32) -> (i32, i32) {
    %c0_i32 = arith.constant 0 : i32
    %c0_i32_0 = arith.constant 0 : i32
    %c0_i32_1 = arith.constant 0 : i32
    return %c0_i32, %c0_i32_0 : i32, i32
  }
  func.func @transform_3(%arg0: i32) -> (i32, i32) {
    %c0_i32 = arith.constant 0 : i32
    %c0_i32_0 = arith.constant 0 : i32
    %c0_i32_1 = arith.constant 0 : i32
    return %c0_i32, %c0_i32_0 : i32, i32
  }
  func.func @transform_4(%arg0: i32) -> (i32, i32) {
    %c0_i32 = arith.constant 0 : i32
    %c0_i32_0 = arith.constant 0 : i32
    %c0_i32_1 = arith.constant 0 : i32
    return %c0_i32, %c0_i32_0 : i32, i32
  }
  func.func @transform_5(%arg0: i32) -> (i32, i32) {
    %c0_i32 = arith.constant 0 : i32
    %c0_i32_0 = arith.constant 0 : i32
    %c0_i32_1 = arith.constant 0 : i32
    return %c0_i32, %c0_i32_0 : i32, i32
  }
  func.func @transform_6(%arg0: i32) -> (i32, i32) {
    %c0_i32 = arith.constant 0 : i32
    %c0_i32_0 = arith.constant 0 : i32
    %c0_i32_1 = arith.constant 0 : i32
    return %c0_i32, %c0_i32_0 : i32, i32
  }
  func.func @transform_7(%arg0: i32) -> (i32, i32) {
    %c0_i32 = arith.constant 0 : i32
    %c0_i32_0 = arith.constant 0 : i32
    %c0_i32_1 = arith.constant 0 : i32
    return %c0_i32, %c0_i32_0 : i32, i32
  }
  func.func @transform_8(%arg0: i32) -> i32 {
    %c0_i32 = arith.constant 0 : i32
    %c0_i32_0 = arith.constant 0 : i32
    return %c0_i32 : i32
  }
  func.func @transform_9(%arg0: i32) -> (i32, i32) {
    %c0_i32 = arith.constant 0 : i32
    %c0_i32_0 = arith.constant 0 : i32
    return %c0_i32, %arg0 : i32, i32
  }
}

</mosaic_0001>

<bundles_post_ra>
// kernel: attention_forward_batched.1
= control target key start
LH: loop header
LB: loop body
LE: loop exit
PB: predicated region body
PF: predicated region fallthrough
CT: control target
= control target key end

     0   :  { %s7353_s11 = smov 0   ;;  %s9071_s0 = inlined_call_operand.vmem [shape: f32[256,8,32], index: 0, kind: input, shape index: {}]   ;;  %s9072_s1 = inlined_call_operand.vmem [shape: f32[256,32], index: 1, kind: input, shape index: {}]   ;;  %s9073_s2 = inlined_call_operand.vmem [shape: f32[32,32], index: 2, kind: input, shape index: {}]   ;;  %s9074_s3 = inlined_call_operand.vmem [shape: f32[32,32], index: 3, kind: input, shape index: {}]   ;;  %s9075_s4 = inlined_call_operand.vmem [shape: f32[1,32], index: 4, kind: input, shape index: {}]   ;;  %s9076_s5 = inlined_call_operand.vmem [shape: f32[32,32], index: 5, kind: input, shape index: {}]   ;;  %s9077_s6 = inlined_call_operand.vmem [shape: f32[1,32], index: 6, kind: input, shape index: {}]   ;;  %s9078_s7 = inlined_call_operand.vmem [shape: f32[1,32], index: 7, kind: input, shape index: {}]   ;;  %s9079_s8 = inlined_call_operand.<no memory space> [shape: f32[1], index: 8, kind: input, shape index: {}]   ;;  %s9080_s9 = inlined_call_operand.vmem [shape: f32[8,256], index: 9, kind: output, shape index: {}]  }
   0x1   :  { %14 = sst [smem:[#allocation2]] %s9079_s8 }
   0x2 LB: > { %s7359_s12 = sadd.s32 4294967295, %s7297_s11   ;;  %p6267_p0 = scmp.ge.s32.totalorder %s7297_s11, 1  ;;  %s7297_s11 = sphi %s7353_s11, %s20_s11  }
   0x3   : > { %p300_p1 = scmp.lt.s32.totalorder %s7297_s11, 3 }
   0x5   : > { %p301_p2 = pnand %p6267_p0, %p300_p1 }
   0x6   : > { %s6270_s16 = sshll.u32 (!%p301_p2), %s7359_s12, 4  ;;  %s6268_s19 = sshll.u32 (!%p301_p2), %s7359_s12, 7 }
   0x7   : > { %304 = sbr.rel (%p301_p2) target bundleno = 961 (0x3c1), region = 56  ;;  %p347_p3 = scmp.lt.s32.totalorder (!%p301_p2), %s6270_s16, 31 }
   0x8   : > { %p7377_p4 = scmp.lt.s32.totalorder (!%p301_p2), %s6268_s19, 255  ;;  %s5241_s17 = sld [smem:[#allocation2]] (!%p301_p2) }
   0x9   : > { %p352_p5 = scmp.lt.s32.totalorder (!%p301_p2), %s7359_s12, 1 }
   0xc   : > { %v503_v0 = vld [vmem:[%s9074_s3 + $0x18] sm:$0xff]  ;;  %v502_v1 = vld [vmem:[%s9074_s3 + $0x10] sm:$0xff]  ;;  %v501_v2 = vld [vmem:[%s9074_s3 + $0x8] sm:$0xff]  ;;  %s9083_s16 = smov (!%p347_p3, %s6270_s16), 31  ;;  %vm511_vm0 = vcmask 261120   ;;  %s9085_s19 = smov (!%p7377_p4, %s6268_s19), 255 }
   0xd   : > { %7266 = vmatprep.subr.mxu1 %v503_v0  ;;  %6834 = vmatprep.subr.mxu0 %v503_v0  ;;  %v500_v3 = vld [vmem:[%s9074_s3] sm:$0xff]  ;;  %s6271_s22 = sshll.u32 %s9083_s16, 3  ;;  %v708_v4 = vld [vmem:[%s9073_s2 + $0x18] sm:$0xff]  ;;  %v707_v9 = vld [vmem:[%s9073_s2 + $0x10] sm:$0xff]  ;;  %s6269_s15 = sshll.u32 %s9085_s19, 3  ;;  %vm6013_vm1 = vcmask 1041409  }
   0xe   : > { %7270 = vmatpush3.msra.mxu1 %v503_v0  ;;  %6835 = vmatpush3.msra.mxu0 %v503_v0  ;;  %s7384_s26 = scalar_lea.vmem %s9072_s1, %s6271_s22  ;;  %v706_v13 = vld [vmem:[%s9073_s2 + $0x8] sm:$0xff]  ;;  %v705_v14 = vld [vmem:[%s9073_s2] sm:$0xff]  ;;  %s7422_s18 = scalar_lea.vmem %s9071_s0, %s6269_s15  ;;  %v3497_v59 = vld [vmem:[%s9076_s5 + $0x18] sm:$0xff]  ;;  %vm6015_vm2 = vcmask 1042434   ;;  %vm6017_vm3 = vcmask 1043459   ;;  %vm6019_vm4 = vcmask 1044484  }
   0xf   : > { %7267 = vmatprep.subr.mxu1 %v502_v1  ;;  %6836 = vmatprep.subr.mxu0 %v502_v1  ;;  %v492_v5 = vld [vmem:[%s7384_s26 + $0x40] sm:$0xff]  ;;  %v493_v6 = vld [vmem:[%s7384_s26 + $0x48] sm:$0xff]  ;;  %v494_v7 = vld [vmem:[%s7384_s26 + $0x50] sm:$0xff]  ;;  %vm6021_vm5 = vcmask 1045509   ;;  %vm6023_vm6 = vcmask 1046534   ;;  %vm6025_vm7 = vcmask 1047559  }
  0x10   : > { %7271 = vmatpush3.msra.mxu1 %v502_v1  ;;  %6837 = vmatpush3.msra.mxu0 %v502_v1  ;;  %v484_v8 = vld [vmem:[%s7384_s26] sm:$0xff]  ;;  %v485_v10 = vld [vmem:[%s7384_s26 + $0x8] sm:$0xff]  ;;  %v495_v11 = vld [vmem:[%s7384_s26 + $0x58] sm:$0xff]  ;;  %v1818_v1 = vlaneseq  ;;  %s9087_s12 = smov (!%p352_p5, %s7359_s12), 1 }
  0x11   : > { %7268 = vmatprep.subr.mxu1 %v501_v2  ;;  %6838 = vmatprep.subr.mxu0 %v501_v2  ;;  %v496_v12 = vld [vmem:[%s7384_s26 + $0x60] sm:$0xff]  ;;  %v497_v15 = vld [vmem:[%s7384_s26 + $0x68] sm:$0xff]  ;;  %v486_v16 = vld [vmem:[%s7384_s26 + $0x10] sm:$0xff]  ;;  %s6272_s22 = sshll.u32 %s9087_s12, 3 }
  0x12   : > { %7272 = vmatpush3.msra.mxu1 %v501_v2  ;;  %6839 = vmatpush3.msra.mxu0 %v501_v2  ;;  %v487_v17 = vld [vmem:[%s7384_s26 + $0x18] sm:$0xff]  ;;  %v498_v18 = vld [vmem:[%s7384_s26 + $0x70] sm:$0xff]  ;;  %v356_v20 = vld [vmem:[%s7422_s18] sm:$0xff]  ;;  %s355_s25 = scalar_lea.vmem %s9080_s9, %s6272_s22 }
  0x13   : > { %7269 = vmatprep.subr.mxu1 %v500_v3  ;;  %6840 = vmatprep.subr.mxu0 %v500_v3  ;;  %v499_v19 = vld [vmem:[%s7384_s26 + $0x78] sm:$0xff]  ;;  %v488_v21 = vld [vmem:[%s7384_s26 + $0x20] sm:$0xff]  ;;  %v489_v22 = vld [vmem:[%s7384_s26 + $0x28] sm:$0xff] }
  0x14   : > { %7273 = vmatpush3.msra.mxu1 %v500_v3  ;;  %6854 = vmatprep.mubr.msk.f32.mxu1 %vm511_vm0, %v492_v5  ;;  %v357_v23 = vld [vmem:[%s7422_s18 + $0x8] sm:$0xff]  ;;  %v358_v24 = vld [vmem:[%s7422_s18 + $0x10] sm:$0xff]  ;;  %v359_v25 = vld [vmem:[%s7422_s18 + $0x18] sm:$0xff]  ;;  %v7528_v5 = vshrl.u32 %v1818_v1, 7 }
  0x15   : > { %6855 = vmatmul.mubr.msk.f32.vlgmr.msra.gmra.mxu1 %vm511_vm0, %v493_v6  ;;  %6866 = vmatprep.subr.mxu1 %v708_v4  ;;  %v490_v26 = vld [vmem:[%s7384_s26 + $0x30] sm:$0xff]  ;;  %v491_v27 = vld [vmem:[%s7384_s26 + $0x38] sm:$0xff]  ;;  %v360_v28 = vld [vmem:[%s7422_s18 + $0x20] sm:$0xff]  ;;  %v5500_v6 = vand.u32 127, %v1818_v1 }
  0x16   : > { %6867 = vmatpush3.msra.mxu1 %v708_v4  ;;  %6857 = vmatprep.mubr.msk.f32.mxu1 %vm511_vm0, %v494_v7  ;;  %v361_v29 = vld [vmem:[%s7422_s18 + $0x28] sm:$0xff]  ;;  %v362_v30 = vld [vmem:[%s7422_s18 + $0x30] sm:$0xff]  ;;  %v363_v31 = vld [vmem:[%s7422_s18 + $0x38] sm:$0xff] }
  0x17   : > { %6841 = vmatpush3.msra.mxu0 %v500_v3  ;;  %6842 = vmatprep.mubr.msk.f32.mxu0 %vm511_vm0, %v484_v8  ;;  %v364_v32 = vld [vmem:[%s7422_s18 + $0x40] sm:$0xff]  ;;  %v365_v33 = vld [vmem:[%s7422_s18 + $0x48] sm:$0xff]  ;;  %v366_v34 = vld [vmem:[%s7422_s18 + $0x50] sm:$0xff]  ;;  %v7532_v8 = vsub.s32 %v5500_v6, %v7528_v5 }
  0x18   : > { %6868 = vmatprep.subr.mxu1 %v707_v9  ;;  %6843 = vmatmul.mubr.msk.f32.vlgmr.msra.gmra.mxu0 %vm511_vm0, %v485_v10  ;;  %v367_v35 = vld [vmem:[%s7422_s18 + $0x58] sm:$0xff]  ;;  %v368_v36 = vld [vmem:[%s7422_s18 + $0x60] sm:$0xff]  ;;  %v369_v37 = vld [vmem:[%s7422_s18 + $0x68] sm:$0xff] }
  0x19   : > { %6858 = vmatmul.mubr.msk.f32.gmra.mxu1 %vm511_vm0, %v495_v11  ;;  %6845 = vmatprep.mubr.msk.f32.mxu0 %vm511_vm0, %v486_v16  ;;  %v370_v38 = vld [vmem:[%s7422_s18 + $0x70] sm:$0xff]  ;;  %v371_v39 = vld [vmem:[%s7422_s18 + $0x78] sm:$0xff]  ;;  %v372_v40 = vld [vmem:[%s7422_s18 + $0x80] sm:$0xff] }
  0x1a   : > { %6869 = vmatpush3.msra.mxu1 %v707_v9  ;;  %6860 = vmatprep.mubr.msk.f32.mxu1 %vm511_vm0, %v496_v12  ;;  %v373_v41 = vld [vmem:[%s7422_s18 + $0x88] sm:$0xff]  ;;  %v374_v42 = vld [vmem:[%s7422_s18 + $0x90] sm:$0xff]  ;;  %v375_v43 = vld [vmem:[%s7422_s18 + $0x98] sm:$0xff] }
  0x1b   : > { %6870 = vmatprep.subr.mxu1 %v706_v13  ;;  %v376_v44 = vld [vmem:[%s7422_s18 + $0xa0] sm:$0xff]  ;;  %v377_v45 = vld [vmem:[%s7422_s18 + $0xa8] sm:$0xff]  ;;  %v378_v46 = vld [vmem:[%s7422_s18 + $0xb0] sm:$0xff]  ;;  %7066 = vmatprep.subr.mxu0 %v3497_v59 }
  0x1c   : > { %6871 = vmatpush3.msra.mxu1 %v706_v13  ;;  %6846 = vmatmul.mubr.msk.f32.gmra.mxu0 %vm511_vm0, %v487_v17  ;;  %v379_v47 = vld [vmem:[%s7422_s18 + $0xb8] sm:$0xff]  ;;  %v380_v48 = vld [vmem:[%s7422_s18 + $0xc0] sm:$0xff]  ;;  %v381_v49 = vld [vmem:[%s7422_s18 + $0xc8] sm:$0xff] }
  0x1d   : > { %6861 = vmatmul.mubr.msk.f32.gmra.mxu1 %vm511_vm0, %v497_v15  ;;  %6872 = vmatprep.subr.mxu1 %v705_v14  ;;  %v382_v50 = vld [vmem:[%s7422_s18 + $0xd0] sm:$0xff]  ;;  %v383_v51 = vld [vmem:[%s7422_s18 + $0xd8] sm:$0xff]  ;;  %v384_v52 = vld [vmem:[%s7422_s18 + $0xe0] sm:$0xff] }
  0x1e   : > { %6863 = vmatprep.mubr.msk.f32.mxu1 %vm511_vm0, %v498_v18  ;;  %6873 = vmatpush3.msra.mxu1 %v705_v14  ;;  %v385_v53 = vld [vmem:[%s7422_s18 + $0xe8] sm:$0xff]  ;;  %v386_v54 = vld [vmem:[%s7422_s18 + $0xf0] sm:$0xff]  ;;  %v387_v55 = vld [vmem:[%s7422_s18 + $0xf8] sm:$0xff] }
  0x1f   : > { %6848 = vmatprep.mubr.msk.f32.mxu0 %vm511_vm0, %v488_v21  ;;  %v388_v56 = vld [vmem:[%s7422_s18 + $0x100] sm:$0xff]  ;;  %v389_v57 = vld [vmem:[%s7422_s18 + $0x108] sm:$0xff]  ;;  %v390_v58 = vld [vmem:[%s7422_s18 + $0x110] sm:$0xff]  ;;  %7067 = vmatpush3.msra.mxu0 %v3497_v59 }
  0x20   : > { %6849 = vmatmul.mubr.msk.f32.gmra.mxu0 %vm511_vm0, %v489_v22  ;;  %v391_v60 = vld [vmem:[%s7422_s18 + $0x118] sm:$0xff]  ;;  %v3496_v61 = vld [vmem:[%s9076_s5 + $0x10] sm:$0xff]  ;;  %v392_v62 = vld [vmem:[%s7422_s18 + $0x120] sm:$0xff] }
  0x21   : > { %6864 = vmatmul.mubr.msk.f32.gmra.mxu1 %vm511_vm0, %v499_v19  ;;  %6851 = vmatprep.mubr.msk.f32.mxu0 %vm511_vm0, %v490_v26  ;;  %v3495_v63 = vld [vmem:[%s9076_s5 + $0x8] sm:$0xff]  ;;  %v394_v2 = vld [vmem:[%s7422_s18 + $0x130] sm:$0xff]  ;;  %v3494_v3 = vld [vmem:[%s9076_s5] sm:$0xff] }
  0x22   : > { %6874 = vmatprep.mubr.msk.f32.mxu1 %vm511_vm0, %v356_v20  ;;  %7068 = vmatprep.subr.mxu0 %v3496_v61  ;;  %v393_v0 = vld [vmem:[%s7422_s18 + $0x128] sm:$0xff]  ;;  %v395_v4 = vld [vmem:[%s7422_s18 + $0x138] sm:$0xff]  ;;  %v396_v7 = vld [vmem:[%s7422_s18 + $0x140] sm:$0xff] }
  0x23   : > { %7069 = vmatpush3.msra.mxu0 %v3496_v61  ;;  %v397_v9 = vld [vmem:[%s7422_s18 + $0x148] sm:$0xff]  ;;  %v398_v10 = vld [vmem:[%s7422_s18 + $0x150] sm:$0xff]  ;;  %v399_v11 = vld [vmem:[%s7422_s18 + $0x158] sm:$0xff]  ;;  %v7299_v61 = vmov 1966171168  }
  0x24   : > { %6852 = vmatmul.mubr.msk.f32.gmra.mxu0 %vm511_vm0, %v491_v27  ;;  %7070 = vmatprep.subr.mxu0 %v3495_v63  ;;  %v400_v12 = vld [vmem:[%s7422_s18 + $0x160] sm:$0xff]  ;;  %v401_v13 = vld [vmem:[%s7422_s18 + $0x168] sm:$0xff]  ;;  %v402_v14 = vld [vmem:[%s7422_s18 + $0x170] sm:$0xff] }
  0x25   : > { %6875 = vmatmul.mubr.msk.f32.vlgmr.msra.gmra.mxu1 %vm511_vm0, %v357_v23  ;;  %7071 = vmatpush3.msra.mxu0 %v3495_v63  ;;  %v403_v15 = vld [vmem:[%s7422_s18 + $0x178] sm:$0xff]  ;;  %v404_v16 = vld [vmem:[%s7422_s18 + $0x180] sm:$0xff]  ;;  %v405_v17 = vld [vmem:[%s7422_s18 + $0x188] sm:$0xff] }
  0x26   : > { %6877 = vmatprep.mubr.msk.f32.mxu1 %vm511_vm0, %v358_v24  ;;  %7072 = vmatprep.subr.mxu0 %v3494_v3  ;;  %v406_v18 = vld [vmem:[%s7422_s18 + $0x190] sm:$0xff]  ;;  %v407_v19 = vld [vmem:[%s7422_s18 + $0x198] sm:$0xff]  ;;  %v408_v20 = vld [vmem:[%s7422_s18 + $0x1a0] sm:$0xff] }
  0x27   : > { %7073 = vmatpush3.msra.mxu0 %v3494_v3  ;;  %v409_v21 = vld [vmem:[%s7422_s18 + $0x1a8] sm:$0xff]  ;;  %v410_v22 = vld [vmem:[%s7422_s18 + $0x1b0] sm:$0xff]  ;;  %v411_v23 = vld [vmem:[%s7422_s18 + $0x1b8] sm:$0xff] }
  0x28   : > { %v412_v24 = vld [vmem:[%s7422_s18 + $0x1c0] sm:$0xff]  ;;  %v414_v26 = vld [vmem:[%s7422_s18 + $0x1d0] sm:$0xff]  ;;  %v415_v27 = vld [vmem:[%s7422_s18 + $0x1d8] sm:$0xff] }
  0x29   : > { %6878 = vmatmul.mubr.msk.f32.gmra.mxu1 %vm511_vm0, %v359_v25  ;;  %v413_v25 = vld [vmem:[%s7422_s18 + $0x1c8] sm:$0xff]  ;;  %v446_v59 = vld [vmem:[%s7422_s18 + $0x2d0] sm:$0xff] }
  0x2a   : > { %6880 = vmatprep.mubr.msk.f32.mxu1 %vm511_vm0, %v360_v28  ;;  %v416_v28 = vld [vmem:[%s7422_s18 + $0x1e0] sm:$0xff] }
  0x2d   : > { %6881 = vmatmul.mubr.msk.f32.gmra.mxu1 %vm511_vm0, %v361_v29  ;;  %v417_v29 = vld [vmem:[%s7422_s18 + $0x1e8] sm:$0xff] }
  0x2e   : > { %6883 = vmatprep.mubr.msk.f32.mxu1 %vm511_vm0, %v362_v30  ;;  %v418_v30 = vld [vmem:[%s7422_s18 + $0x1f0] sm:$0xff] }
  0x31   : > { %6884 = vmatmul.mubr.msk.f32.gmra.mxu1 %vm511_vm0, %v363_v31  ;;  %v419_v31 = vld [vmem:[%s7422_s18 + $0x1f8] sm:$0xff] }
  0x32   : > { %6886 = vmatprep.mubr.msk.f32.mxu1 %vm511_vm0, %v364_v32  ;;  %v420_v32 = vld [vmem:[%s7422_s18 + $0x200] sm:$0xff] }
  0x35   : > { %6887 = vmatmul.mubr.msk.f32.gmra.mxu1 %vm511_vm0, %v365_v33  ;;  %v421_v33 = vld [vmem:[%s7422_s18 + $0x208] sm:$0xff] }
  0x36   : > { %6889 = vmatprep.mubr.msk.f32.mxu1 %vm511_vm0, %v366_v34  ;;  %v422_v34 = vld [vmem:[%s7422_s18 + $0x210] sm:$0xff] }
  0x39   : > { %6890 = vmatmul.mubr.msk.f32.gmra.mxu1 %vm511_vm0, %v367_v35  ;;  %v423_v35 = vld [vmem:[%s7422_s18 + $0x218] sm:$0xff] }
  0x3a   : > { %6892 = vmatprep.mubr.msk.f32.mxu1 %vm511_vm0, %v368_v36  ;;  %v424_v36 = vld [vmem:[%s7422_s18 + $0x220] sm:$0xff] }
  0x3d   : > { %6893 = vmatmul.mubr.msk.f32.gmra.mxu1 %vm511_vm0, %v369_v37  ;;  %v425_v37 = vld [vmem:[%s7422_s18 + $0x228] sm:$0xff] }
  0x3e   : > { %6895 = vmatprep.mubr.msk.f32.mxu1 %vm511_vm0, %v370_v38  ;;  %v426_v38 = vld [vmem:[%s7422_s18 + $0x230] sm:$0xff] }
  0x41   : > { %6896 = vmatmul.mubr.msk.f32.gmra.mxu1 %vm511_vm0, %v371_v39  ;;  %v427_v39 = vld [vmem:[%s7422_s18 + $0x238] sm:$0xff] }
  0x42   : > { %6898 = vmatprep.mubr.msk.f32.mxu1 %vm511_vm0, %v372_v40  ;;  %v428_v40 = vld [vmem:[%s7422_s18 + $0x240] sm:$0xff] }
  0x45   : > { %6899 = vmatmul.mubr.msk.f32.gmra.mxu1 %vm511_vm0, %v373_v41  ;;  %v429_v41 = vld [vmem:[%s7422_s18 + $0x248] sm:$0xff] }
  0x46   : > { %6901 = vmatprep.mubr.msk.f32.mxu1 %vm511_vm0, %v374_v42  ;;  %v430_v42 = vld [vmem:[%s7422_s18 + $0x250] sm:$0xff] }
  0x49   : > { %6902 = vmatmul.mubr.msk.f32.gmra.mxu1 %vm511_vm0, %v375_v43  ;;  %v431_v43 = vld [vmem:[%s7422_s18 + $0x258] sm:$0xff] }
  0x4a   : > { %6904 = vmatprep.mubr.msk.f32.mxu1 %vm511_vm0, %v376_v44  ;;  %v432_v44 = vld [vmem:[%s7422_s18 + $0x260] sm:$0xff] }
  0x4d   : > { %6905 = vmatmul.mubr.msk.f32.gmra.mxu1 %vm511_vm0, %v377_v45  ;;  %v433_v45 = vld [vmem:[%s7422_s18 + $0x268] sm:$0xff] }
  0x4e   : > { %6907 = vmatprep.mubr.msk.f32.mxu1 %vm511_vm0, %v378_v46  ;;  %v434_v46 = vld [vmem:[%s7422_s18 + $0x270] sm:$0xff] }
  0x51   : > { %6908 = vmatmul.mubr.msk.f32.gmra.mxu1 %vm511_vm0, %v379_v47  ;;  %v435_v47 = vld [vmem:[%s7422_s18 + $0x278] sm:$0xff] }
  0x52   : > { %6910 = vmatprep.mubr.msk.f32.mxu1 %vm511_vm0, %v380_v48  ;;  %v436_v48 = vld [vmem:[%s7422_s18 + $0x280] sm:$0xff] }
  0x55   : > { %6911 = vmatmul.mubr.msk.f32.gmra.mxu1 %vm511_vm0, %v381_v49  ;;  %v437_v49 = vld [vmem:[%s7422_s18 + $0x288] sm:$0xff] }
  0x56   : > { %6913 = vmatprep.mubr.msk.f32.mxu1 %vm511_vm0, %v382_v50  ;;  %v438_v50 = vld [vmem:[%s7422_s18 + $0x290] sm:$0xff] }
  0x59   : > { %6914 = vmatmul.mubr.msk.f32.gmra.mxu1 %vm511_vm0, %v383_v51  ;;  %v439_v51 = vld [vmem:[%s7422_s18 + $0x298] sm:$0xff] }
  0x5a   : > { %6916 = vmatprep.mubr.msk.f32.mxu1 %vm511_vm0, %v384_v52  ;;  %v440_v52 = vld [vmem:[%s7422_s18 + $0x2a0] sm:$0xff] }
  0x5d   : > { %6917 = vmatmul.mubr.msk.f32.gmra.mxu1 %vm511_vm0, %v385_v53  ;;  %v441_v53 = vld [vmem:[%s7422_s18 + $0x2a8] sm:$0xff] }
  0x5e   : > { %6919 = vmatprep.mubr.msk.f32.mxu1 %vm511_vm0, %v386_v54  ;;  %v442_v54 = vld [vmem:[%s7422_s18 + $0x2b0] sm:$0xff] }
  0x61   : > { %6920 = vmatmul.mubr.msk.f32.gmra.mxu1 %vm511_vm0, %v387_v55  ;;  %v443_v55 = vld [vmem:[%s7422_s18 + $0x2b8] sm:$0xff] }
  0x62   : > { %6922 = vmatprep.mubr.msk.f32.mxu1 %vm511_vm0, %v388_v56  ;;  %v444_v56 = vld [vmem:[%s7422_s18 + $0x2c0] sm:$0xff] }
  0x65   : > { %6923 = vmatmul.mubr.msk.f32.gmra.mxu1 %vm511_vm0, %v389_v57  ;;  %v445_v57 = vld [vmem:[%s7422_s18 + $0x2c8] sm:$0xff] }
  0x66   : > { %6925 = vmatprep.mubr.msk.f32.mxu1 %vm511_vm0, %v390_v58  ;;  %v7636_v58 = vld [vmem:[%s9075_s4] ss:$0 sm:$0xff] }
  0x69   : > { %6926 = vmatmul.mubr.msk.f32.gmra.mxu1 %vm511_vm0, %v391_v60 }
  0x6a   : > { %6928 = vmatprep.mubr.msk.f32.mxu1 %vm511_vm0, %v392_v62  ;;  %v1816_v62 = vunpack.c.l.s4 %v7299_v61 }
  0x6c   : > { %v1817_v6 = vunpack.c.0.s8 %v1816_v62 }
  0x6d   : > { %6929 = vmatmul.mubr.msk.f32.gmra.mxu1 %vm511_vm0, %v393_v0  ;;  %v447_v0 = vld [vmem:[%s7422_s18 + $0x2d8] sm:$0xff] }
  0x6e   : > { %6931 = vmatprep.mubr.msk.f32.mxu1 %vm511_vm0, %v394_v2  ;;  %v448_v2 = vld [vmem:[%s7422_s18 + $0x2e0] sm:$0xff] }
  0x71   : > { %6932 = vmatmul.mubr.msk.f32.gmra.mxu1 %vm511_vm0, %v395_v4 }
  0x72   : > { %6934 = vmatprep.mubr.msk.f32.mxu1 %vm511_vm0, %v396_v7 }
  0x75   : > { %6935 = vmatmul.mubr.msk.f32.gmra.mxu1 %vm511_vm0, %v397_v9 }
  0x76   : > { %6937 = vmatprep.mubr.msk.f32.mxu1 %vm511_vm0, %v398_v10  ;;  %v449_v10 = vld [vmem:[%s7422_s18 + $0x2e8] sm:$0xff] }
  0x79   : > { %6938 = vmatmul.mubr.msk.f32.gmra.mxu1 %vm511_vm0, %v399_v11 }
  0x7a   : > { %6940 = vmatprep.mubr.msk.f32.mxu1 %vm511_vm0, %v400_v12 }
  0x7d   : > { %6941 = vmatmul.mubr.msk.f32.gmra.mxu1 %vm511_vm0, %v401_v13 }
  0x7e   : > { %6943 = vmatprep.mubr.msk.f32.mxu1 %vm511_vm0, %v402_v14  ;;  %v450_v14 = vld [vmem:[%s7422_s18 + $0x2f0] sm:$0xff] }
  0x81   : > { %6944 = vmatmul.mubr.msk.f32.gmra.mxu1 %vm511_vm0, %v403_v15 }
  0x82   : > { %6946 = vmatprep.mubr.msk.f32.mxu1 %vm511_vm0, %v404_v16  ;;  %v7661_v16 = vsub.s32 %v1817_v6, %v7528_v5 }
  0x85   : > { %6947 = vmatmul.mubr.msk.f32.gmra.mxu1 %vm511_vm0, %v405_v17 }
  0x86   : > { %6949 = vmatprep.mubr.msk.f32.mxu1 %vm511_vm0, %v406_v18 }
  0x89   : > { %6950 = vmatmul.mubr.msk.f32.gmra.mxu1 %vm511_vm0, %v407_v19  ;;  %v451_v19 = vld [vmem:[%s7422_s18 + $0x2f8] sm:$0xff] }
  0x8a   : > { %6952 = vmatprep.mubr.msk.f32.mxu1 %vm511_vm0, %v408_v20 }
  0x8d   : > { %6953 = vmatmul.mubr.msk.f32.gmra.mxu1 %vm511_vm0, %v409_v21 }
  0x8e   : > { %6955 = vmatprep.mubr.msk.f32.mxu1 %vm511_vm0, %v410_v22 }
  0x91   : > { %6956 = vmatmul.mubr.msk.f32.gmra.mxu1 %vm511_vm0, %v411_v23  ;;  %v452_v23 = vld [vmem:[%s7422_s18 + $0x300] sm:$0xff] }
  0x92   : > { %6958 = vmatprep.mubr.msk.f32.mxu1 %vm511_vm0, %v412_v24 }
  0x95   : > { %6959 = vmatmul.mubr.msk.f32.gmra.mxu1 %vm511_vm0, %v413_v25 }
  0x96   : > { %6961 = vmatprep.mubr.msk.f32.mxu1 %vm511_vm0, %v414_v26 }
  0x99   : > { %6962 = vmatmul.mubr.msk.f32.gmra.mxu1 %vm511_vm0, %v415_v27 }
  0x9a   : > { %6964 = vmatprep.mubr.msk.f32.mxu1 %vm511_vm0, %v416_v28 }
  0x9d   : > { %6965 = vmatmul.mubr.msk.f32.gmra.mxu1 %vm511_vm0, %v417_v29  ;;  %v453_v29 = vld [vmem:[%s7422_s18 + $0x308] sm:$0xff] }
  0x9e   : > { %6967 = vmatprep.mubr.msk.f32.mxu1 %vm511_vm0, %v418_v30 }
  0xa1   : > { %6968 = vmatmul.mubr.msk.f32.gmra.mxu1 %vm511_vm0, %v419_v31 }
  0xa2   : > { %6970 = vmatprep.mubr.msk.f32.mxu1 %vm511_vm0, %v420_v32 }
  0xa5   : > { %6971 = vmatmul.mubr.msk.f32.gmra.mxu1 %vm511_vm0, %v421_v33  ;;  %v7684_v33 = vsub.s32 0, %v7528_v5  ;;  %v455_v5 = vld [vmem:[%s7422_s18 + $0x318] sm:$0xff] }
  0xa6   : > { %6973 = vmatprep.mubr.msk.f32.mxu1 %vm511_vm0, %v422_v34  ;;  %v454_v34 = vld [vmem:[%s7422_s18 + $0x310] sm:$0xff] }
  0xa9   : > { %6974 = vmatmul.mubr.msk.f32.gmra.mxu1 %vm511_vm0, %v423_v35 }
  0xaa   : > { %6976 = vmatprep.mubr.msk.f32.mxu1 %vm511_vm0, %v424_v36 }
  0xad   : > { %6977 = vmatmul.mubr.msk.f32.gmra.mxu1 %vm511_vm0, %v425_v37 }
  0xae   : > { %6979 = vmatprep.mubr.msk.f32.mxu1 %vm511_vm0, %v426_v38 }
  0xb1   : > { %6980 = vmatmul.mubr.msk.f32.gmra.mxu1 %vm511_vm0, %v427_v39 }
  0xb2   : > { %6982 = vmatprep.mubr.msk.f32.mxu1 %vm511_vm0, %v428_v40 }
  0xb5   : > { %6983 = vmatmul.mubr.msk.f32.gmra.mxu1 %vm511_vm0, %v429_v41 }
  0xb6   : > { %6985 = vmatprep.mubr.msk.f32.mxu1 %vm511_vm0, %v430_v42 }
  0xb9   : > { %6986 = vmatmul.mubr.msk.f32.gmra.mxu1 %vm511_vm0, %v431_v43 }
  0xba   : > { %6988 = vmatprep.mubr.msk.f32.mxu1 %vm511_vm0, %v432_v44 }
  0xbd   : > { %6989 = vmatmul.mubr.msk.f32.gmra.mxu1 %vm511_vm0, %v433_v45 }
  0xbe   : > { %6991 = vmatprep.mubr.msk.f32.mxu1 %vm511_vm0, %v434_v46  ;;  %v456_v46 = vld [vmem:[%s7422_s18 + $0x320] sm:$0xff] }
  0xc1   : > { %6992 = vmatmul.mubr.msk.f32.gmra.mxu1 %vm511_vm0, %v435_v47 }
  0xc2   : > { %6994 = vmatprep.mubr.msk.f32.mxu1 %vm511_vm0, %v436_v48 }
  0xc5   : > { %6995 = vmatmul.mubr.msk.f32.gmra.mxu1 %vm511_vm0, %v437_v49 }
  0xc6   : > { %6997 = vmatprep.mubr.msk.f32.mxu1 %vm511_vm0, %v438_v50 }
  0xc9   : > { %6998 = vmatmul.mubr.msk.f32.gmra.mxu1 %vm511_vm0, %v439_v51 }
  0xca   : > { %7000 = vmatprep.mubr.msk.f32.mxu1 %vm511_vm0, %v440_v52 }
  0xcd   : > { %7001 = vmatmul.mubr.msk.f32.gmra.mxu1 %vm511_vm0, %v441_v53  ;;  %v457_v53 = vld [vmem:[%s7422_s18 + $0x328] sm:$0xff] }
  0xce   : > { %7003 = vmatprep.mubr.msk.f32.mxu1 %vm511_vm0, %v442_v54 }
  0xd1   : > { %7004 = vmatmul.mubr.msk.f32.gmra.mxu1 %vm511_vm0, %v443_v55 }
  0xd2   : > { %7006 = vmatprep.mubr.msk.f32.mxu1 %vm511_vm0, %v444_v56 }
  0xd5   : > { %v6856_v60 = vpop.f32.mrf.mxu1  ;;  %7007 = vmatmul.mubr.msk.f32.gmra.mxu1 %vm511_vm0, %v445_v57 }
  0xd6   : > { %v7641_v63 = vadd.f32 %v6856_v60, %v7636_v58  ;;  %7009 = vmatprep.mubr.msk.f32.mxu1 %vm511_vm0, %v446_v59  ;;  %v458_v59 = vld [vmem:[%s7422_s18 + $0x330] sm:$0xff] }
  0xd7   : > { %v666_v1 = vpop.f32.mrf.mxu1 }
  0xd8   : > { %v7647_v3 = vadd.f32 %v7636_v58, %v666_v1  ;;  %v6844_v4 = vpop.f32.mrf.mxu0 }
  0xd9   : > { %v6859_v7 = vpop.f32.mrf.mxu1  ;;  %7010 = vmatmul.mubr.msk.f32.gmra.mxu1 %vm511_vm0, %v447_v0  ;;  %v632_v35 = vadd.f32 %v6844_v4, %v7636_v58 }
  0xda   : > { %v626_v9 = vpop.f32.mrf.mxu0  ;;  %7012 = vmatprep.mubr.msk.f32.mxu1 %vm511_vm0, %v448_v2  ;;  %v7653_v11 = vadd.f32 %v6859_v7, %v7636_v58 }
  0xdb   : > { %v676_v12 = vpop.f32.mrf.mxu1  ;;  %v627_v13 = vadd.f32 %v7636_v58, %v626_v9  ;;  %v1870_v48 = vrot.slane %v632_v35, %v7661_v16  ;;  %v1863_v60 = vcombine.high %v632_v35, %v632_v35  ;;  %v459_v9 = vld [vmem:[%s7422_s18 + $0x338] sm:$0xff]  ;;  %v462_v35 = vld [vmem:[%s7422_s18 + $0x350] sm:$0xff] }
  0xdc   : > { %v7658_v15 = vadd.f32 %v7636_v58, %v676_v12  ;;  %v7707_v62 = vpop.f32.mrf.mxu0 }
  0xdd   : > { %v6862_v17 = vpop.f32.mrf.mxu1  ;;  %7013 = vmatmul.mubr.msk.f32.gmra.mxu1 %vm511_vm0, %v449_v10  ;;  %v1814_v18 = vcombine.high %v627_v13, %v627_v13  ;;  %v1821_v20 = vrot.slane %v627_v13, %v7661_v16  ;;  %v1878_v0 = vcombine.high %v1870_v48, %v1870_v48 }
  0xde   : > { %7015 = vmatprep.mubr.msk.f32.mxu1 %vm511_vm0, %v450_v14  ;;  %v7668_v21 = vadd.f32 %v6862_v17, %v7636_v58  ;;  %v460_v17 = vld [vmem:[%s7422_s18 + $0x340] sm:$0xff] }
  0xdf   : > { %v686_v22 = vpop.f32.mrf.mxu1  ;;  %v1828_v25 = vrot.slane %v1814_v18, %v7661_v16  ;;  %v1829_v26 = vcombine.high %v1821_v20, %v1821_v20  ;;  %v1837_v30 = vrot.slane %v1821_v20, %v7661_v16  ;;  %v1877_v20 = vrot.slane %v1863_v60, %v7661_v16 }
  0xe0   : > { %v7672_v24 = vadd.f32 %v7636_v58, %v686_v22 }
  0xe1   : > { %v6865_v27 = vpop.f32.mrf.mxu1  ;;  %7016 = vmatmul.mubr.msk.f32.gmra.mxu1 %vm511_vm0, %v451_v19  ;;  %v1851_v32 = vrot.slane %v1829_v26, %v7661_v16  ;;  %v1830_v40 = vcombine.high %v1828_v25, %v1828_v25  ;;  %v2601_v41 = vrot.slane %v1837_v30, %v7684_v33  ;;  %v1859_v42 = vcombine.high %v1837_v30, %v1837_v30  ;;  %v636_v19 = vpop.f32.mrf.mxu0  ;;  %v461_v30 = vld [vmem:[%s7422_s18 + $0x348] sm:$0xff] }
  0xe2   : > { %v7677_v28 = vadd.f32 %v6865_v27, %v7636_v58  ;;  %7018 = vmatprep.mubr.msk.f32.mxu1 %vm511_vm0, %v452_v23  ;;  %v1844_v54 = vrot.slane %v1828_v25, %v7661_v16  ;;  %v1900_v25 = vrot.slane %v1878_v0, %v7661_v16  ;;  %v1886_v26 = vrot.slane %v1870_v48, %v7661_v16 }
  0xe3   : > { %v696_v31 = vpop.f32.mrf.mxu1  ;;  %v2605_v38 = vrot.slane %v1851_v32, %v7684_v33  ;;  %v1861_v39 = vcombine.high %v1851_v32, %v1851_v32  ;;  %v1858_v50 = vrot.slane %v1830_v40, %v7661_v16  ;;  %v2609_v52 = vrot.slane %v1859_v42, %v7684_v33 }
  0xe4   : > { %v7689_v36 = vadd.f32 %v7636_v58, %v696_v31  ;;  %v2617_v7 = vrot.slane %v1844_v54, %v7684_v33  ;;  %v1860_v10 = vcombine.high %v1844_v54, %v1844_v54  ;;  %v2637_v40 = vrot.slane %v1900_v25, %v7684_v33 }
  0xe5   : > { %v6876_v37 = vpop.f32.mrf.mxu1  ;;  %7019 = vmatmul.mubr.msk.f32.gmra.mxu1 %vm511_vm0, %v453_v29  ;;  %v2613_v45 = vrot.slane %v1861_v39, %v7684_v33  ;;  %v2621_v2 = vrot.slane %v1858_v50, %v7684_v33  ;;  %v1862_v4 = vcombine.high %v1858_v50, %v1858_v50  ;;  %v464_v50 = vld [vmem:[%s7422_s18 + $0x360] sm:$0xff] }
  0xe6   : > { %7021 = vmatprep.mubr.msk.f32.mxu1 %vm511_vm0, %v454_v34  ;;  %v3239_v43 = vadd.f32 %v6876_v37, %v2605_v38  ;;  %v2625_v29 = vrot.slane %v1860_v10, %v7684_v33  ;;  %v637_v37 = vadd.f32 %v7636_v58, %v636_v19 }
  0xe7   : > { %v1159_v44 = vpop.f32.mrf.mxu1  ;;  %v2629_v23 = vrot.slane %v1862_v4, %v7684_v33 }
  0xe8   : > { %v3238_v47 = vadd.f32 %v2601_v41, %v1159_v44  ;;  %v3367_v55 = vmax.f32 %v3239_v43, 0.0  ;;  %v1910_v41 = vcombine.high %v1900_v25, %v1900_v25  ;;  %v2633_v43 = vrot.slane %v1886_v26, %v7684_v33  ;;  %v463_v44 = vld [vmem:[%s7422_s18 + $0x358] sm:$0xff] }
  0xe9   : > { %v6879_v49 = vpop.f32.mrf.mxu1  ;;  %7022 = vmatmul.mubr.msk.f32.gmra.mxu1 %vm511_vm0, %v455_v5  ;;  %v1879_v5 = vcombine.high %v1877_v20, %v1877_v20 }
  0xea   : > { %v3366_v51 = vmax.f32 %v3238_v47, 0.0  ;;  %7024 = vmatprep.mubr.msk.f32.mxu1 %vm511_vm0, %v456_v46  ;;  %v3241_v56 = vadd.f32 %v6879_v49, %v2613_v45  ;;  %v1908_v45 = vcombine.high %v1886_v26, %v1886_v26  ;;  %v1919_v49 = vrot.slane %v637_v37, %v7661_v16 }
  0xeb   : > { %v1169_v57 = vpop.f32.mrf.mxu1  ;;  %v1907_v54 = vrot.slane %v1879_v5, %v7661_v16 }
  0xec   : > { %v3240_v61 = vadd.f32 %v2609_v52, %v1169_v57  ;;  %7074 = vmatprep.mubr.msk.f32.mxu0 %vm511_vm0, %v3366_v51  ;;  %v3369_v12 = vmax.f32 %v3241_v56, 0.0  ;;  %v2641_v56 = vrot.slane %v1908_v45, %v7684_v33  ;;  %v465_v57 = vld [vmem:[%s7422_s18 + $0x368] sm:$0xff] }
  0xed   : > { %v6882_v1 = vpop.f32.mrf.mxu1  ;;  %7025 = vmatmul.mubr.msk.f32.gmra.mxu1 %vm511_vm0, %v457_v53  ;;  %7075 = vmatmul.mubr.msk.f32.vlgmr.msra.gmra.mxu0 %vm511_vm0, %v3367_v55  ;;  %v2645_v53 = vrot.slane %v1910_v41, %v7684_v33  ;;  %v1911_v10 = vcombine.high %v1907_v54, %v1907_v54 }
  0xee   : > { %v3368_v6 = vmax.f32 %v3240_v61, 0.0  ;;  %7027 = vmatprep.mubr.msk.f32.mxu1 %vm511_vm0, %v458_v59  ;;  %v3243_v13 = vadd.f32 %v6882_v1, %v2621_v2  ;;  %v1893_v59 = vrot.slane %v1877_v20, %v7661_v16  ;;  %v1927_v1 = vcombine.high %v1919_v49, %v1919_v49  ;;  %v466_v2 = vld [vmem:[%s7422_s18 + $0x370] sm:$0xff] }
  0xef   : > { %v1179_v14 = vpop.f32.mrf.mxu1 }
  0xf0   : > { %v3242_v18 = vadd.f32 %v2617_v7, %v1179_v14  ;;  %7077 = vmatprep.mubr.msk.f32.mxu0 %vm511_vm0, %v3368_v6  ;;  %v3371_v31 = vmax.f32 %v3243_v13, 0.0  ;;  %v1912_v6 = vcombine.high %v637_v37, %v637_v37  ;;  %v2649_v13 = vrot.slane %v1893_v59, %v7684_v33  ;;  %v467_v14 = vld [vmem:[%s7422_s18 + $0x378] sm:$0xff] }
  0xf1   : > { %v6885_v22 = vpop.f32.mrf.mxu1  ;;  %7028 = vmatmul.mubr.msk.f32.gmra.mxu1 %vm511_vm0, %v459_v9  ;;  %7078 = vmatmul.mubr.msk.f32.gmra.mxu0 %vm511_vm0, %v3369_v12  ;;  %v2653_v9 = vrot.slane %v1907_v54, %v7684_v33 }
  0xf2   : > { %v3370_v27 = vmax.f32 %v3242_v18, 0.0  ;;  %7030 = vmatprep.mubr.msk.f32.mxu1 %vm511_vm0, %v460_v17  ;;  %v3245_v32 = vadd.f32 %v6885_v22, %v2629_v23  ;;  %v1909_v17 = vcombine.high %v1893_v59, %v1893_v59  ;;  %v468_v22 = vld [vmem:[%s7422_s18 + $0x380] sm:$0xff]  ;;  %v1949_v23 = vrot.slane %v1927_v1, %v7661_v16 }
  0xf3   : > { %v1189_v34 = vpop.f32.mrf.mxu1  ;;  %v1926_v26 = vrot.slane %v1912_v6, %v7661_v16 }
  0xf4   : > { %v3244_v38 = vadd.f32 %v2625_v29, %v1189_v34  ;;  %7080 = vmatprep.mubr.msk.f32.mxu0 %vm511_vm0, %v3370_v27  ;;  %v3373_v46 = vmax.f32 %v3245_v32, 0.0  ;;  %v2661_v29 = vrot.slane %v1911_v10, %v7684_v33  ;;  %v469_v32 = vld [vmem:[%s7422_s18 + $0x388] sm:$0xff]  ;;  %v1935_v34 = vrot.slane %v1919_v49, %v7661_v16 }
  0xf5   : > { %v6888_v39 = vpop.f32.mrf.mxu1  ;;  %7031 = vmatmul.mubr.msk.f32.gmra.mxu1 %vm511_vm0, %v461_v30  ;;  %7081 = vmatmul.mubr.msk.f32.gmra.mxu0 %vm511_vm0, %v3371_v31  ;;  %v2657_v31 = vrot.slane %v1909_v17, %v7684_v33  ;;  %v1959_v41 = vcombine.high %v1949_v23, %v1949_v23 }
  0xf6   : > { %v3372_v42 = vmax.f32 %v3244_v38, 0.0  ;;  %7033 = vmatprep.mubr.msk.f32.mxu1 %vm511_vm0, %v462_v35  ;;  %v3247_v47 = vadd.f32 %v6888_v39, %v2637_v40  ;;  %v2669_v39 = vrot.slane %v1949_v23, %v7684_v33  ;;  %v470_v40 = vld [vmem:[%s7422_s18 + $0x390] sm:$0xff] }
  0xf7   : > { %v1199_v48 = vpop.f32.mrf.mxu1 }
  0xf8   : > { %v3246_v51 = vadd.f32 %v2633_v43, %v1199_v48  ;;  %7083 = vmatprep.mubr.msk.f32.mxu0 %vm511_vm0, %v3372_v42  ;;  %v3375_v60 = vmax.f32 %v3247_v47, 0.0  ;;  %v642_v42 = vadd.f32 %v7707_v62, %v7636_v58  ;;  %v471_v47 = vld [vmem:[%s7422_s18 + $0x398] sm:$0xff]  ;;  %v1957_v48 = vcombine.high %v1935_v34, %v1935_v34  ;;  %v472_v62 = vld [vmem:[%s7422_s18 + $0x3a0] sm:$0xff] }
  0xf9   : > { %v6891_v52 = vpop.f32.mrf.mxu1  ;;  %7034 = vmatmul.mubr.msk.f32.gmra.mxu1 %vm511_vm0, %v463_v44  ;;  %7084 = vmatmul.mubr.msk.f32.gmra.mxu0 %vm511_vm0, %v3373_v46  ;;  %v1928_v44 = vcombine.high %v1926_v26, %v1926_v26  ;;  %v2665_v46 = vrot.slane %v1935_v34, %v7684_v33 }
  0xfa   : > { %v3374_v55 = vmax.f32 %v3246_v51, 0.0  ;;  %7036 = vmatprep.mubr.msk.f32.mxu1 %vm511_vm0, %v464_v50  ;;  %v3249_v61 = vadd.f32 %v6891_v52, %v2645_v53  ;;  %v2677_v52 = vrot.slane %v1959_v41, %v7684_v33  ;;  %v1968_v54 = vrot.slane %v642_v42, %v7661_v16 }
  0xfb   : > { %v1209_v0 = vpop.f32.mrf.mxu1  ;;  %v2673_v59 = vrot.slane %v1957_v48, %v7684_v33  ;;  %v1961_v6 = vcombine.high %v642_v42, %v642_v42  ;;  %v478_v42 = vld [vmem:[%s7422_s18 + $0x3d0] sm:$0xff] }
  0xfc   : > { %v3248_v4 = vadd.f32 %v2641_v56, %v1209_v0  ;;  %7086 = vmatprep.mubr.msk.f32.mxu0 %vm511_vm0, %v3374_v55  ;;  %v3377_v18 = vmax.f32 %v3249_v61, 0.0  ;;  %v1956_v56 = vrot.slane %v1928_v44, %v7661_v16  ;;  %v1942_v61 = vrot.slane %v1926_v26, %v7661_v16  ;;  %v476_v26 = vld [vmem:[%s7422_s18 + $0x3c0] sm:$0xff] }
  0xfd   : > { %v6894_v7 = vpop.f32.mrf.mxu1  ;;  %7037 = vmatmul.mubr.msk.f32.gmra.mxu1 %vm511_vm0, %v465_v57  ;;  %7087 = vmatmul.mubr.msk.f32.gmra.mxu0 %vm511_vm0, %v3375_v60  ;;  %v473_v60 = vld [vmem:[%s7422_s18 + $0x3a8] sm:$0xff]  ;;  %v1976_v10 = vcombine.high %v1968_v54, %v1968_v54 }
  0xfe   : > { %v3376_v12 = vmax.f32 %v3248_v4, 0.0  ;;  %7039 = vmatprep.mubr.msk.f32.mxu1 %vm511_vm0, %v466_v2  ;;  %v3251_v19 = vadd.f32 %v6894_v7, %v2653_v9  ;;  %v474_v4 = vld [vmem:[%s7422_s18 + $0x3b0] sm:$0xff]  ;;  %v7788_v9 = vpop.f32.mrf.mxu0 }
  0xff   : > { %v1219_v20 = vpop.f32.mrf.mxu1  ;;  %v1998_v34 = vrot.slane %v1976_v10, %v7661_v16 }
 0x100   : > { %v3250_v25 = vadd.f32 %v2649_v13, %v1219_v20  ;;  %7089 = vmatprep.mubr.msk.f32.mxu0 %vm511_vm0, %v3376_v12  ;;  %v3379_v35 = vmax.f32 %v3251_v19, 0.0  ;;  %v2685_v13 = vrot.slane %v1956_v56, %v7684_v33  ;;  %v475_v19 = vld [vmem:[%s7422_s18 + $0x3b8] sm:$0xff]  ;;  %v1958_v20 = vcombine.high %v1942_v61, %v1942_v61 }
 0x101   : > { %v6897_v27 = vpop.f32.mrf.mxu1  ;;  %7040 = vmatmul.mubr.msk.f32.gmra.mxu1 %vm511_vm0, %v467_v14  ;;  %7090 = vmatmul.mubr.msk.f32.gmra.mxu0 %vm511_vm0, %v3377_v18  ;;  %v1960_v14 = vcombine.high %v1956_v56, %v1956_v56  ;;  %v2681_v18 = vrot.slane %v1942_v61, %v7684_v33  ;;  %v480_v56 = vld [vmem:[%s7422_s18 + $0x3e0] sm:$0xff] }
 0x102   : > { %v3378_v30 = vmax.f32 %v3250_v25, 0.0  ;;  %7042 = vmatprep.mubr.msk.f32.mxu1 %vm511_vm0, %v468_v22  ;;  %v3253_v37 = vadd.f32 %v6897_v27, %v2661_v29  ;;  %v646_v29 = vpop.f32.mrf.mxu0 }
 0x103   : > { %v1229_v38 = vpop.f32.mrf.mxu1 }
 0x104   : > { %v3252_v5 = vadd.f32 %v2657_v31, %v1229_v38  ;;  %7092 = vmatprep.mubr.msk.f32.mxu0 %vm511_vm0, %v3378_v30  ;;  %v3381_v49 = vmax.f32 %v3253_v37, 0.0  ;;  %v1975_v30 = vrot.slane %v1961_v6, %v7661_v16  ;;  %v2689_v37 = vrot.slane %v1958_v20, %v7684_v33  ;;  %v477_v38 = vld [vmem:[%s7422_s18 + $0x3c8] sm:$0xff] }
 0x105   : > { %v6900_v43 = vpop.f32.mrf.mxu1  ;;  %7043 = vmatmul.mubr.msk.f32.gmra.mxu1 %vm511_vm0, %v469_v32  ;;  %7093 = vmatmul.mubr.msk.f32.gmra.mxu0 %vm511_vm0, %v3379_v35  ;;  %v2693_v32 = vrot.slane %v1960_v14, %v7684_v33 }
 0x106   : > { %v3380_v45 = vmax.f32 %v3252_v5, 0.0  ;;  %7045 = vmatprep.mubr.msk.f32.mxu1 %vm511_vm0, %v470_v40  ;;  %v3255_v50 = vadd.f32 %v6900_v43, %v2669_v39  ;;  %v1984_v39 = vrot.slane %v1968_v54, %v7661_v16  ;;  %v647_v43 = vadd.f32 %v7636_v58, %v646_v29 }
 0x107   : > { %v1239_v51 = vpop.f32.mrf.mxu1  ;;  %v1977_v48 = vcombine.high %v1975_v30, %v1975_v30 }
 0x108   : > { %v3254_v53 = vadd.f32 %v2665_v46, %v1239_v51  ;;  %7095 = vmatprep.mubr.msk.f32.mxu0 %vm511_vm0, %v3380_v45  ;;  %v3383_v0 = vmax.f32 %v3255_v50, 0.0  ;;  %v2701_v46 = vrot.slane %v1998_v34, %v7684_v33  ;;  %v2697_v50 = vrot.slane %v1984_v39, %v7684_v33  ;;  %v479_v51 = vld [vmem:[%s7422_s18 + $0x3d8] sm:$0xff] }
 0x109   : > { %v6903_v55 = vpop.f32.mrf.mxu1  ;;  %7046 = vmatmul.mubr.msk.f32.gmra.mxu1 %vm511_vm0, %v471_v47  ;;  %7096 = vmatmul.mubr.msk.f32.gmra.mxu0 %vm511_vm0, %v3381_v49  ;;  %v2008_v47 = vcombine.high %v1998_v34, %v1998_v34  ;;  %v2005_v61 = vrot.slane %v1977_v48, %v7661_v16 }
 0x10a   : > { %v3382_v57 = vmax.f32 %v3254_v53, 0.0  ;;  %7048 = vmatprep.mubr.msk.f32.mxu1 %vm511_vm0, %v472_v62  ;;  %v3257_v1 = vadd.f32 %v6903_v55, %v2677_v52  ;;  %v2006_v52 = vcombine.high %v1984_v39, %v1984_v39  ;;  %v2017_v55 = vrot.slane %v647_v43, %v7661_v16 }
 0x10b   : > { %v1249_v2 = vpop.f32.mrf.mxu1  ;;  %v2009_v20 = vcombine.high %v2005_v61, %v2005_v61 }
 0x10c   : > { %v3256_v7 = vadd.f32 %v2673_v59, %v1249_v2  ;;  %7098 = vmatprep.mubr.msk.f32.mxu0 %vm511_vm0, %v3382_v57  ;;  %v3385_v22 = vmax.f32 %v3257_v1, 0.0  ;;  %v2705_v1 = vrot.slane %v2006_v52, %v7684_v33  ;;  %v481_v2 = vld [vmem:[%s7422_s18 + $0x3e8] sm:$0xff] }
 0x10d   : > { %v6906_v12 = vpop.f32.mrf.mxu1  ;;  %7049 = vmatmul.mubr.msk.f32.gmra.mxu1 %vm511_vm0, %v473_v60  ;;  %7099 = vmatmul.mubr.msk.f32.gmra.mxu0 %vm511_vm0, %v3383_v0  ;;  %v2709_v60 = vrot.slane %v2008_v47, %v7684_v33 }
 0x10e   : > { %v3384_v17 = vmax.f32 %v3256_v7, 0.0  ;;  %7051 = vmatprep.mubr.msk.f32.mxu1 %vm511_vm0, %v474_v4  ;;  %v3259_v23 = vadd.f32 %v6906_v12, %v2685_v13  ;;  %v1991_v4 = vrot.slane %v1975_v30, %v7661_v16  ;;  %v2025_v12 = vcombine.high %v2017_v55, %v2017_v55  ;;  %v482_v13 = vld [vmem:[%s7422_s18 + $0x3f0] sm:$0xff] }
 0x10f   : > { %v1259_v25 = vpop.f32.mrf.mxu1 }
 0x110   : > { %v3258_v27 = vadd.f32 %v2681_v18, %v1259_v25  ;;  %7101 = vmatprep.mubr.msk.f32.mxu0 %vm511_vm0, %v3384_v17  ;;  %v3387_v40 = vmax.f32 %v3259_v23, 0.0  ;;  %v2010_v17 = vcombine.high %v647_v43, %v647_v43  ;;  %v2713_v23 = vrot.slane %v1991_v4, %v7684_v33  ;;  %v483_v25 = vld [vmem:[%s7422_s18 + $0x3f8] sm:$0xff] }
 0x111   : > { %v6909_v31 = vpop.f32.mrf.mxu1  ;;  %7052 = vmatmul.mubr.msk.f32.gmra.mxu1 %vm511_vm0, %v475_v19  ;;  %7102 = vmatmul.mubr.msk.f32.gmra.mxu0 %vm511_vm0, %v3385_v22  ;;  %v2717_v19 = vrot.slane %v2005_v61, %v7684_v33 }
 0x112   : > { %v3386_v35 = vmax.f32 %v3258_v27, 0.0  ;;  %7054 = vmatprep.mubr.msk.f32.mxu1 %vm511_vm0, %v476_v26  ;;  %v3261_v41 = vadd.f32 %v6909_v31, %v2693_v32  ;;  %v2007_v26 = vcombine.high %v1991_v4, %v1991_v4  ;;  %v2047_v31 = vrot.slane %v2025_v12, %v7661_v16 }
 0x113   : > { %v1269_v5 = vpop.f32.mrf.mxu1  ;;  %v2024_v34 = vrot.slane %v2010_v17, %v7661_v16 }
 0x114   : > { %v3260_v44 = vadd.f32 %v2689_v37, %v1269_v5  ;;  %7104 = vmatprep.mubr.msk.f32.mxu0 %vm511_vm0, %v3386_v35  ;;  %v3389_v62 = vmax.f32 %v3261_v41, 0.0  ;;  %v2725_v37 = vrot.slane %v2009_v20, %v7684_v33  ;;  %v2721_v39 = vrot.slane %v2007_v26, %v7684_v33 }
 0x115   : > { %v6912_v45 = vpop.f32.mrf.mxu1  ;;  %7055 = vmatmul.mubr.msk.f32.gmra.mxu1 %vm511_vm0, %v477_v38  ;;  %7105 = vmatmul.mubr.msk.f32.gmra.mxu0 %vm511_vm0, %v3387_v40  ;;  %v2033_v40 = vrot.slane %v2017_v55, %v7661_v16  ;;  %v2733_v43 = vrot.slane %v2047_v31, %v7684_v33  ;;  %v2026_v48 = vcombine.high %v2024_v34, %v2024_v34 }
 0x116   : > { %v3388_v49 = vmax.f32 %v3260_v44, 0.0  ;;  %7057 = vmatprep.mubr.msk.f32.mxu1 %vm511_vm0, %v478_v42  ;;  %v3263_v53 = vadd.f32 %v6912_v45, %v2701_v46  ;;  %v2057_v44 = vcombine.high %v2047_v31, %v2047_v31  ;;  %v652_v46 = vadd.f32 %v7788_v9, %v7636_v58 }
 0x117   : > { %v1279_v54 = vpop.f32.mrf.mxu1  ;;  %v2054_v9 = vrot.slane %v2026_v48, %v7661_v16  ;;  %v2040_v61 = vrot.slane %v2024_v34, %v7661_v16 }
 0x118   : > { %v3262_v57 = vadd.f32 %v2697_v50, %v1279_v54  ;;  %7107 = vmatprep.mubr.msk.f32.mxu0 %vm511_vm0, %v3388_v49  ;;  %v3391_v6 = vmax.f32 %v3263_v53, 0.0  ;;  %v2729_v50 = vrot.slane %v2033_v40, %v7684_v33  ;;  %v2741_v54 = vrot.slane %v2057_v44, %v7684_v33 }
 0x119   : > { %v6915_v59 = vpop.f32.mrf.mxu1  ;;  %7058 = vmatmul.mubr.msk.f32.gmra.mxu1 %vm511_vm0, %v479_v51  ;;  %7108 = vmatmul.mubr.msk.f32.gmra.mxu0 %vm511_vm0, %v3389_v62  ;;  %v2055_v51 = vcombine.high %v2033_v40, %v2033_v40 }
 0x11a   : > { %v3390_v0 = vmax.f32 %v3262_v57, 0.0  ;;  %7060 = vmatprep.mubr.msk.f32.mxu1 %vm511_vm0, %v480_v56  ;;  %v3265_v7 = vadd.f32 %v6915_v59, %v2709_v60  ;;  %v2066_v56 = vrot.slane %v652_v46, %v7661_v16 }
 0x11b   : > { %v1289_v10 = vpop.f32.mrf.mxu1  ;;  %v2737_v60 = vrot.slane %v2055_v51, %v7684_v33 }
 0x11c   : > { %v3264_v14 = vadd.f32 %v2705_v1, %v1289_v10  ;;  %7110 = vmatprep.mubr.msk.f32.mxu0 %vm511_vm0, %v3390_v0  ;;  %v3393_v27 = vmax.f32 %v3265_v7, 0.0  ;;  %v2059_v7 = vcombine.high %v652_v46, %v652_v46  ;;  %v2074_v10 = vcombine.high %v2066_v56, %v2066_v56 }
 0x11d   : > { %v6918_v18 = vpop.f32.mrf.mxu1  ;;  %7061 = vmatmul.mubr.msk.f32.gmra.mxu1 %vm511_vm0, %v481_v2  ;;  %7111 = vmatmul.mubr.msk.f32.gmra.mxu0 %vm511_vm0, %v3391_v6  ;;  %v7857_v6 = vpop.f32.mrf.mxu0 }
 0x11e   : > { %v3392_v22 = vmax.f32 %v3264_v14, 0.0  ;;  %7063 = vmatprep.mubr.msk.f32.mxu1 %vm511_vm0, %v482_v13  ;;  %v3267_v29 = vadd.f32 %v6918_v18, %v2717_v19  ;;  %v2749_v13 = vrot.slane %v2054_v9, %v7684_v33  ;;  %v2058_v14 = vcombine.high %v2054_v9, %v2054_v9 }
 0x11f   : > { %v1299_v30 = vpop.f32.mrf.mxu1  ;;  %v2745_v18 = vrot.slane %v2040_v61, %v7684_v33  ;;  %v2056_v19 = vcombine.high %v2040_v61, %v2040_v61  ;;  %v656_v26 = vpop.f32.mrf.mxu0  ;;  %v2096_v31 = vrot.slane %v2074_v10, %v7661_v16 }
 0x120   : > { %v3266_v32 = vadd.f32 %v2713_v23, %v1299_v30  ;;  %7113 = vmatprep.mubr.msk.f32.mxu0 %vm511_vm0, %v3392_v22  ;;  %v3395_v41 = vmax.f32 %v3267_v29, 0.0  ;;  %v2757_v30 = vrot.slane %v2058_v14, %v7684_v33  ;;  %v657_v40 = vadd.f32 %v7636_v58, %v656_v26 }
 0x121   : > { %v6921_v35 = vpop.f32.mrf.mxu1  ;;  %7064 = vmatmul.mubr.msk.f32.gmra.mxu1 %vm511_vm0, %v483_v25  ;;  %7114 = vmatmul.mubr.msk.f32.gmra.mxu0 %vm511_vm0, %v3393_v27  ;;  %v2073_v27 = vrot.slane %v2059_v7, %v7661_v16  ;;  %v2753_v34 = vrot.slane %v2056_v19, %v7684_v33 }
 0x122   : > { %v3394_v38 = vmax.f32 %v3266_v32, 0.0  ;;  %v3269_v5 = vadd.f32 %v6921_v35, %v2725_v37  ;;  %v2082_v35 = vrot.slane %v2066_v56, %v7661_v16  ;;  %v2115_v51 = vrot.slane %v657_v40, %v7661_v16 }
 0x123   : > { %v1309_v42 = vpop.f32.mrf.mxu1  ;;  %v2075_v44 = vcombine.high %v2073_v27, %v2073_v27 }
 0x124   : > { %v3268_v45 = vadd.f32 %v2721_v39, %v1309_v42  ;;  %7116 = vmatprep.mubr.msk.f32.mxu0 %vm511_vm0, %v3394_v38  ;;  %v3397_v52 = vmax.f32 %v3269_v5, 0.0  ;;  %v2765_v42 = vrot.slane %v2096_v31, %v7684_v33  ;;  %v2761_v46 = vrot.slane %v2082_v35, %v7684_v33 }
 0x125   : > { %v6924_v47 = vpop.f32.mrf.mxu1  ;;  %7117 = vmatmul.mubr.msk.f32.gmra.mxu0 %vm511_vm0, %v3395_v41  ;;  %v2123_v61 = vcombine.high %v2115_v51, %v2115_v51 }
 0x126   : > { %v3396_v49 = vmax.f32 %v3268_v45, 0.0  ;;  %v3271_v62 = vadd.f32 %v6924_v47, %v2733_v43  ;;  %v2106_v43 = vcombine.high %v2096_v31, %v2096_v31  ;;  %v2104_v47 = vcombine.high %v2082_v35, %v2082_v35 }
 0x127   : > { %v1319_v53 = vpop.f32.mrf.mxu1  ;;  %v2145_v19 = vrot.slane %v2123_v61, %v7661_v16 }
 0x128   : > { %v3270_v55 = vadd.f32 %v2729_v50, %v1319_v53  ;;  %7119 = vmatprep.mubr.msk.f32.mxu0 %vm511_vm0, %v3396_v49  ;;  %v3399_v0 = vmax.f32 %v3271_v62, 0.0  ;;  %v2773_v53 = vrot.slane %v2106_v43, %v7684_v33  ;;  %v2769_v56 = vrot.slane %v2104_v47, %v7684_v33 }
 0x129   : > { %v6927_v57 = vpop.f32.mrf.mxu1  ;;  %7120 = vmatmul.mubr.msk.f32.gmra.mxu0 %vm511_vm0, %v3397_v52  ;;  %v2155_v35 = vcombine.high %v2145_v19, %v2145_v19 }
 0x12a   : > { %v3398_v59 = vmax.f32 %v3270_v55, 0.0  ;;  %v3273_v1 = vadd.f32 %v6927_v57, %v2741_v54  ;;  %v2103_v54 = vrot.slane %v2075_v44, %v7661_v16  ;;  %v2089_v57 = vrot.slane %v2073_v27, %v7661_v16 }
 0x12b   : > { %v1329_v2 = vpop.f32.mrf.mxu1 }
 0x12c   : > { %v3272_v4 = vadd.f32 %v2737_v60, %v1329_v2  ;;  %7122 = vmatprep.mubr.msk.f32.mxu0 %vm511_vm0, %v3398_v59  ;;  %v3401_v20 = vmax.f32 %v3273_v1, 0.0  ;;  %v2108_v1 = vcombine.high %v657_v40, %v657_v40  ;;  %v2107_v7 = vcombine.high %v2103_v54, %v2103_v54 }
 0x12d   : > { %v6930_v12 = vpop.f32.mrf.mxu1  ;;  %7123 = vmatmul.mubr.msk.f32.gmra.mxu0 %vm511_vm0, %v3399_v0 }
 0x12e   : > { %v3400_v17 = vmax.f32 %v3272_v4, 0.0  ;;  %v3275_v22 = vadd.f32 %v6930_v12, %v2749_v13  ;;  %v2781_v4 = vrot.slane %v2103_v54, %v7684_v33  ;;  %v2777_v12 = vrot.slane %v2089_v57, %v7684_v33 }
 0x12f   : > { %v1339_v23 = vpop.f32.mrf.mxu1  ;;  %v2105_v13 = vcombine.high %v2089_v57, %v2089_v57 }
 0x130   : > { %v3274_v25 = vadd.f32 %v2745_v18, %v1339_v23  ;;  %7125 = vmatprep.mubr.msk.f32.mxu0 %vm511_vm0, %v3400_v17  ;;  %v3403_v37 = vmax.f32 %v3275_v22, 0.0  ;;  %v2122_v22 = vrot.slane %v2108_v1, %v7661_v16 }
 0x131   : > { %v6933_v29 = vpop.f32.mrf.mxu1  ;;  %7126 = vmatmul.mubr.msk.f32.gmra.mxu0 %vm511_vm0, %v3401_v20  ;;  %v2785_v27 = vrot.slane %v2105_v13, %v7684_v33 }
 0x132   : > { %v3402_v32 = vmax.f32 %v3274_v25, 0.0  ;;  %v3277_v38 = vadd.f32 %v6933_v29, %v2757_v30  ;;  %v2789_v25 = vrot.slane %v2107_v7, %v7684_v33  ;;  %v2131_v29 = vrot.slane %v2115_v51, %v7661_v16 }
 0x133   : > { %v1349_v39 = vpop.f32.mrf.mxu1  ;;  %v2124_v40 = vcombine.high %v2122_v22, %v2122_v22  ;;  %v2138_v51 = vrot.slane %v2122_v22, %v7661_v16 }
 0x134   : > { %v3276_v41 = vadd.f32 %v2753_v34, %v1349_v39  ;;  %7128 = vmatprep.mubr.msk.f32.mxu0 %vm511_vm0, %v3402_v32  ;;  %v3405_v48 = vmax.f32 %v3277_v38, 0.0  ;;  %v2797_v34 = vrot.slane %v2145_v19, %v7684_v33  ;;  %v662_v38 = vadd.f32 %v7857_v6, %v7636_v58 }
 0x135   : > { %v6936_v5 = vpop.f32.mrf.mxu1  ;;  %7129 = vmatmul.mubr.msk.f32.gmra.mxu0 %vm511_vm0, %v3403_v37  ;;  %v2152_v58 = vrot.slane %v2124_v40, %v7661_v16  ;;  %v2809_v61 = vrot.slane %v2138_v51, %v7684_v33  ;;  %v2213_v40 = vrot.slane %v7647_v3, %v7661_v16 }
 0x136   : > { %v3404_v45 = vmax.f32 %v3276_v41, 0.0  ;;  %v3279_v49 = vadd.f32 %v6936_v5, %v2765_v42  ;;  %v2793_v5 = vrot.slane %v2131_v29, %v7684_v33  ;;  %v2153_v42 = vcombine.high %v2131_v29, %v2131_v29 }
 0x137   : > { %v1359_v50 = vpop.f32.mrf.mxu1 }
 0x138   : > { %v3278_v52 = vadd.f32 %v2761_v46, %v1359_v50  ;;  %7131 = vmatprep.mubr.msk.f32.mxu0 %vm511_vm0, %v3404_v45  ;;  %v3407_v9 = vmax.f32 %v3279_v49, 0.0  ;;  %v2805_v46 = vrot.slane %v2155_v35, %v7684_v33  ;;  %v2801_v50 = vrot.slane %v2153_v42, %v7684_v33 }
 0x139   : > { %v6939_v62 = vpop.f32.mrf.mxu1  ;;  %7132 = vmatmul.mubr.msk.f32.gmra.mxu0 %vm511_vm0, %v3405_v48  ;;  %v2164_v48 = vrot.slane %v662_v38, %v7661_v16 }
 0x13a   : > { %v3406_v55 = vmax.f32 %v3278_v52, 0.0  ;;  %v3281_v59 = vadd.f32 %v6939_v62, %v2773_v53 }
 0x13b   : > { %v1369_v60 = vpop.f32.mrf.mxu1  ;;  %v2180_v19 = vrot.slane %v2164_v48, %v7661_v16 }
 0x13c   : > { %v3280_v0 = vadd.f32 %v2769_v56, %v1369_v60  ;;  %7134 = vmatprep.mubr.msk.f32.mxu0 %vm511_vm0, %v3406_v55  ;;  %v3409_v14 = vmax.f32 %v3281_v59, 0.0  ;;  %v2157_v55 = vcombine.high %v662_v38, %v662_v38  ;;  %v2172_v56 = vcombine.high %v2164_v48, %v2164_v48 }
 0x13d   : > { %v6942_v2 = vpop.f32.mrf.mxu1  ;;  %7135 = vmatmul.mubr.msk.f32.gmra.mxu0 %vm511_vm0, %v3407_v9  ;;  %v2813_v9 = vrot.slane %v2152_v58, %v7684_v33  ;;  %v2156_v59 = vcombine.high %v2152_v58, %v2152_v58  ;;  %v2206_v58 = vcombine.high %v7647_v3, %v7647_v3 }
 0x13e   : > { %v3408_v10 = vmax.f32 %v3280_v0, 0.0  ;;  %v3283_v17 = vadd.f32 %v6942_v2, %v2781_v4  ;;  %v2154_v0 = vcombine.high %v2138_v51, %v2138_v51 }
 0x13f   : > { %v1379_v18 = vpop.f32.mrf.mxu1  ;;  %v2821_v13 = vrot.slane %v2156_v59, %v7684_v33  ;;  %v2220_v59 = vrot.slane %v2206_v58, %v7661_v16 }
 0x140   : > { %v3282_v20 = vadd.f32 %v2777_v12, %v1379_v18  ;;  %7137 = vmatprep.mubr.msk.f32.mxu0 %vm511_vm0, %v3408_v10  ;;  %v3411_v30 = vmax.f32 %v3283_v17, 0.0  ;;  %v2171_v10 = vrot.slane %v2157_v55, %v7661_v16  ;;  %v2817_v18 = vrot.slane %v2154_v0, %v7684_v33 }
 0x141   : > { %v6945_v23 = vpop.f32.mrf.mxu1  ;;  %7138 = vmatmul.mubr.msk.f32.gmra.mxu0 %vm511_vm0, %v3409_v14  ;;  %v2194_v14 = vrot.slane %v2172_v56, %v7661_v16 }
 0x142   : > { %v3410_v26 = vmax.f32 %v3282_v20, 0.0  ;;  %v3285_v31 = vadd.f32 %v6945_v23, %v2789_v25 }
 0x143   : > { %v1389_v32 = vpop.f32.mrf.mxu1  ;;  %v2204_v29 = vcombine.high %v2194_v14, %v2194_v14 }
 0x144   : > { %v3284_v37 = vadd.f32 %v2785_v27, %v1389_v32  ;;  %7140 = vmatprep.mubr.msk.f32.mxu0 %vm511_vm0, %v3410_v26  ;;  %v3413_v43 = vmax.f32 %v3285_v31, 0.0  ;;  %v2829_v27 = vrot.slane %v2194_v14, %v7684_v33  ;;  %v2825_v32 = vrot.slane %v2180_v19, %v7684_v33 }
 0x145   : > { %v6948_v39 = vpop.f32.mrf.mxu1  ;;  %7141 = vmatmul.mubr.msk.f32.gmra.mxu0 %vm511_vm0, %v3411_v30  ;;  %v2173_v30 = vcombine.high %v2171_v10, %v2171_v10 }
 0x146   : > { %v3412_v41 = vmax.f32 %v3284_v37, 0.0  ;;  %v3287_v44 = vadd.f32 %v6948_v39, %v2797_v34  ;;  %v2202_v34 = vcombine.high %v2180_v19, %v2180_v19 }
 0x147   : > { %v1399_v45 = vpop.f32.mrf.mxu1  ;;  %v2201_v42 = vrot.slane %v2173_v30, %v7661_v16 }
 0x148   : > { %v3286_v47 = vadd.f32 %v2793_v5, %v1399_v45  ;;  %7143 = vmatprep.mubr.msk.f32.mxu0 %vm511_vm0, %v3412_v41  ;;  %v3415_v52 = vmax.f32 %v3287_v44, 0.0  ;;  %v2837_v5 = vrot.slane %v2204_v29, %v7684_v33  ;;  %v2833_v44 = vrot.slane %v2202_v34, %v7684_v33 }
 0x149   : > { %v6951_v49 = vpop.f32.mrf.mxu1  ;;  %7144 = vmatmul.mubr.msk.f32.gmra.mxu0 %vm511_vm0, %v3413_v43  ;;  %v2187_v45 = vrot.slane %v2171_v10, %v7661_v16  ;;  %v2845_v51 = vrot.slane %v2201_v42, %v7684_v33  ;;  %v2262_v29 = vrot.slane %v7641_v63, %v7661_v16 }
 0x14a   : > { %v3414_v6 = vmax.f32 %v3286_v47, 0.0  ;;  %v3289_v62 = vadd.f32 %v6951_v49, %v2805_v46 }
 0x14b   : > { %v1409_v53 = vpop.f32.mrf.mxu1 }
 0x14c   : > { %v3288_v54 = vadd.f32 %v2801_v50, %v1409_v53  ;;  %7146 = vmatprep.mubr.msk.f32.mxu0 %vm511_vm0, %v3414_v6  ;;  %v3417_v1 = vmax.f32 %v3289_v62, 0.0  ;;  %v2221_v6 = vcombine.high %v2213_v40, %v2213_v40  ;;  %v2841_v53 = vrot.slane %v2187_v45, %v7684_v33 }
 0x14d   : > { %v6954_v57 = vpop.f32.mrf.mxu1  ;;  %7147 = vmatmul.mubr.msk.f32.gmra.mxu0 %vm511_vm0, %v3415_v52  ;;  %v2205_v52 = vcombine.high %v2201_v42, %v2201_v42  ;;  %v2270_v42 = vcombine.high %v2262_v29, %v2262_v29 }
 0x14e   : > { %v3416_v60 = vmax.f32 %v3288_v54, 0.0  ;;  %v3291_v2 = vadd.f32 %v6954_v57, %v2813_v9  ;;  %v2203_v54 = vcombine.high %v2187_v45, %v2187_v45 }
 0x14f   : > { %v1419_v4 = vpop.f32.mrf.mxu1 }
 0x150   : > { %v3290_v7 = vadd.f32 %v2809_v61, %v1419_v4  ;;  %7149 = vmatprep.mubr.msk.f32.mxu0 %vm511_vm0, %v3416_v60  ;;  %v3419_v20 = vmax.f32 %v3291_v2, 0.0  ;;  %v2853_v60 = vrot.slane %v2205_v52, %v7684_v33  ;;  %v2243_v61 = vrot.slane %v2221_v6, %v7661_v16 }
 0x151   : > { %v6957_v12 = vpop.f32.mrf.mxu1  ;;  %7150 = vmatmul.mubr.msk.f32.gmra.mxu0 %vm511_vm0, %v3417_v1  ;;  %v2849_v1 = vrot.slane %v2203_v54, %v7684_v33  ;;  %v2229_v2 = vrot.slane %v2213_v40, %v7661_v16 }
 0x152   : > { %v3418_v17 = vmax.f32 %v3290_v7, 0.0  ;;  %v3293_v22 = vadd.f32 %v6957_v12, %v2821_v13  ;;  %v2861_v14 = vrot.slane %v2243_v61, %v7684_v33 }
 0x153   : > { %v1429_v23 = vpop.f32.mrf.mxu1 }
 0x154   : > { %v3292_v25 = vadd.f32 %v2817_v18, %v1429_v23  ;;  %7152 = vmatprep.mubr.msk.f32.mxu0 %vm511_vm0, %v3418_v17  ;;  %v3421_v35 = vmax.f32 %v3293_v22, 0.0  ;;  %v2253_v17 = vcombine.high %v2243_v61, %v2243_v61  ;;  %v2222_v18 = vcombine.high %v2220_v59, %v2220_v59 }
 0x155   : > { %v6960_v26 = vpop.f32.mrf.mxu1  ;;  %7153 = vmatmul.mubr.msk.f32.gmra.mxu0 %vm511_vm0, %v3419_v20  ;;  %v2857_v20 = vrot.slane %v2229_v2, %v7684_v33  ;;  %v2251_v22 = vcombine.high %v2229_v2, %v2229_v2 }
 0x156   : > { %v3420_v31 = vmax.f32 %v3292_v25, 0.0  ;;  %v3295_v37 = vadd.f32 %v6960_v26, %v2829_v27 }
 0x157   : > { %v1439_v38 = vpop.f32.mrf.mxu1 }
 0x158   : > { %v3294_v39 = vadd.f32 %v2825_v32, %v1439_v38  ;;  %7155 = vmatprep.mubr.msk.f32.mxu0 %vm511_vm0, %v3420_v31  ;;  %v3423_v46 = vmax.f32 %v3295_v37, 0.0  ;;  %v2869_v31 = vrot.slane %v2253_v17, %v7684_v33  ;;  %v2250_v32 = vrot.slane %v2222_v18, %v7661_v16 }
 0x159   : > { %v6963_v41 = vpop.f32.mrf.mxu1  ;;  %7156 = vmatmul.mubr.msk.f32.gmra.mxu0 %vm511_vm0, %v3421_v35  ;;  %v2865_v35 = vrot.slane %v2251_v22, %v7684_v33  ;;  %v2236_v37 = vrot.slane %v2220_v59, %v7661_v16 }
 0x15a   : > { %v3422_v43 = vmax.f32 %v3294_v39, 0.0  ;;  %v3297_v47 = vadd.f32 %v6963_v41, %v2837_v5  ;;  %v2255_v5 = vcombine.high %v7641_v63, %v7641_v63  ;;  %v2254_v45 = vcombine.high %v2250_v32, %v2250_v32 }
 0x15b   : > { %v1449_v48 = vpop.f32.mrf.mxu1 }
 0x15c   : > { %v3296_v49 = vadd.f32 %v2833_v44, %v1449_v48  ;;  %7158 = vmatprep.mubr.msk.f32.mxu0 %vm511_vm0, %v3422_v43  ;;  %v3425_v55 = vmax.f32 %v3297_v47, 0.0  ;;  %v2877_v44 = vrot.slane %v2250_v32, %v7684_v33  ;;  %v2873_v47 = vrot.slane %v2236_v37, %v7684_v33 }
 0x15d   : > { %v6966_v50 = vpop.f32.mrf.mxu1  ;;  %7159 = vmatmul.mubr.msk.f32.gmra.mxu0 %vm511_vm0, %v3423_v46  ;;  %v2252_v48 = vcombine.high %v2236_v37, %v2236_v37  ;;  %v2885_v52 = vrot.slane %v2254_v45, %v7684_v33 }
 0x15e   : > { %v3424_v62 = vmax.f32 %v3296_v49, 0.0  ;;  %v3299_v56 = vadd.f32 %v6966_v50, %v2845_v51  ;;  %v2269_v51 = vrot.slane %v2255_v5, %v7661_v16 }
 0x15f   : > { %v1459_v57 = vpop.f32.mrf.mxu1  ;;  %v2881_v54 = vrot.slane %v2252_v48, %v7684_v33 }
 0x160   : > { %v3298_v9 = vadd.f32 %v2841_v53, %v1459_v57  ;;  %7161 = vmatprep.mubr.msk.f32.mxu0 %vm511_vm0, %v3424_v62  ;;  %v3427_v4 = vmax.f32 %v3299_v56, 0.0  ;;  %v2292_v62 = vrot.slane %v2270_v42, %v7661_v16 }
 0x161   : > { %v6969_v3 = vpop.f32.mrf.mxu1  ;;  %7162 = vmatmul.mubr.msk.f32.gmra.mxu0 %vm511_vm0, %v3425_v55  ;;  %v2278_v55 = vrot.slane %v2262_v29, %v7661_v16 }
 0x162   : > { %v3426_v0 = vmax.f32 %v3298_v9, 0.0  ;;  %v3301_v7 = vadd.f32 %v6969_v3, %v2853_v60  ;;  %v2893_v60 = vrot.slane %v2292_v62, %v7684_v33  ;;  %v2302_v61 = vcombine.high %v2292_v62, %v2292_v62 }
 0x163   : > { %v1469_v10 = vpop.f32.mrf.mxu1  ;;  %v2889_v2 = vrot.slane %v2278_v55, %v7684_v33 }
 0x164   : > { %v3300_v12 = vadd.f32 %v2849_v1, %v1469_v10  ;;  %7164 = vmatprep.mubr.msk.f32.mxu0 %vm511_vm0, %v3426_v0  ;;  %v3429_v23 = vmax.f32 %v3301_v7, 0.0  ;;  %v2271_v0 = vcombine.high %v2269_v51, %v2269_v51  ;;  %v2901_v18 = vrot.slane %v2302_v61, %v7684_v33 }
 0x165   : > { %v6972_v13 = vpop.f32.mrf.mxu1  ;;  %7165 = vmatmul.mubr.msk.f32.gmra.mxu0 %vm511_vm0, %v3427_v4  ;;  %v2300_v4 = vcombine.high %v2278_v55, %v2278_v55 }
 0x166   : > { %v3428_v19 = vmax.f32 %v3300_v12, 0.0  ;;  %v3303_v25 = vadd.f32 %v6972_v13, %v2861_v14  ;;  %v2311_v14 = vrot.slane %v7658_v15, %v7661_v16 }
 0x167   : > { %v1479_v26 = vpop.f32.mrf.mxu1  ;;  %v2897_v22 = vrot.slane %v2300_v4, %v7684_v33 }
 0x168   : > { %v3302_v27 = vadd.f32 %v2857_v20, %v1479_v26  ;;  %7167 = vmatprep.mubr.msk.f32.mxu0 %vm511_vm0, %v3428_v19  ;;  %v3431_v38 = vmax.f32 %v3303_v25, 0.0  ;;  %v2299_v19 = vrot.slane %v2271_v0, %v7661_v16  ;;  %v2327_v48 = vrot.slane %v2311_v14, %v7661_v16 }
 0x169   : > { %v6975_v30 = vpop.f32.mrf.mxu1  ;;  %7168 = vmatmul.mubr.msk.f32.gmra.mxu0 %vm511_vm0, %v3429_v23  ;;  %v2285_v23 = vrot.slane %v2269_v51, %v7661_v16 }
 0x16a   : > { %v3430_v34 = vmax.f32 %v3302_v27, 0.0  ;;  %v3305_v39 = vadd.f32 %v6975_v30, %v2869_v31  ;;  %v2304_v30 = vcombine.high %v7658_v15, %v7658_v15  ;;  %v2319_v31 = vcombine.high %v2311_v14, %v2311_v14 }
 0x16b   : > { %v1489_v40 = vpop.f32.mrf.mxu1  ;;  %v2349_v55 = vcombine.high %v2327_v48, %v2327_v48  ;;  %v2353_v14 = vcombine.high %v7653_v11, %v7653_v11 }
 0x16c   : > { %v3304_v41 = vadd.f32 %v2865_v35, %v1489_v40  ;;  %7170 = vmatprep.mubr.msk.f32.mxu0 %vm511_vm0, %v3430_v34  ;;  %v3433_v49 = vmax.f32 %v3305_v39, 0.0  ;;  %v2909_v34 = vrot.slane %v2299_v19, %v7684_v33  ;;  %v2303_v35 = vcombine.high %v2299_v19, %v2299_v19 }
 0x16d   : > { %v6978_v43 = vpop.f32.mrf.mxu1  ;;  %7171 = vmatmul.mubr.msk.f32.gmra.mxu0 %vm511_vm0, %v3431_v38  ;;  %v2905_v38 = vrot.slane %v2285_v23, %v7684_v33  ;;  %v2301_v39 = vcombine.high %v2285_v23, %v2285_v23  ;;  %v2341_v45 = vrot.slane %v2319_v31, %v7661_v16  ;;  %v2367_v31 = vrot.slane %v2353_v14, %v7661_v16 }
 0x16e   : > { %v3432_v46 = vmax.f32 %v3304_v41, 0.0  ;;  %v3307_v58 = vadd.f32 %v6978_v43, %v2877_v44  ;;  %v2318_v43 = vrot.slane %v2304_v30, %v7661_v16  ;;  %v2917_v44 = vrot.slane %v2303_v35, %v7684_v33 }
 0x16f   : > { %v1499_v6 = vpop.f32.mrf.mxu1 }
 0x170   : > { %v3306_v50 = vadd.f32 %v2873_v47, %v1499_v6  ;;  %7173 = vmatprep.mubr.msk.f32.mxu0 %vm511_vm0, %v3432_v46  ;;  %v3435_v56 = vmax.f32 %v3307_v58, 0.0  ;;  %v2913_v47 = vrot.slane %v2301_v39, %v7684_v33  ;;  %v2320_v62 = vcombine.high %v2318_v43, %v2318_v43 }
 0x171   : > { %v6981_v63 = vpop.f32.mrf.mxu1  ;;  %7174 = vmatmul.mubr.msk.f32.gmra.mxu0 %vm511_vm0, %v3433_v49  ;;  %v2334_v4 = vrot.slane %v2318_v43, %v7661_v16 }
 0x172   : > { %v3434_v53 = vmax.f32 %v3306_v50, 0.0  ;;  %v3309_v57 = vadd.f32 %v6981_v63, %v2885_v52  ;;  %v2925_v63 = vrot.slane %v2341_v45, %v7684_v33  ;;  %v2351_v52 = vcombine.high %v2341_v45, %v2341_v45 }
 0x173   : > { %v1509_v9 = vpop.f32.mrf.mxu1  ;;  %v2348_v0 = vrot.slane %v2320_v62, %v7661_v16  ;;  %v2937_v23 = vrot.slane %v2334_v4, %v7684_v33 }
 0x174   : > { %v3308_v59 = vadd.f32 %v2881_v54, %v1509_v9  ;;  %7176 = vmatprep.mubr.msk.f32.mxu0 %vm511_vm0, %v3434_v53  ;;  %v3437_v7 = vmax.f32 %v3309_v57, 0.0  ;;  %v2921_v54 = vrot.slane %v2327_v48, %v7684_v33  ;;  %v2933_v61 = vrot.slane %v2351_v52, %v7684_v33 }
 0x175   : > { %v6984_v3 = vpop.f32.mrf.mxu1  ;;  %7177 = vmatmul.mubr.msk.f32.gmra.mxu0 %vm511_vm0, %v3435_v56  ;;  %v2941_v19 = vrot.slane %v2348_v0, %v7684_v33 }
 0x176   : > { %v3436_v1 = vmax.f32 %v3308_v59, 0.0  ;;  %v3311_v10 = vadd.f32 %v6984_v3, %v2893_v60  ;;  %v2360_v3 = vrot.slane %v7653_v11, %v7661_v16 }
 0x177   : > { %v1519_v12 = vpop.f32.mrf.mxu1 }
 0x178   : > { %v3310_v13 = vadd.f32 %v2889_v2, %v1519_v12  ;;  %7179 = vmatprep.mubr.msk.f32.mxu0 %vm511_vm0, %v3436_v1  ;;  %v3439_v25 = vmax.f32 %v3311_v10, 0.0  ;;  %v2929_v2 = vrot.slane %v2349_v55, %v7684_v33 }
 0x179   : > { %v6987_v17 = vpop.f32.mrf.mxu1  ;;  %7180 = vmatmul.mubr.msk.f32.gmra.mxu0 %vm511_vm0, %v3437_v7 }
 0x17a   : > { %v3438_v20 = vmax.f32 %v3310_v13, 0.0  ;;  %v3313_v26 = vadd.f32 %v6987_v17, %v2901_v18  ;;  %v2368_v17 = vcombine.high %v2360_v3, %v2360_v3 }
 0x17b   : > { %v1529_v27 = vpop.f32.mrf.mxu1 }
 0x17c   : > { %v3312_v29 = vadd.f32 %v2897_v22, %v1529_v27  ;;  %7182 = vmatprep.mubr.msk.f32.mxu0 %vm511_vm0, %v3438_v20  ;;  %v3441_v40 = vmax.f32 %v3313_v26, 0.0  ;;  %v2352_v20 = vcombine.high %v2348_v0, %v2348_v0 }
 0x17d   : > { %v6990_v32 = vpop.f32.mrf.mxu1  ;;  %7183 = vmatmul.mubr.msk.f32.gmra.mxu0 %vm511_vm0, %v3439_v25  ;;  %v2350_v25 = vcombine.high %v2334_v4, %v2334_v4 }
 0x17e   : > { %v3440_v37 = vmax.f32 %v3312_v29, 0.0  ;;  %v3315_v41 = vadd.f32 %v6990_v32, %v2909_v34  ;;  %v2949_v32 = vrot.slane %v2352_v20, %v7684_v33  ;;  %v2390_v34 = vrot.slane %v2368_v17, %v7661_v16 }
 0x17f   : > { %v1539_v5 = vpop.f32.mrf.mxu1 }
 0x180   : > { %v3314_v42 = vadd.f32 %v2905_v38, %v1539_v5  ;;  %7185 = vmatprep.mubr.msk.f32.mxu0 %vm511_vm0, %v3440_v37  ;;  %v3443_v49 = vmax.f32 %v3315_v41, 0.0  ;;  %v2945_v37 = vrot.slane %v2350_v25, %v7684_v33  ;;  %v2376_v38 = vrot.slane %v2360_v3, %v7661_v16 }
 0x181   : > { %v6993_v15 = vpop.f32.mrf.mxu1  ;;  %7186 = vmatmul.mubr.msk.f32.gmra.mxu0 %vm511_vm0, %v3441_v40  ;;  %v2957_v43 = vrot.slane %v2390_v34, %v7684_v33 }
 0x182   : > { %v3442_v46 = vmax.f32 %v3314_v42, 0.0  ;;  %v3317_v58 = vadd.f32 %v6993_v15, %v2917_v44  ;;  %v2400_v15 = vcombine.high %v2390_v34, %v2390_v34  ;;  %v2369_v44 = vcombine.high %v2367_v31, %v2367_v31 }
 0x183   : > { %v1549_v6 = vpop.f32.mrf.mxu1 }
 0x184   : > { %v3316_v50 = vadd.f32 %v2913_v47, %v1549_v6  ;;  %7188 = vmatprep.mubr.msk.f32.mxu0 %vm511_vm0, %v3442_v46  ;;  %v3445_v56 = vmax.f32 %v3317_v58, 0.0  ;;  %v2953_v46 = vrot.slane %v2376_v38, %v7684_v33  ;;  %v2398_v47 = vcombine.high %v2376_v38, %v2376_v38 }
 0x185   : > { %v6996_v51 = vpop.f32.mrf.mxu1  ;;  %7189 = vmatmul.mubr.msk.f32.gmra.mxu0 %vm511_vm0, %v3443_v49  ;;  %v2397_v52 = vrot.slane %v2369_v44, %v7661_v16  ;;  %v8060_v44 = vrot.slane %v7689_v36, %v7661_v16 }
 0x186   : > { %v3444_v53 = vmax.f32 %v3316_v50, 0.0  ;;  %v3319_v57 = vadd.f32 %v6996_v51, %v2925_v63  ;;  %v2409_v50 = vrot.slane %v7672_v24, %v7661_v16  ;;  %v2965_v63 = vrot.slane %v2400_v15, %v7684_v33 }
 0x187   : > { %v1559_v9 = vpop.f32.mrf.mxu1  ;;  %v2401_v0 = vcombine.high %v2397_v52, %v2397_v52  ;;  %v2500_v15 = vcombine.high %v7689_v36, %v7689_v36 }
 0x188   : > { %v3318_v59 = vadd.f32 %v2921_v54, %v1559_v9  ;;  %7191 = vmatprep.mubr.msk.f32.mxu0 %vm511_vm0, %v3444_v53  ;;  %v3447_v7 = vmax.f32 %v3319_v57, 0.0  ;;  %v2961_v53 = vrot.slane %v2398_v47, %v7684_v33  ;;  %v2383_v54 = vrot.slane %v2367_v31, %v7661_v16 }
 0x189   : > { %v6999_v60 = vpop.f32.mrf.mxu1  ;;  %7192 = vmatmul.mubr.msk.f32.gmra.mxu0 %vm511_vm0, %v3445_v56  ;;  %v2417_v3 = vcombine.high %v2409_v50, %v2409_v50 }
 0x18a   : > { %v3446_v1 = vmax.f32 %v3318_v59, 0.0  ;;  %v3321_v10 = vadd.f32 %v6999_v60, %v2933_v61  ;;  %v2402_v59 = vcombine.high %v7672_v24, %v7672_v24  ;;  %v2973_v61 = vrot.slane %v2397_v52, %v7684_v33 }
 0x18b   : > { %v1569_v12 = vpop.f32.mrf.mxu1  ;;  %v2399_v4 = vcombine.high %v2383_v54, %v2383_v54  ;;  %v2458_v24 = vrot.slane %v7668_v21, %v7661_v16 }
 0x18c   : > { %v3320_v13 = vadd.f32 %v2929_v2, %v1569_v12  ;;  %7194 = vmatprep.mubr.msk.f32.mxu0 %vm511_vm0, %v3446_v1  ;;  %v3449_v26 = vmax.f32 %v3321_v10, 0.0  ;;  %v2969_v2 = vrot.slane %v2383_v54, %v7684_v33  ;;  %v2416_v14 = vrot.slane %v2402_v59, %v7661_v16 }
 0x18d   : > { %v7002_v18 = vpop.f32.mrf.mxu1  ;;  %7195 = vmatmul.mubr.msk.f32.gmra.mxu0 %vm511_vm0, %v3447_v7  ;;  %v2466_v31 = vcombine.high %v2458_v24, %v2458_v24 }
 0x18e   : > { %v3448_v22 = vmax.f32 %v3320_v13, 0.0  ;;  %v3323_v27 = vadd.f32 %v7002_v18, %v2941_v19  ;;  %v2981_v18 = vrot.slane %v2401_v0, %v7684_v33  ;;  %v2439_v19 = vrot.slane %v2417_v3, %v7661_v16 }
 0x18f   : > { %v1579_v29 = vpop.f32.mrf.mxu1 }
 0x190   : > { %v3322_v30 = vadd.f32 %v2937_v23, %v1579_v29  ;;  %7197 = vmatprep.mubr.msk.f32.mxu0 %vm511_vm0, %v3448_v22  ;;  %v3451_v39 = vmax.f32 %v3323_v27, 0.0  ;;  %v2977_v22 = vrot.slane %v2399_v4, %v7684_v33  ;;  %v2425_v23 = vrot.slane %v2409_v50, %v7661_v16 }
 0x191   : > { %v7005_v11 = vpop.f32.mrf.mxu1  ;;  %7198 = vmatmul.mubr.msk.f32.gmra.mxu0 %vm511_vm0, %v3449_v26  ;;  %v2451_v29 = vcombine.high %v7668_v21, %v7668_v21  ;;  %v2449_v34 = vcombine.high %v2439_v19, %v2439_v19  ;;  %v2549_v21 = vcombine.high %v7677_v28, %v7677_v28 }
 0x192   : > { %v3450_v35 = vmax.f32 %v3322_v30, 0.0  ;;  %v3325_v40 = vadd.f32 %v7005_v11, %v2949_v32  ;;  %v2989_v32 = vrot.slane %v2439_v19, %v7684_v33  ;;  %v2985_v38 = vrot.slane %v2425_v23, %v7684_v33 }
 0x193   : > { %v1589_v41 = vpop.f32.mrf.mxu1  ;;  %v8072_v50 = vrot.slane %v2549_v21, %v7661_v16 }
 0x194   : > { %v3324_v5 = vadd.f32 %v2945_v37, %v1589_v41  ;;  %7200 = vmatprep.mubr.msk.f32.mxu0 %vm511_vm0, %v3450_v35  ;;  %v3453_v48 = vmax.f32 %v3325_v40, 0.0  ;;  %v2418_v35 = vcombine.high %v2416_v14, %v2416_v14  ;;  %v2432_v40 = vrot.slane %v2416_v14, %v7661_v16 }
 0x195   : > { %v7008_v42 = vpop.f32.mrf.mxu1  ;;  %7201 = vmatmul.mubr.msk.f32.gmra.mxu0 %vm511_vm0, %v3451_v39  ;;  %v2447_v39 = vcombine.high %v2425_v23, %v2425_v23 }
 0x196   : > { %v3452_v45 = vmax.f32 %v3324_v5, 0.0  ;;  %v3327_v49 = vadd.f32 %v7008_v42, %v2957_v43  ;;  %v8054_v43 = vrot.slane %v7677_v28, %v7661_v16  ;;  %v2446_v28 = vrot.slane %v2418_v35, %v7661_v16 }
 0x197   : > { %v1599_v58 = vpop.f32.mrf.mxu1  ;;  %v2448_v36 = vcombine.high %v2432_v40, %v2432_v40  ;;  %v3001_v4 = vrot.slane %v2432_v40, %v7684_v33 }
 0x198   : > { %v3326_v6 = vadd.f32 %v2953_v46, %v1599_v58  ;;  %7203 = vmatprep.mubr.msk.f32.mxu0 %vm511_vm0, %v3452_v45  ;;  %v3455_v55 = vmax.f32 %v3327_v49, 0.0  ;;  %v2465_v46 = vrot.slane %v2451_v29, %v7661_v16  ;;  %v8068_v49 = vrot.slane %v2466_v31, %v7661_v16 }
 0x199   : > { %v7011_v51 = vpop.f32.mrf.mxu1  ;;  %7204 = vmatmul.mubr.msk.f32.gmra.mxu0 %vm511_vm0, %v3453_v48  ;;  %v2997_v48 = vrot.slane %v2449_v34, %v7684_v33  ;;  %v2564_v54 = vcombine.high %v8054_v43, %v8054_v43  ;;  %v3005_v59 = vrot.slane %v2446_v28, %v7684_v33 }
 0x19a   : > { %v3454_v62 = vmax.f32 %v3326_v6, 0.0  ;;  %v3329_v56 = vadd.f32 %v7011_v51, %v2965_v63  ;;  %v2993_v6 = vrot.slane %v2447_v39, %v7684_v33  ;;  %v2467_v0 = vcombine.high %v2465_v46, %v2465_v46 }
 0x19b   : > { %v1609_v57 = vpop.f32.mrf.mxu1  ;;  %v3021_v14 = vrot.slane %v8068_v49, %v7684_v33  ;;  %v8109_v23 = vrot.slane %v2465_v46, %v7661_v16 }
 0x19c   : > { %v3328_v9 = vadd.f32 %v2961_v53, %v1609_v57  ;;  %7206 = vmatprep.mubr.msk.f32.mxu0 %vm511_vm0, %v3454_v62  ;;  %v3457_v7 = vmax.f32 %v3329_v56, 0.0  ;;  %v8077_v62 = vld [vmem:[%s9077_s6] ss:$0 sm:$0xff]  ;;  %v8080_v53 = vrot.slane %v2458_v24, %v7661_v16  ;;  %v2515_v56 = vcombine.high %v8060_v44, %v8060_v44 }
 0x19d   : > { %v7014_v60 = vpop.f32.mrf.mxu1  ;;  %7207 = vmatmul.mubr.msk.f32.gmra.mxu0 %vm511_vm0, %v3455_v55  ;;  %v8085_v55 = vrot.slane %v2500_v15, %v7661_v16  ;;  %v8117_v31 = vrot.slane %v2467_v0, %v7661_v16 }
 0x19e   : > { %v3456_v1 = vmax.f32 %v3328_v9, 0.0  ;;  %v3331_v10 = vadd.f32 %v7014_v60, %v2973_v61  ;;  %v2450_v60 = vcombine.high %v2446_v28, %v2446_v28  ;;  %v2498_v61 = vcombine.high %v8068_v49, %v8068_v49 }
 0x19f   : > { %v1619_v12 = vpop.f32.mrf.mxu1  ;;  %v3017_v29 = vrot.slane %v8080_v53, %v7684_v33  ;;  %v8121_v35 = vrot.slane %v2515_v56, %v7661_v16  ;;  %v3033_v49 = vrot.slane %v8109_v23, %v7684_v33 }
 0x1a0   : > { %v3330_v13 = vadd.f32 %v2969_v2, %v1619_v12  ;;  %7209 = vmatprep.mubr.msk.f32.mxu0 %vm511_vm0, %v3456_v1  ;;  %v3459_v25 = vmax.f32 %v3331_v10, 0.0 }
 0x1a1   : > { %v7017_v17 = vpop.f32.mrf.mxu1  ;;  %7210 = vmatmul.mubr.msk.f32.gmra.mxu0 %vm511_vm0, %v3457_v7  ;;  %v3009_v7 = vrot.slane %v2448_v36, %v7684_v33 }
 0x1a2   : > { %v3458_v20 = vmax.f32 %v3330_v13, 0.0  ;;  %v3333_v26 = vadd.f32 %v7017_v17, %v2981_v18  ;;  %v2496_v17 = vcombine.high %v8080_v53, %v8080_v53 }
 0x1a3   : > { %v1629_v27 = vpop.f32.mrf.mxu1 }
 0x1a4   : > { %v3332_v30 = vadd.f32 %v2977_v22, %v1629_v27  ;;  %7212 = vmatprep.mubr.msk.f32.mxu0 %vm511_vm0, %v3458_v20  ;;  %v3461_v41 = vmax.f32 %v3333_v26, 0.0  ;;  %v8106_v22 = vld [vmem:[%s9078_s7] ss:$0 sm:$0xff]  ;;  %v3013_v26 = vrot.slane %v2450_v60, %v7684_v33 }
 0x1a5   : > { %v7020_v11 = vpop.f32.mrf.mxu1  ;;  %7213 = vmatmul.mubr.msk.f32.gmra.mxu0 %vm511_vm0, %v3459_v25 }
 0x1a6   : > { %v3460_v37 = vmax.f32 %v3332_v30, 0.0  ;;  %v3335_v5 = vadd.f32 %v7020_v11, %v2989_v32  ;;  %v3029_v30 = vrot.slane %v2498_v61, %v7684_v33  ;;  %v2547_v61 = vcombine.high %v8121_v35, %v8121_v35 }
 0x1a7   : > { %v1639_v42 = vpop.f32.mrf.mxu1 }
 0x1a8   : > { %v3334_v45 = vadd.f32 %v2985_v38, %v1639_v42  ;;  %7215 = vmatprep.mubr.msk.f32.mxu0 %vm511_vm0, %v3460_v37  ;;  %v3463_v51 = vmax.f32 %v3335_v5, 0.0 }
 0x1a9   : > { %v7023_v47 = vpop.f32.mrf.mxu1  ;;  %7216 = vmatmul.mubr.msk.f32.gmra.mxu0 %vm511_vm0, %v3461_v41  ;;  %v3025_v41 = vrot.slane %v2496_v17, %v7684_v33 }
 0x1aa   : > { %v3462_v58 = vmax.f32 %v3334_v45, 0.0  ;;  %v3337_v63 = vadd.f32 %v7023_v47, %v2997_v48  ;;  %v2497_v45 = vcombine.high %v8109_v23, %v8109_v23 }
 0x1ab   : > { %v1649_v52 = vpop.f32.mrf.mxu1 }
 0x1ac   : > { %v3336_v57 = vadd.f32 %v2993_v6, %v1649_v52  ;;  %7218 = vmatprep.mubr.msk.f32.mxu0 %vm511_vm0, %v3462_v58  ;;  %v3465_v10 = vmax.f32 %v3337_v63, 0.0  ;;  %v8136_v58 = vrot.slane %v8060_v44, %v7661_v16  ;;  %v3037_v63 = vrot.slane %v8117_v31, %v7684_v33 }
 0x1ad   : > { %v7026_v9 = vpop.f32.mrf.mxu1  ;;  %v7076_v3 = vpop.f32.mrf.mxu0  ;;  %7219 = vmatmul.mubr.msk.f32.gmra.mxu0 %vm511_vm0, %v3463_v51  ;;  %v8147_v60 = vrot.slane %v2497_v45, %v7684_v33 }
 0x1ae   : > { %v3464_v1 = vmax.f32 %v3336_v57, 0.0  ;;  %v3961_v2 = vadd.f32 %v7076_v3, %v8077_v62  ;;  %v3339_v12 = vadd.f32 %v7026_v9, %v3005_v59  ;;  %v2499_v59 = vcombine.high %v8117_v31, %v8117_v31 }
 0x1af   : > { %v1659_v13 = vpop.f32.mrf.mxu1  ;;  %v3955_v24 = vpop.f32.mrf.mxu0  ;;  %v2545_v31 = vcombine.high %v8136_v58, %v8136_v58 }
 0x1b0   : > { %v4595_v18 = vmax.f32 %v3961_v2, 0.0  ;;  %v3338_v19 = vadd.f32 %v3001_v4, %v1659_v13  ;;  %v3956_v20 = vadd.f32 %v8077_v62, %v3955_v24  ;;  %7221 = vmatprep.mubr.msk.f32.mxu0 %vm511_vm0, %v3464_v1  ;;  %v3467_v37 = vmax.f32 %v3339_v12, 0.0 }
 0x1b1   : > { %v7029_v25 = vpop.f32.mrf.mxu1  ;;  %v7079_v27 = vpop.f32.mrf.mxu0  ;;  %7222 = vmatmul.mubr.msk.f32.gmra.mxu0 %vm511_vm0, %v3465_v10  ;;  %v3045_v23 = vrot.slane %v2499_v59, %v7684_v33 }
 0x1b2   : > { %v3466_v11 = vmax.f32 %v3338_v19, 0.0  ;;  %v4594_v32 = vmax.f32 %v3956_v20, 0.0  ;;  %v3971_v34 = vadd.f32 %v7079_v27, %v8077_v62  ;;  %v3341_v38 = vadd.f32 %v7029_v25, %v3013_v26 }
 0x1b3   : > { %v1669_v39 = vpop.f32.mrf.mxu1  ;;  %v3965_v40 = vpop.f32.mrf.mxu0  ;;  %v4730_v21 = vmul.f32 %v8106_v22, %v4595_v18  ;;  %v3049_v25 = vrot.slane %v8136_v58, %v7684_v33 }
 0x1b4   : > { %v4597_v5 = vmax.f32 %v3971_v34, 0.0  ;;  %v3340_v42 = vadd.f32 %v3009_v7, %v1669_v39  ;;  %v3966_v15 = vadd.f32 %v8077_v62, %v3965_v40  ;;  %7224 = vmatprep.mubr.msk.f32.mxu0 %vm511_vm0, %v3466_v11  ;;  %v4729_v28 = vmul.f32 %v8106_v22, %v4594_v32 }
 0x1b5   : > { %v4860_v46 = vsel %vm511_vm0, %v4730_v21, 0.0  ;;  %v7032_v47 = vpop.f32.mrf.mxu1  ;;  %v7082_v48 = vpop.f32.mrf.mxu0  ;;  %7225 = vmatmul.mubr.msk.f32.gmra.mxu0 %vm511_vm0, %v3467_v37  ;;  %v3469_v52 = vmax.f32 %v3341_v38, 0.0 }
 0x1b6   : > { %v3468_v6 = vmax.f32 %v3340_v42, 0.0  ;;  %v4596_v36 = vmax.f32 %v3966_v15, 0.0  ;;  %4861 = vadd.xlane.f32.xlu0 %v4860_v46  ;;  %v3981_v51 = vadd.f32 %v7082_v48, %v8077_v62  ;;  %v3343_v53 = vadd.f32 %v7032_v47, %v3021_v14 }
 0x1b7   : > { %v1679_v56 = vpop.f32.mrf.mxu1  ;;  %v3975_v57 = vpop.f32.mrf.mxu0  ;;  %v4732_v9 = vmul.f32 %v8106_v22, %v4597_v5  ;;  %v4857_v1 = vsel %vm511_vm0, %v4729_v28, 0.0  ;;  %v3053_v14 = vrot.slane %v8121_v35, %v7684_v33  ;;  %v8178_v47 = vrot.slane %v8085_v55, %v7661_v16 }
 0x1b8   : > { %v3342_v3 = vadd.f32 %v3017_v29, %v1679_v56  ;;  %v3976_v44 = vadd.f32 %v8077_v62, %v3975_v57  ;;  %7227 = vmatprep.mubr.msk.f32.mxu0 %vm511_vm0, %v3468_v6  ;;  %v4599_v0 = vmax.f32 %v3981_v51, 0.0  ;;  %v4731_v10 = vmul.f32 %v8106_v22, %v4596_v36 }
 0x1b9   : > { %v4866_v2 = vsel %vm511_vm0, %v4732_v9, 0.0  ;;  %v7035_v4 = vpop.f32.mrf.mxu1  ;;  %v7085_v7 = vpop.f32.mrf.mxu0  ;;  %7228 = vmatmul.mubr.msk.f32.gmra.mxu0 %vm511_vm0, %v3469_v52  ;;  %v3471_v17 = vmax.f32 %v3343_v53, 0.0  ;;  %v8164_v29 = vrot.slane %v2547_v61, %v7684_v33  ;;  %v8186_v6 = vrot.slane %v2564_v54, %v7661_v16 }
 0x1ba   : > { %v3470_v12 = vmax.f32 %v3342_v3, 0.0  ;;  %v4598_v13 = vmax.f32 %v3976_v44, 0.0  ;;  %4858 = vadd.xlane.f32.xlu0 %v4857_v1  ;;  %4867 = vadd.xlane.f32.xlu1 %v4866_v2  ;;  %v3991_v24 = vadd.f32 %v7085_v7, %v8077_v62  ;;  %v3345_v18 = vadd.f32 %v7035_v4, %v3029_v30 }
 0x1bb   : > { %v1689_v19 = vpop.f32.mrf.mxu1  ;;  %v3985_v20 = vpop.f32.mrf.mxu0  ;;  %v4863_v30 = vsel %vm511_vm0, %v4731_v10, 0.0  ;;  %v4734_v38 = vmul.f32 %v8106_v22, %v4599_v0  ;;  %v3057_v9 = vrot.slane %v2545_v31, %v7684_v33  ;;  %v8197_v0 = vrot.slane %v8054_v43, %v7661_v16 }
 0x1bc   : > { %v3344_v26 = vadd.f32 %v3025_v41, %v1689_v19  ;;  %v3986_v27 = vadd.f32 %v8077_v62, %v3985_v20  ;;  %7230 = vmatprep.mubr.msk.f32.mxu0 %vm511_vm0, %v3470_v12  ;;  %v4601_v11 = vmax.f32 %v3991_v24, 0.0  ;;  %v4733_v37 = vmul.f32 %v8106_v22, %v4598_v13 }
 0x1bd   : > { %v7038_v32 = vpop.f32.mrf.mxu1  ;;  %v7088_v34 = vpop.f32.mrf.mxu0  ;;  %7231 = vmatmul.mubr.msk.f32.gmra.mxu0 %vm511_vm0, %v3471_v17  ;;  %v2516_v41 = vcombine.high %v8085_v55, %v8085_v55  ;;  %v3473_v5 = vmax.f32 %v3345_v18, 0.0  ;;  %v4872_v51 = vsel %vm511_vm0, %v4734_v38, 0.0  ;;  %v3065_v19 = vrot.slane %v8178_v47, %v7684_v33 }
 0x1be   : > { %v3472_v39 = vmax.f32 %v3344_v26, 0.0  ;;  %v4600_v40 = vmax.f32 %v3986_v27, 0.0  ;;  %4864 = vadd.xlane.f32.xlu1 %v4863_v30  ;;  %v4001_v21 = vadd.f32 %v7088_v34, %v8077_v62  ;;  %v3347_v42 = vadd.f32 %v7038_v32, %v3037_v63 }
 0x1bf   : > { %v4869_v15 = vsel %vm511_vm0, %v4733_v37, 0.0  ;;  %v1699_v45 = vpop.f32.mrf.mxu1  ;;  %v3995_v46 = vpop.f32.mrf.mxu0  ;;  %v8203_v4 = vrot.slane %v2516_v41, %v7661_v16  ;;  %v3085_v35 = vrot.slane %v8186_v6, %v7684_v33  ;;  %v3081_v41 = vrot.slane %v8197_v0, %v7684_v33 }
 0x1c0   : > { %4870 = vadd.xlane.f32.xlu0 %v4869_v15  ;;  %v3346_v48 = vadd.f32 %v3033_v49, %v1699_v45  ;;  %v3996_v28 = vadd.f32 %v8077_v62, %v3995_v46  ;;  %7233 = vmatprep.mubr.msk.f32.mxu0 %vm511_vm0, %v3472_v39  ;;  %v4603_v36 = vmax.f32 %v4001_v21, 0.0  ;;  %v4735_v55 = vmul.f32 %v8106_v22, %v4600_v40 }
 0x1c1   : > { %v7041_v63 = vpop.f32.mrf.mxu1  ;;  %v7091_v52 = vpop.f32.mrf.mxu0  ;;  %7234 = vmatmul.mubr.msk.f32.gmra.mxu0 %vm511_vm0, %v3473_v5  ;;  %v4736_v49 = vmul.f32 %v8106_v22, %v4601_v11  ;;  %v3475_v54 = vmax.f32 %v3347_v42, 0.0  ;;  %v2546_v11 = vcombine.high %v8178_v47, %v8178_v47  ;;  %v3069_v47 = vrot.slane %v8203_v4, %v7684_v33 }
 0x1c2   : > { %v3474_v53 = vmax.f32 %v3346_v48, 0.0  ;;  %v4602_v56 = vmax.f32 %v3996_v28, 0.0  ;;  %4873 = vadd.xlane.f32.xlu1 %v4872_v51  ;;  %v4011_v57 = vadd.f32 %v7091_v52, %v8077_v62  ;;  %v3349_v59 = vadd.f32 %v7041_v63, %v3045_v23 }
 0x1c3   : > { %v4875_v3 = vsel %vm511_vm0, %v4735_v55, 0.0  ;;  %v1709_v44 = vpop.f32.mrf.mxu1  ;;  %v4005_v61 = vpop.f32.mrf.mxu0  ;;  %v4878_v10 = vsel %vm511_vm0, %v4736_v49, 0.0  ;;  %v4738_v24 = vmul.f32 %v8106_v22, %v4603_v36  ;;  %v2548_v36 = vcombine.high %v8203_v4, %v8203_v4 }
 0x1c4   : > { %4876 = vadd.xlane.f32.xlu0 %v4875_v3  ;;  %v3348_v1 = vadd.f32 %v8147_v60, %v1709_v44  ;;  %v4006_v2 = vadd.f32 %v8077_v62, %v4005_v61  ;;  %7236 = vmatprep.mubr.msk.f32.mxu0 %vm511_vm0, %v3474_v53  ;;  %v4605_v7 = vmax.f32 %v4011_v57, 0.0  ;;  %v4737_v43 = vmul.f32 %v8106_v22, %v4602_v56 }
 0x1c5   : > { %v7044_v12 = vpop.f32.mrf.mxu1  ;;  %v7094_v13 = vpop.f32.mrf.mxu0  ;;  %7237 = vmatmul.mubr.msk.f32.gmra.mxu0 %vm511_vm0, %v3475_v54  ;;  %v3477_v20 = vmax.f32 %v3349_v59, 0.0  ;;  %v4884_v34 = vsel %vm511_vm0, %v4738_v24, 0.0 }
 0x1c6   : > { %v3476_v17 = vmax.f32 %v3348_v1, 0.0  ;;  %v4604_v60 = vmax.f32 %v4006_v2, 0.0  ;;  %4879 = vadd.xlane.f32.xlu1 %v4878_v10  ;;  %v4021_v18 = vadd.f32 %v7094_v13, %v8077_v62  ;;  %v3351_v23 = vadd.f32 %v7044_v12, %v3053_v14 }
 0x1c7   : > { %v4881_v26 = vsel %vm511_vm0, %v4737_v43, 0.0  ;;  %v1719_v27 = vpop.f32.mrf.mxu1  ;;  %v4015_v31 = vpop.f32.mrf.mxu0  ;;  %v4740_v40 = vmul.f32 %v8106_v22, %v4605_v7  ;;  %v3073_v1 = vrot.slane %v2546_v11, %v7684_v33  ;;  %v3077_v7 = vrot.slane %v2548_v36, %v7684_v33 }
 0x1c8   : > { %4882 = vadd.xlane.f32.xlu0 %v4881_v26  ;;  %v3350_v30 = vadd.f32 %v3049_v25, %v1719_v27  ;;  %v4016_v32 = vadd.f32 %v8077_v62, %v4015_v31  ;;  %7239 = vmatprep.mubr.msk.f32.mxu0 %vm511_vm0, %v3476_v17  ;;  %v4607_v14 = vmax.f32 %v4021_v18, 0.0  ;;  %v4739_v39 = vmul.f32 %v8106_v22, %v4604_v60 }
 0x1c9   : > { %v7047_v37 = vpop.f32.mrf.mxu1  ;;  %v7097_v38 = vpop.f32.mrf.mxu0  ;;  %7240 = vmatmul.mubr.msk.f32.gmra.mxu0 %vm511_vm0, %v3477_v20  ;;  %v3479_v5 = vmax.f32 %v3351_v23, 0.0  ;;  %v4890_v63 = vsel %vm511_vm0, %v4740_v40, 0.0  ;;  %v2594_v20 = vcombine.high %v8197_v0, %v8197_v0 }
 0x1ca   : > { %v3478_v58 = vmax.f32 %v3350_v30, 0.0  ;;  %v4606_v25 = vmax.f32 %v4016_v32, 0.0  ;;  %4885 = vadd.xlane.f32.xlu1 %v4884_v34  ;;  %v4031_v21 = vadd.f32 %v7097_v38, %v8077_v62  ;;  %v3353_v42 = vadd.f32 %v7047_v37, %v8164_v29 }
 0x1cb   : > { %v4887_v15 = vsel %vm511_vm0, %v4739_v39, 0.0  ;;  %v1729_v45 = vpop.f32.mrf.mxu1  ;;  %v4025_v46 = vpop.f32.mrf.mxu0  ;;  %v4742_v49 = vmul.f32 %v8106_v22, %v4607_v14  ;;  %v2565_v30 = vcombine.high %v8072_v50, %v8072_v50 }
 0x1cc   : > { %4888 = vadd.xlane.f32.xlu0 %v4887_v15  ;;  %v3352_v48 = vadd.f32 %v3057_v9, %v1729_v45  ;;  %v4026_v28 = vadd.f32 %v8077_v62, %v4025_v46  ;;  %7242 = vmatprep.mubr.msk.f32.mxu0 %vm511_vm0, %v3478_v58  ;;  %v4609_v51 = vmax.f32 %v4031_v21, 0.0  ;;  %v4741_v55 = vmul.f32 %v8106_v22, %v4606_v25 }
 0x1cd   : > { %v7050_v29 = vpop.f32.mrf.mxu1  ;;  %v7100_v52 = vpop.f32.mrf.mxu0  ;;  %7243 = vmatmul.mubr.msk.f32.gmra.mxu0 %vm511_vm0, %v3479_v5  ;;  %v2596_v9 = vcombine.high %v8186_v6, %v8186_v6  ;;  %v3481_v54 = vmax.f32 %v3353_v42, 0.0  ;;  %v4896_v12 = vsel %vm511_vm0, %v4742_v49, 0.0  ;;  %v8272_v15 = vrot.slane %v8072_v50, %v7661_v16 }
 0x1ce   : > { %v3480_v53 = vmax.f32 %v3352_v48, 0.0  ;;  %v4608_v56 = vmax.f32 %v4026_v28, 0.0  ;;  %4891 = vadd.xlane.f32.xlu1 %v4890_v63  ;;  %v4041_v57 = vadd.f32 %v7100_v52, %v8077_v62  ;;  %v3355_v59 = vadd.f32 %v7050_v29, %v3069_v47 }
 0x1cf   : > { %v4893_v3 = vsel %vm511_vm0, %v4741_v55, 0.0  ;;  %v1739_v44 = vpop.f32.mrf.mxu1  ;;  %v4035_v61 = vpop.f32.mrf.mxu0  ;;  %v4744_v17 = vmul.f32 %v8106_v22, %v4609_v51  ;;  %v3093_v34 = vrot.slane %v2596_v9, %v7684_v33  ;;  %v2593_v36 = vrot.slane %v2565_v30, %v7661_v16 }
 0x1d0   : > { %4894 = vadd.xlane.f32.xlu0 %v4893_v3  ;;  %v3354_v2 = vadd.f32 %v3065_v19, %v1739_v44  ;;  %v4036_v4 = vadd.f32 %v8077_v62, %v4035_v61  ;;  %7245 = vmatprep.mubr.msk.f32.mxu0 %vm511_vm0, %v3480_v53  ;;  %v4611_v10 = vmax.f32 %v4041_v57, 0.0  ;;  %v4743_v24 = vmul.f32 %v8106_v22, %v4608_v56 }
 0x1d1   : > { %v7053_v13 = vpop.f32.mrf.mxu1  ;;  %v7103_v43 = vpop.f32.mrf.mxu0  ;;  %7246 = vmatmul.mubr.msk.f32.gmra.mxu0 %vm511_vm0, %v3481_v54  ;;  %v3483_v23 = vmax.f32 %v3355_v59, 0.0  ;;  %v4902_v38 = vsel %vm511_vm0, %v4744_v17, 0.0  ;;  %v3089_v50 = vrot.slane %v2594_v20, %v7684_v33  ;;  %v3097_v53 = vrot.slane %v8272_v15, %v7684_v33 }
 0x1d2   : > { %v3482_v60 = vmax.f32 %v3354_v2, 0.0  ;;  %v4610_v18 = vmax.f32 %v4036_v4, 0.0  ;;  %4897 = vadd.xlane.f32.xlu1 %v4896_v12  ;;  %v4051_v19 = vadd.f32 %v7103_v43, %v8077_v62  ;;  %v3357_v26 = vadd.f32 %v7053_v13, %v3077_v7 }
 0x1d3   : > { %v4899_v27 = vsel %vm511_vm0, %v4743_v24, 0.0  ;;  %v1749_v31 = vpop.f32.mrf.mxu1  ;;  %v4045_v11 = vpop.f32.mrf.mxu0  ;;  %v4746_v25 = vmul.f32 %v8106_v22, %v4611_v10  ;;  %v3101_v3 = vrot.slane %v2593_v36, %v7684_v33 }
 0x1d4   : > { %4900 = vadd.xlane.f32.xlu0 %v4899_v27  ;;  %v3356_v32 = vadd.f32 %v3073_v1, %v1749_v31  ;;  %v4046_v14 = vadd.f32 %v8077_v62, %v4045_v11  ;;  %7248 = vmatprep.mubr.msk.f32.mxu0 %vm511_vm0, %v3482_v60  ;;  %v4613_v37 = vmax.f32 %v4051_v19, 0.0  ;;  %v4745_v58 = vmul.f32 %v8106_v22, %v4610_v18 }
 0x1d5   : > { %v7056_v39 = vpop.f32.mrf.mxu1  ;;  %v7106_v40 = vpop.f32.mrf.mxu0  ;;  %7249 = vmatmul.mubr.msk.f32.gmra.mxu0 %vm511_vm0, %v3483_v23  ;;  %v3485_v45 = vmax.f32 %v3357_v26, 0.0  ;;  %v4908_v6 = vsel %vm511_vm0, %v4746_v25, 0.0  ;;  %v2597_v1 = vcombine.high %v2593_v36, %v2593_v36  ;;  %v2595_v60 = vcombine.high %v8272_v15, %v8272_v15 }
 0x1d6   : > { %v3484_v21 = vmax.f32 %v3356_v32, 0.0  ;;  %v4612_v5 = vmax.f32 %v4046_v14, 0.0  ;;  %4903 = vadd.xlane.f32.xlu1 %v4902_v38  ;;  %v4061_v42 = vadd.f32 %v7106_v40, %v8077_v62  ;;  %v3359_v46 = vadd.f32 %v7056_v39, %v3085_v35 }
 0x1d7   : > { %v4905_v47 = vsel %vm511_vm0, %v4745_v58, 0.0  ;;  %v1759_v48 = vpop.f32.mrf.mxu1  ;;  %v4055_v28 = vpop.f32.mrf.mxu0  ;;  %v4748_v55 = vmul.f32 %v8106_v22, %v4613_v37  ;;  %v3109_v11 = vrot.slane %v2597_v1, %v7684_v33  ;;  %v3105_v25 = vrot.slane %v2595_v60, %v7684_v33 }
 0x1d8   : > { %4906 = vadd.xlane.f32.xlu0 %v4905_v47  ;;  %v3358_v51 = vadd.f32 %v3081_v41, %v1759_v48  ;;  %v4056_v63 = vadd.f32 %v8077_v62, %v4055_v28  ;;  %7251 = vmatprep.mubr.msk.f32.mxu0 %vm511_vm0, %v3484_v21  ;;  %v4615_v29 = vmax.f32 %v4061_v42, 0.0  ;;  %v4747_v16 = vmul.f32 %v8106_v22, %v4612_v5 }
 0x1d9   : > { %v7059_v35 = vpop.f32.mrf.mxu1  ;;  %v7109_v52 = vpop.f32.mrf.mxu0  ;;  %7252 = vmatmul.mubr.msk.f32.gmra.mxu0 %vm511_vm0, %v3485_v45  ;;  %v3487_v56 = vmax.f32 %v3359_v46, 0.0  ;;  %v4914_v4 = vsel %vm511_vm0, %v4748_v55, 0.0 }
 0x1da   : > { %v3486_v49 = vmax.f32 %v3358_v51, 0.0  ;;  %v4614_v0 = vmax.f32 %v4056_v63, 0.0  ;;  %4909 = vadd.xlane.f32.xlu1 %v4908_v6  ;;  %v4071_v41 = vadd.f32 %v7109_v52, %v8077_v62  ;;  %v3361_v57 = vadd.f32 %v7059_v35, %v3093_v34 }
 0x1db   : > { %v4911_v9 = vsel %vm511_vm0, %v4747_v16, 0.0  ;;  %v1769_v54 = vpop.f32.mrf.mxu1  ;;  %v4065_v59 = vpop.f32.mrf.mxu0  ;;  %v4750_v13 = vmul.f32 %v8106_v22, %v4615_v29 }
 0x1dc   : > { %4912 = vadd.xlane.f32.xlu0 %v4911_v9  ;;  %v3360_v44 = vadd.f32 %v3089_v50, %v1769_v54  ;;  %v4066_v61 = vadd.f32 %v8077_v62, %v4065_v59  ;;  %7254 = vmatprep.mubr.msk.f32.mxu0 %vm511_vm0, %v3486_v49  ;;  %v4617_v2 = vmax.f32 %v4071_v41, 0.0  ;;  %v4749_v12 = vmul.f32 %v8106_v22, %v4614_v0 }
 0x1dd   : > { %v7062_v7 = vpop.f32.mrf.mxu1  ;;  %v7112_v10 = vpop.f32.mrf.mxu0  ;;  %7255 = vmatmul.mubr.msk.f32.gmra.mxu0 %vm511_vm0, %v3487_v56  ;;  %v3489_v18 = vmax.f32 %v3361_v57, 0.0  ;;  %v4920_v32 = vsel %vm511_vm0, %v4750_v13, 0.0 }
 0x1de   : > { %v3488_v43 = vmax.f32 %v3360_v44, 0.0  ;;  %v4616_v24 = vmax.f32 %v4066_v61, 0.0  ;;  %4915 = vadd.xlane.f32.xlu1 %v4914_v4  ;;  %v4081_v17 = vadd.f32 %v7112_v10, %v8077_v62  ;;  %v3363_v19 = vadd.f32 %v7062_v7, %v3101_v3 }
 0x1df   : > { %v4917_v20 = vsel %vm511_vm0, %v4749_v12, 0.0  ;;  %v1779_v23 = vpop.f32.mrf.mxu1  ;;  %v4075_v26 = vpop.f32.mrf.mxu0  ;;  %v4752_v38 = vmul.f32 %v8106_v22, %v4617_v2 }
 0x1e0   : > { %4918 = vadd.xlane.f32.xlu0 %v4917_v20  ;;  %v3362_v27 = vadd.f32 %v3097_v53, %v1779_v23  ;;  %v4076_v31 = vadd.f32 %v8077_v62, %v4075_v26  ;;  %7257 = vmatprep.mubr.msk.f32.mxu0 %vm511_vm0, %v3488_v43  ;;  %v4619_v30 = vmax.f32 %v4081_v17, 0.0  ;;  %v4751_v37 = vmul.f32 %v8106_v22, %v4616_v24 }
 0x1e1   : > { %v7065_v14 = vpop.f32.mrf.mxu1  ;;  %v7115_v34 = vpop.f32.mrf.mxu0  ;;  %7258 = vmatmul.mubr.msk.f32.gmra.mxu0 %vm511_vm0, %v3489_v18  ;;  %v3491_v21 = vmax.f32 %v3363_v19, 0.0  ;;  %v4926_v28 = vsel %vm511_vm0, %v4752_v38, 0.0 }
 0x1e2   : > { %v3490_v39 = vmax.f32 %v3362_v27, 0.0  ;;  %v4618_v40 = vmax.f32 %v4076_v31, 0.0  ;;  %4921 = vadd.xlane.f32.xlu1 %v4920_v32  ;;  %v4091_v58 = vadd.f32 %v7115_v34, %v8077_v62  ;;  %v3365_v5 = vadd.f32 %v7065_v14, %v3109_v11 }
 0x1e3   : > { %v4923_v42 = vsel %vm511_vm0, %v4751_v37, 0.0  ;;  %v1789_v15 = vpop.f32.mrf.mxu1  ;;  %v4085_v45 = vpop.f32.mrf.mxu0  ;;  %v4754_v51 = vmul.f32 %v8106_v22, %v4619_v30 }
 0x1e4   : > { %4924 = vadd.xlane.f32.xlu0 %v4923_v42  ;;  %v3364_v46 = vadd.f32 %v3105_v25, %v1789_v15  ;;  %v4086_v47 = vadd.f32 %v8077_v62, %v4085_v45  ;;  %7260 = vmatprep.mubr.msk.f32.mxu0 %vm511_vm0, %v3490_v39  ;;  %v4621_v48 = vmax.f32 %v4091_v58, 0.0  ;;  %v4753_v33 = vmul.f32 %v8106_v22, %v4618_v40 }
 0x1e5   : > { %v7118_v36 = vpop.f32.mrf.mxu0  ;;  %7261 = vmatmul.mubr.msk.f32.gmra.mxu0 %vm511_vm0, %v3491_v21  ;;  %v3493_v6 = vmax.f32 %v3365_v5, 0.0  ;;  %v4932_v0 = vsel %vm511_vm0, %v4754_v51, 0.0 }
 0x1e6   : > { %v3492_v63 = vmax.f32 %v3364_v46, 0.0  ;;  %v4620_v50 = vmax.f32 %v4086_v47, 0.0  ;;  %4927 = vadd.xlane.f32.xlu1 %v4926_v28  ;;  %v4101_v29 = vadd.f32 %v7118_v36, %v8077_v62  ;;  %v4929_v35 = vsel %vm511_vm0, %v4753_v33, 0.0 }
 0x1e7   : > { %v4095_v52 = vpop.f32.mrf.mxu0  ;;  %v4756_v53 = vmul.f32 %v8106_v22, %v4621_v48 }
 0x1e8   : > { %4930 = vadd.xlane.f32.xlu0 %v4929_v35  ;;  %v4096_v16 = vadd.f32 %v8077_v62, %v4095_v52  ;;  %7263 = vmatprep.mubr.msk.f32.mxu0 %vm511_vm0, %v3492_v63  ;;  %v4755_v55 = vmul.f32 %v8106_v22, %v4620_v50  ;;  %v4623_v49 = vmax.f32 %v4101_v29, 0.0 }
 0x1e9   : > { %v7121_v41 = vpop.f32.mrf.mxu0  ;;  %7264 = vmatmul.mubr.msk.f32.gmra.mxu0 %vm511_vm0, %v3493_v6  ;;  %v4938_v61 = vsel %vm511_vm0, %v4756_v53, 0.0 }
 0x1ea   : > { %v4622_v56 = vmax.f32 %v4096_v16, 0.0  ;;  %4933 = vadd.xlane.f32.xlu1 %v4932_v0  ;;  %v4111_v57 = vadd.f32 %v7121_v41, %v8077_v62  ;;  %v4935_v9 = vsel %vm511_vm0, %v4755_v55, 0.0  ;;  %v4758_v2 = vmul.f32 %v8106_v22, %v4623_v49 }
 0x1eb   : > { %v4105_v54 = vpop.f32.mrf.mxu0 }
 0x1ec   : > { %4936 = vadd.xlane.f32.xlu0 %v4935_v9  ;;  %v4106_v59 = vadd.f32 %v8077_v62, %v4105_v54  ;;  %v4757_v3 = vmul.f32 %v8106_v22, %v4622_v56  ;;  %v4625_v44 = vmax.f32 %v4111_v57, 0.0  ;;  %v4944_v17 = vsel %vm511_vm0, %v4758_v2, 0.0 }
 0x1ed   : > { %v7124_v1 = vpop.f32.mrf.mxu0 }
 0x1ee   : > { %v4624_v4 = vmax.f32 %v4106_v59, 0.0  ;;  %4939 = vadd.xlane.f32.xlu1 %v4938_v61  ;;  %v4121_v7 = vadd.f32 %v7124_v1, %v8077_v62  ;;  %v4941_v10 = vsel %vm511_vm0, %v4757_v3, 0.0  ;;  %v4760_v18 = vmul.f32 %v8106_v22, %v4625_v44 }
 0x1ef   : > { %v4115_v12 = vpop.f32.mrf.mxu0 }
 0x1f0   : > { %4942 = vadd.xlane.f32.xlu0 %v4941_v10  ;;  %v4116_v13 = vadd.f32 %v8077_v62, %v4115_v12  ;;  %v4759_v43 = vmul.f32 %v8106_v22, %v4624_v4  ;;  %v4627_v24 = vmax.f32 %v4121_v7, 0.0  ;;  %v4950_v30 = vsel %vm511_vm0, %v4760_v18, 0.0 }
 0x1f1   : > { %v7127_v60 = vpop.f32.mrf.mxu0 }
 0x1f2   : > { %v4626_v19 = vmax.f32 %v4116_v13, 0.0  ;;  %4945 = vadd.xlane.f32.xlu1 %v4944_v17  ;;  %v4131_v20 = vadd.f32 %v7127_v60, %v8077_v62  ;;  %v4947_v23 = vsel %vm511_vm0, %v4759_v43, 0.0  ;;  %v4762_v14 = vmul.f32 %v8106_v22, %v4627_v24 }
 0x1f3   : > { %v4125_v26 = vpop.f32.mrf.mxu0 }
 0x1f4   : > { %4948 = vadd.xlane.f32.xlu0 %v4947_v23  ;;  %v4126_v27 = vadd.f32 %v8077_v62, %v4125_v26  ;;  %v4761_v31 = vmul.f32 %v8106_v22, %v4626_v19  ;;  %v4629_v11 = vmax.f32 %v4131_v20, 0.0  ;;  %v4956_v21 = vsel %vm511_vm0, %v4762_v14, 0.0 }
 0x1f5   : > { %v7130_v32 = vpop.f32.mrf.mxu0 }
 0x1f6   : > { %v4628_v34 = vmax.f32 %v4126_v27, 0.0  ;;  %4951 = vadd.xlane.f32.xlu1 %v4950_v30  ;;  %v4141_v37 = vadd.f32 %v7130_v32, %v8077_v62  ;;  %v4953_v38 = vsel %vm511_vm0, %v4761_v31, 0.0  ;;  %v4764_v42 = vmul.f32 %v8106_v22, %v4629_v11 }
 0x1f7   : > { %v4135_v39 = vpop.f32.mrf.mxu0 }
 0x1f8   : > { %4954 = vadd.xlane.f32.xlu0 %v4953_v38  ;;  %v4136_v40 = vadd.f32 %v8077_v62, %v4135_v39  ;;  %v4763_v58 = vmul.f32 %v8106_v22, %v4628_v34  ;;  %v4631_v25 = vmax.f32 %v4141_v37, 0.0  ;;  %v4962_v33 = vsel %vm511_vm0, %v4764_v42, 0.0 }
 0x1f9   : > { %v7133_v5 = vpop.f32.mrf.mxu0 }
 0x1fa   : > { %v4630_v15 = vmax.f32 %v4136_v40, 0.0  ;;  %4957 = vadd.xlane.f32.xlu1 %v4956_v21  ;;  %v4151_v45 = vadd.f32 %v7133_v5, %v8077_v62  ;;  %v4959_v46 = vsel %vm511_vm0, %v4763_v58, 0.0  ;;  %v4766_v63 = vmul.f32 %v8106_v22, %v4631_v25 }
 0x1fb   : > { %v4145_v47 = vpop.f32.mrf.mxu0 }
 0x1fc   : > { %4960 = vadd.xlane.f32.xlu0 %v4959_v46  ;;  %v4146_v48 = vadd.f32 %v8077_v62, %v4145_v47  ;;  %v4765_v28 = vmul.f32 %v8106_v22, %v4630_v15  ;;  %v4633_v36 = vmax.f32 %v4151_v45, 0.0  ;;  %v4968_v49 = vsel %vm511_vm0, %v4766_v63, 0.0 }
 0x1fd   : > { %v7136_v51 = vpop.f32.mrf.mxu0 }
 0x1fe   : > { %v4632_v50 = vmax.f32 %v4146_v48, 0.0  ;;  %4963 = vadd.xlane.f32.xlu1 %v4962_v33  ;;  %v4161_v29 = vadd.f32 %v7136_v51, %v8077_v62  ;;  %v4965_v6 = vsel %vm511_vm0, %v4765_v28, 0.0  ;;  %v4768_v41 = vmul.f32 %v8106_v22, %v4633_v36 }
 0x1ff   : > { %v4155_v35 = vpop.f32.mrf.mxu0 }
 0x200   : > { %4966 = vadd.xlane.f32.xlu0 %v4965_v6  ;;  %v4156_v52 = vadd.f32 %v8077_v62, %v4155_v35  ;;  %v4767_v16 = vmul.f32 %v8106_v22, %v4632_v50  ;;  %v4635_v55 = vmax.f32 %v4161_v29, 0.0  ;;  %v4974_v44 = vsel %vm511_vm0, %v4768_v41, 0.0 }
 0x201   : > { %v7139_v0 = vpop.f32.mrf.mxu0 }
 0x202   : > { %v4634_v53 = vmax.f32 %v4156_v52, 0.0  ;;  %4969 = vadd.xlane.f32.xlu1 %v4968_v49  ;;  %v4171_v56 = vadd.f32 %v7139_v0, %v8077_v62  ;;  %v4971_v57 = vsel %vm511_vm0, %v4767_v16, 0.0  ;;  %v4770_v1 = vmul.f32 %v8106_v22, %v4635_v55 }
 0x203   : > { %v4165_v9 = vpop.f32.mrf.mxu0 }
 0x204   : > { %4972 = vadd.xlane.f32.xlu0 %v4971_v57  ;;  %v4166_v54 = vadd.f32 %v8077_v62, %v4165_v9  ;;  %v4769_v59 = vmul.f32 %v8106_v22, %v4634_v53  ;;  %v4637_v3 = vmax.f32 %v4171_v56, 0.0  ;;  %v4980_v24 = vsel %vm511_vm0, %v4770_v1, 0.0 }
 0x205   : > { %v7142_v61 = vpop.f32.mrf.mxu0 }
 0x206   : > { %v4636_v2 = vmax.f32 %v4166_v54, 0.0  ;;  %4975 = vadd.xlane.f32.xlu1 %v4974_v44  ;;  %v4181_v4 = vadd.f32 %v7142_v61, %v8077_v62  ;;  %v4977_v7 = vsel %vm511_vm0, %v4769_v59, 0.0  ;;  %v4772_v60 = vmul.f32 %v8106_v22, %v4637_v3 }
 0x207   : > { %v4175_v10 = vpop.f32.mrf.mxu0 }
 0x208   : > { %4978 = vadd.xlane.f32.xlu0 %v4977_v7  ;;  %v4176_v12 = vadd.f32 %v8077_v62, %v4175_v10  ;;  %v4771_v13 = vmul.f32 %v8106_v22, %v4636_v2  ;;  %v4639_v43 = vmax.f32 %v4181_v4, 0.0  ;;  %v4986_v11 = vsel %vm511_vm0, %v4772_v60, 0.0 }
 0x209   : > { %v7145_v17 = vpop.f32.mrf.mxu0 }
 0x20a   : > { %v4638_v18 = vmax.f32 %v4176_v12, 0.0  ;;  %4981 = vadd.xlane.f32.xlu1 %v4980_v24  ;;  %v4191_v19 = vadd.f32 %v7145_v17, %v8077_v62  ;;  %v4983_v20 = vsel %vm511_vm0, %v4771_v13, 0.0  ;;  %v4774_v32 = vmul.f32 %v8106_v22, %v4639_v43 }
 0x20b   : > { %v4185_v23 = vpop.f32.mrf.mxu0 }
 0x20c   : > { %4984 = vadd.xlane.f32.xlu0 %v4983_v20  ;;  %v4186_v26 = vadd.f32 %v8077_v62, %v4185_v23  ;;  %v4773_v27 = vmul.f32 %v8106_v22, %v4638_v18  ;;  %v4641_v31 = vmax.f32 %v4191_v19, 0.0  ;;  %v4992_v25 = vsel %vm511_vm0, %v4774_v32, 0.0  ;;  %v8415_v18 = vld [vmem:[%s9077_s6] ss:$0 sm:$0xff] }
 0x20d   : > { %v7148_v30 = vpop.f32.mrf.mxu0 }
 0x20e   : > { %v4640_v14 = vmax.f32 %v4186_v26, 0.0  ;;  %4987 = vadd.xlane.f32.xlu1 %v4986_v11  ;;  %v4201_v34 = vadd.f32 %v7148_v30, %v8077_v62  ;;  %v4989_v37 = vsel %vm511_vm0, %v4773_v27, 0.0  ;;  %v4776_v5 = vmul.f32 %v8106_v22, %v4641_v31 }
 0x20f   : > { %v4195_v38 = vpop.f32.mrf.mxu0 }
 0x210   : > { %4990 = vadd.xlane.f32.xlu0 %v4989_v37  ;;  %v4196_v39 = vadd.f32 %v8077_v62, %v4195_v38  ;;  %v4775_v40 = vmul.f32 %v8106_v22, %v4640_v14  ;;  %v4643_v58 = vmax.f32 %v4201_v34, 0.0  ;;  %v4998_v36 = vsel %vm511_vm0, %v4776_v5, 0.0 }
 0x211   : > { %v7151_v21 = vpop.f32.mrf.mxu0 }
 0x212   : > { %v4642_v42 = vmax.f32 %v4196_v39, 0.0  ;;  %4993 = vadd.xlane.f32.xlu1 %v4992_v25  ;;  %v4211_v15 = vadd.f32 %v7151_v21, %v8077_v62  ;;  %v4995_v45 = vsel %vm511_vm0, %v4775_v40, 0.0  ;;  %v4778_v51 = vmul.f32 %v8106_v22, %v4643_v58 }
 0x213   : > { %v4205_v46 = vpop.f32.mrf.mxu0 }
 0x214   : > { %4996 = vadd.xlane.f32.xlu0 %v4995_v45  ;;  %v4206_v47 = vadd.f32 %v8077_v62, %v4205_v46  ;;  %v4777_v48 = vmul.f32 %v8106_v22, %v4642_v42  ;;  %v4645_v28 = vmax.f32 %v4211_v15, 0.0  ;;  %v5004_v55 = vsel %vm511_vm0, %v4778_v51, 0.0 }
 0x215   : > { %v7154_v33 = vpop.f32.mrf.mxu0 }
 0x216   : > { %v4644_v63 = vmax.f32 %v4206_v47, 0.0  ;;  %4999 = vadd.xlane.f32.xlu1 %v4998_v36  ;;  %v4221_v50 = vadd.f32 %v7154_v33, %v8077_v62  ;;  %v5001_v29 = vsel %vm511_vm0, %v4777_v48, 0.0  ;;  %v4780_v0 = vmul.f32 %v8106_v22, %v4645_v28  ;;  %v8435_v47 = vld [vmem:[%s9078_s7] ss:$0 sm:$0xff] }
 0x217   : > { %v4215_v6 = vpop.f32.mrf.mxu0 }
 0x218   : > { %5002 = vadd.xlane.f32.xlu0 %v5001_v29  ;;  %v4216_v35 = vadd.f32 %v8077_v62, %v4215_v6  ;;  %v4779_v52 = vmul.f32 %v8106_v22, %v4644_v63  ;;  %v4647_v16 = vmax.f32 %v4221_v50, 0.0  ;;  %v5010_v3 = vsel %vm511_vm0, %v4780_v0, 0.0 }
 0x219   : > { %v7157_v49 = vpop.f32.mrf.mxu0 }
 0x21a   : > { %v4646_v41 = vmax.f32 %v4216_v35, 0.0  ;;  %5005 = vadd.xlane.f32.xlu1 %v5004_v55  ;;  %v4231_v53 = vadd.f32 %v7157_v49, %v8077_v62  ;;  %v5007_v56 = vsel %vm511_vm0, %v4779_v52, 0.0  ;;  %v4782_v61 = vmul.f32 %v8106_v22, %v4647_v16 }
 0x21b   : > { %v4225_v57 = vpop.f32.mrf.mxu0 }
 0x21c   : > { %5008 = vadd.xlane.f32.xlu0 %v5007_v56  ;;  %v4226_v9 = vadd.f32 %v8077_v62, %v4225_v57  ;;  %v4781_v54 = vmul.f32 %v8106_v22, %v4646_v41  ;;  %v4649_v59 = vmax.f32 %v4231_v53, 0.0  ;;  %v5016_v43 = vsel %vm511_vm0, %v4782_v61, 0.0 }
 0x21d   : > { %v7160_v44 = vpop.f32.mrf.mxu0 }
 0x21e   : > { %v4648_v1 = vmax.f32 %v4226_v9, 0.0  ;;  %5011 = vadd.xlane.f32.xlu1 %v5010_v3  ;;  %v4241_v2 = vadd.f32 %v7160_v44, %v8077_v62  ;;  %v5013_v4 = vsel %vm511_vm0, %v4781_v54, 0.0  ;;  %v4784_v17 = vmul.f32 %v8106_v22, %v4649_v59 }
 0x21f   : > { %v4235_v7 = vpop.f32.mrf.mxu0 }
 0x220   : > { %5014 = vadd.xlane.f32.xlu0 %v5013_v4  ;;  %v4236_v10 = vadd.f32 %v8077_v62, %v4235_v7  ;;  %v4783_v12 = vmul.f32 %v8106_v22, %v4648_v1  ;;  %v4651_v13 = vmax.f32 %v4241_v2, 0.0  ;;  %v5022_v31 = vsel %vm511_vm0, %v4784_v17, 0.0 }
 0x221   : > { %v7163_v24 = vpop.f32.mrf.mxu0 }
 0x222   : > { %v4650_v60 = vmax.f32 %v4236_v10, 0.0  ;;  %5017 = vadd.xlane.f32.xlu1 %v5016_v43  ;;  %v4251_v19 = vadd.f32 %v8415_v18, %v7163_v24  ;;  %v5019_v20 = vsel %vm511_vm0, %v4783_v12, 0.0  ;;  %v4786_v30 = vmul.f32 %v8106_v22, %v4651_v13 }
 0x223   : > { %v4245_v62 = vpop.f32.mrf.mxu0 }
 0x224   : > { %5020 = vadd.xlane.f32.xlu0 %v5019_v20  ;;  %v4246_v23 = vadd.f32 %v8415_v18, %v4245_v62  ;;  %v4785_v26 = vmul.f32 %v8106_v22, %v4650_v60  ;;  %v4653_v27 = vmax.f32 %v4251_v19, 0.0  ;;  %v5028_v58 = vsel %vm511_vm0, %v4786_v30, 0.0 }
 0x225   : > { %v7166_v11 = vpop.f32.mrf.mxu0 }
 0x226   : > { %v4652_v32 = vmax.f32 %v4246_v23, 0.0  ;;  %5023 = vadd.xlane.f32.xlu1 %v5022_v31  ;;  %v4261_v14 = vadd.f32 %v8415_v18, %v7166_v11  ;;  %v5025_v34 = vsel %vm511_vm0, %v4785_v26, 0.0  ;;  %v4788_v21 = vmul.f32 %v8106_v22, %v4653_v27 }
 0x227   : > { %v4255_v37 = vpop.f32.mrf.mxu0 }
 0x228   : > { %5026 = vadd.xlane.f32.xlu0 %v5025_v34  ;;  %v4256_v38 = vadd.f32 %v8415_v18, %v4255_v37  ;;  %v4787_v39 = vmul.f32 %v8106_v22, %v4652_v32  ;;  %v4655_v40 = vmax.f32 %v4261_v14, 0.0  ;;  %v5034_v22 = vsel %vm511_vm0, %v4788_v21, 0.0 }
 0x229   : > { %v7169_v25 = vpop.f32.mrf.mxu0  ;;  %v8465_v14 = vstv %s5241_s17 }
 0x22a   : > { %v4654_v5 = vmax.f32 %v4256_v38, 0.0  ;;  %5029 = vadd.xlane.f32.xlu1 %v5028_v58  ;;  %v4271_v42 = vadd.f32 %v8415_v18, %v7169_v25  ;;  %v5031_v15 = vsel %vm511_vm0, %v4787_v39, 0.0  ;;  %v4790_v33 = vmul.f32 %v8435_v47, %v4655_v40 }
 0x22b   : > { %v4265_v45 = vpop.f32.mrf.mxu0 }
 0x22c   : > { %5032 = vadd.xlane.f32.xlu0 %v5031_v15  ;;  %v4266_v46 = vadd.f32 %v8415_v18, %v4265_v45  ;;  %v4789_v48 = vmul.f32 %v8435_v47, %v4654_v5  ;;  %v4657_v28 = vmax.f32 %v4271_v42, 0.0  ;;  %v5040_v16 = vsel %vm511_vm0, %v4790_v33, 0.0 }
 0x22d   : > { %v7172_v36 = vpop.f32.mrf.mxu0 }
 0x22e   : > { %v4656_v51 = vmax.f32 %v4266_v46, 0.0  ;;  %5035 = vadd.xlane.f32.xlu1 %v5034_v22  ;;  %v4281_v63 = vadd.f32 %v8415_v18, %v7172_v36  ;;  %v5037_v50 = vsel %vm511_vm0, %v4789_v48, 0.0  ;;  %v4792_v49 = vmul.f32 %v8435_v47, %v4657_v28 }
 0x22f   : > { %v4275_v29 = vpop.f32.mrf.mxu0 }
 0x230   : > { %5038 = vadd.xlane.f32.xlu0 %v5037_v50  ;;  %v4276_v6 = vadd.f32 %v8415_v18, %v4275_v29  ;;  %v4791_v35 = vmul.f32 %v8435_v47, %v4656_v51  ;;  %v4659_v52 = vmax.f32 %v4281_v63, 0.0  ;;  %v5046_v59 = vsel %vm511_vm0, %v4792_v49, 0.0 }
 0x231   : > { %v7175_v55 = vpop.f32.mrf.mxu0 }
 0x232   : > { %v4658_v0 = vmax.f32 %v4276_v6, 0.0  ;;  %5041 = vadd.xlane.f32.xlu1 %v5040_v16  ;;  %v4291_v41 = vadd.f32 %v8415_v18, %v7175_v55  ;;  %v5043_v53 = vsel %vm511_vm0, %v4791_v35, 0.0  ;;  %v4794_v44 = vmul.f32 %v8435_v47, %v4659_v52 }
 0x233   : > { %v4285_v56 = vpop.f32.mrf.mxu0 }
 0x234   : > { %5044 = vadd.xlane.f32.xlu0 %v5043_v53  ;;  %v4286_v57 = vadd.f32 %v8415_v18, %v4285_v56  ;;  %v4793_v9 = vmul.f32 %v8435_v47, %v4658_v0  ;;  %v4661_v54 = vmax.f32 %v4291_v41, 0.0  ;;  %v5052_v13 = vsel %vm511_vm0, %v4794_v44, 0.0 }
 0x235   : > { %v7178_v3 = vpop.f32.mrf.mxu0 }
 0x236   : > { %v4660_v61 = vmax.f32 %v4286_v57, 0.0  ;;  %5047 = vadd.xlane.f32.xlu1 %v5046_v59  ;;  %v4301_v1 = vadd.f32 %v8415_v18, %v7178_v3  ;;  %v5049_v2 = vsel %vm511_vm0, %v4793_v9, 0.0  ;;  %v4796_v24 = vmul.f32 %v8435_v47, %v4661_v54 }
 0x237   : > { %v4295_v4 = vpop.f32.mrf.mxu0 }
 0x238   : > { %v4663_v7 = vmax.f32 %v4301_v1, 0.0  ;;  %5050 = vadd.xlane.f32.xlu0 %v5049_v2  ;;  %v4296_v10 = vadd.f32 %v8415_v18, %v4295_v4  ;;  %v4795_v12 = vmul.f32 %v8435_v47, %v4660_v61  ;;  %v5058_v27 = vsel %vm511_vm0, %v4796_v24, 0.0 }
 0x239   : > { %v7181_v43 = vpop.f32.mrf.mxu0 }
 0x23a   : > { %v4662_v17 = vmax.f32 %v4296_v10, 0.0  ;;  %5053 = vadd.xlane.f32.xlu1 %v5052_v13  ;;  %v4311_v60 = vadd.f32 %v8415_v18, %v7181_v43  ;;  %v5055_v19 = vsel %vm511_vm0, %v4795_v12, 0.0  ;;  %v4798_v62 = vmul.f32 %v8435_v47, %v4663_v7 }
 0x23b   : > { %v4305_v20 = vpop.f32.mrf.mxu0 }
 0x23c   : > { %5056 = vadd.xlane.f32.xlu0 %v5055_v19  ;;  %v4306_v23 = vadd.f32 %v8415_v18, %v4305_v20  ;;  %v4665_v26 = vmax.f32 %v4311_v60, 0.0  ;;  %v4797_v11 = vmul.f32 %v8435_v47, %v4662_v17  ;;  %v5064_v37 = vsel %vm511_vm0, %v4798_v62, 0.0 }
 0x23d   : > { %v7184_v31 = vpop.f32.mrf.mxu0 }
 0x23e   : > { %v4664_v30 = vmax.f32 %v4306_v23, 0.0  ;;  %5059 = vadd.xlane.f32.xlu1 %v5058_v27  ;;  %v4321_v32 = vadd.f32 %v8415_v18, %v7184_v31  ;;  %v5061_v25 = vsel %vm511_vm0, %v4797_v11, 0.0  ;;  %v4800_v5 = vmul.f32 %v8435_v47, %v4665_v26 }
 0x23f   : > { %v4862_v34 = vpop.xlane.xlu0 %4861  ;;  %v4315_v38 = vpop.f32.mrf.mxu0 }
 0x240   : > { %v4667_v39 = vmax.f32 %v4321_v32, 0.0  ;;  %5065 = vadd.xlane.f32.xlu0 %v5064_v37  ;;  %v4316_v40 = vadd.f32 %v8415_v18, %v4315_v38  ;;  %v4799_v58 = vmul.f32 %v8435_v47, %v4664_v30  ;;  %v5244_v42 = vadd.f32 %v8465_v14, %v4862_v34 }
 0x241   : > { %v7187_v21 = vpop.f32.mrf.mxu0  ;;  %v5070_v29 = vsel %vm511_vm0, %v4800_v5, 0.0 }
 0x242   : > { %v4666_v15 = vmax.f32 %v4316_v40, 0.0  ;;  %5062 = vadd.xlane.f32.xlu1 %v5061_v25  ;;  %v4331_v45 = vadd.f32 %v8415_v18, %v7187_v21  ;;  %v5067_v46 = vsel %vm511_vm0, %v4799_v58, 0.0  ;;  %v4802_v51 = vmul.f32 %v8435_v47, %v4667_v39 }
 0x243   : > { %v4859_v48 = vpop.xlane.xlu0 %4858  ;;  %v4868_v28 = vpop.xlane.xlu1 %4867  ;;  %v5508_v6 = vrot.slane %v5244_v42, %v7532_v8 }
 0x244   : > { %v5243_v22 = vadd.f32 %v8465_v14, %v4859_v48  ;;  %5068 = vadd.xlane.f32.xlu0 %v5067_v46  ;;  %v4325_v36 = vpop.f32.mrf.mxu0  ;;  %v4801_v33 = vmul.f32 %v8435_v47, %v4666_v15  ;;  %v4669_v63 = vmax.f32 %v4331_v45, 0.0  ;;  %v5246_v52 = vadd.f32 %v8465_v14, %v4868_v28 }
 0x245   : > { %v4326_v50 = vadd.f32 %v8415_v18, %v4325_v36  ;;  %v5076_v9 = vsel %vm511_vm0, %v4802_v51, 0.0 }
 0x246   : > { %v5504_v35 = vrot.slane %v5243_v22, %v7532_v8  ;;  %5071 = vadd.xlane.f32.xlu1 %v5070_v29  ;;  %v7190_v16 = vpop.f32.mrf.mxu0  ;;  %v5073_v55 = vsel %vm511_vm0, %v4801_v33, 0.0  ;;  %v4804_v61 = vmul.f32 %v8435_v47, %v4669_v63  ;;  %v5516_v1 = vrot.slane %v5246_v52, %v7532_v8 }
 0x247   : > { %v4668_v49 = vmax.f32 %v4326_v50, 0.0  ;;  %v4341_v0 = vadd.f32 %v8415_v18, %v7190_v16  ;;  %v4865_v41 = vpop.xlane.xlu1 %4864 }
 0x248   : > { %v6014_v53 = vsel %vm6013_vm1, %v5508_v6, %v5504_v35  ;;  %v5245_v56 = vadd.f32 %v8465_v14, %v4865_v41  ;;  %5074 = vadd.xlane.f32.xlu0 %v5073_v55  ;;  %v4335_v57 = vpop.f32.mrf.mxu0  ;;  %v5082_v31 = vsel %vm511_vm0, %v4804_v61, 0.0 }
 0x249   : > { %v4671_v54 = vmax.f32 %v4341_v0, 0.0  ;;  %v4336_v59 = vadd.f32 %v8415_v18, %v4335_v57  ;;  %v4871_v3 = vpop.xlane.xlu0 %4870  ;;  %v4803_v44 = vmul.f32 %v8435_v47, %v4668_v49 }
 0x24a   : > { %v5512_v2 = vrot.slane %v5245_v56, %v7532_v8  ;;  %v5247_v4 = vadd.f32 %v8465_v14, %v4871_v3  ;;  %5077 = vadd.xlane.f32.xlu1 %v5076_v9  ;;  %v7193_v7 = vpop.f32.mrf.mxu0 }
 0x24b   : > { %v4670_v10 = vmax.f32 %v4336_v59, 0.0  ;;  %v4351_v12 = vadd.f32 %v8415_v18, %v7193_v7  ;;  %v4874_v13 = vpop.xlane.xlu1 %4873  ;;  %v5079_v43 = vsel %vm511_vm0, %v4803_v44, 0.0  ;;  %v4806_v24 = vmul.f32 %v8435_v47, %v4671_v54 }
 0x24c   : > { %v6016_v17 = vsel %vm6015_vm2, %v5512_v2, %v6014_v53  ;;  %v5520_v60 = vrot.slane %v5247_v4, %v7532_v8  ;;  %v5248_v19 = vadd.f32 %v8465_v14, %v4874_v13  ;;  %5080 = vadd.xlane.f32.xlu0 %v5079_v43  ;;  %v4345_v20 = vpop.f32.mrf.mxu0 }
 0x24d   : > { %v6018_v62 = vsel %vm6017_vm3, %v5516_v1, %v6016_v17  ;;  %v4673_v23 = vmax.f32 %v4351_v12, 0.0  ;;  %v4346_v26 = vadd.f32 %v8415_v18, %v4345_v20  ;;  %v4877_v27 = vpop.xlane.xlu0 %4876  ;;  %v4805_v37 = vmul.f32 %v8435_v47, %v4670_v10 }
 0x24e   : > { %v6020_v11 = vsel %vm6019_vm4, %v5520_v60, %v6018_v62  ;;  %v5524_v30 = vrot.slane %v5248_v19, %v7532_v8  ;;  %v5249_v32 = vadd.f32 %v8465_v14, %v4877_v27  ;;  %5083 = vadd.xlane.f32.xlu1 %v5082_v31  ;;  %v7196_v34 = vpop.f32.mrf.mxu0  ;;  %v5088_v58 = vsel %vm511_vm0, %v4806_v24, 0.0 }
 0x24f   : > { %v4672_v38 = vmax.f32 %v4346_v26, 0.0  ;;  %v4361_v39 = vadd.f32 %v8415_v18, %v7196_v34  ;;  %v4880_v40 = vpop.xlane.xlu1 %4879  ;;  %v4808_v42 = vmul.f32 %v8435_v47, %v4673_v23  ;;  %v5085_v28 = vsel %vm511_vm0, %v4805_v37, 0.0 }
 0x250   : > { %v5528_v25 = vrot.slane %v5249_v32, %v7532_v8  ;;  %v5250_v21 = vadd.f32 %v8465_v14, %v4880_v40  ;;  %5089 = vadd.xlane.f32.xlu0 %v5088_v58  ;;  %v4355_v5 = vpop.f32.mrf.mxu0  ;;  %v6022_v15 = vsel %vm6021_vm5, %v5524_v30, %v6020_v11 }
 0x251   : > { %v4675_v45 = vmax.f32 %v4361_v39, 0.0  ;;  %v4356_v46 = vadd.f32 %v8415_v18, %v4355_v5  ;;  %v4883_v48 = vpop.xlane.xlu0 %4882  ;;  %v4807_v22 = vmul.f32 %v8435_v47, %v4672_v38  ;;  %v5094_v56 = vsel %vm511_vm0, %v4808_v42, 0.0 }
 0x252   : > { %v5532_v36 = vrot.slane %v5250_v21, %v7532_v8  ;;  %v5251_v33 = vadd.f32 %v8465_v14, %v4883_v48  ;;  %5086 = vadd.xlane.f32.xlu1 %v5085_v28  ;;  %v7199_v51 = vpop.f32.mrf.mxu0  ;;  %v6024_v63 = vsel %vm6023_vm6, %v5528_v25, %v6022_v15 }
 0x253   : > { %v4674_v50 = vmax.f32 %v4356_v46, 0.0  ;;  %v4371_v29 = vadd.f32 %v8415_v18, %v7199_v51  ;;  %v4886_v6 = vpop.xlane.xlu1 %4885  ;;  %v5091_v35 = vsel %vm511_vm0, %v4807_v22, 0.0  ;;  %v4810_v55 = vmul.f32 %v8435_v47, %v4675_v45 }
 0x254   : > { %v5252_v52 = vadd.f32 %v8465_v14, %v4886_v6  ;;  %5092 = vadd.xlane.f32.xlu0 %v5091_v35  ;;  %v4365_v16 = vpop.f32.mrf.mxu0  ;;  %v8524_v49 = vsel %vm6025_vm7, %v5532_v36, %v6024_v63  ;;  %v5536_v9 = vrot.slane %v5251_v33, %v7532_v8 }
 0x255   : > { %v4677_v0 = vmax.f32 %v4371_v29, 0.0  ;;  %v4366_v41 = vadd.f32 %v8415_v18, %v4365_v16  ;;  %v4889_v53 = vpop.xlane.xlu0 %4888  ;;  %v4809_v57 = vmul.f32 %v8435_v47, %v4674_v50  ;;  %v5100_v13 = vsel %vm511_vm0, %v4810_v55, 0.0 }
 0x256   : > { %v5540_v54 = vrot.slane %v5252_v52, %v7532_v8  ;;  %v5253_v59 = vadd.f32 %v8465_v14, %v4889_v53  ;;  %5095 = vadd.xlane.f32.xlu1 %v5094_v56  ;;  %v7202_v3 = vpop.f32.mrf.mxu0 }
 0x257   : > { %v4676_v44 = vmax.f32 %v4366_v41, 0.0  ;;  %v4381_v61 = vadd.f32 %v8415_v18, %v7202_v3  ;;  %v4892_v1 = vpop.xlane.xlu1 %4891  ;;  %v5097_v2 = vsel %vm511_vm0, %v4809_v57, 0.0  ;;  %v4812_v19 = vmul.f32 %v8435_v47, %v4677_v0 }
 0x258   : > { %v6027_v4 = vsel %vm6013_vm1, %v5540_v54, %v5536_v9  ;;  %v5544_v7 = vrot.slane %v5253_v59, %v7532_v8  ;;  %v5254_v10 = vadd.f32 %v8465_v14, %v4892_v1  ;;  %5098 = vadd.xlane.f32.xlu0 %v5097_v2  ;;  %v4375_v12 = vpop.f32.mrf.mxu0 }
 0x259   : > { %v4679_v43 = vmax.f32 %v4381_v61, 0.0  ;;  %v4376_v24 = vadd.f32 %v8415_v18, %v4375_v12  ;;  %v4895_v17 = vpop.xlane.xlu0 %4894  ;;  %v4811_v60 = vmul.f32 %v8435_v47, %v4676_v44  ;;  %v5106_v21 = vsel %vm511_vm0, %v4812_v19, 0.0 }
 0x25a   : > { %v6028_v20 = vsel %vm6015_vm2, %v5544_v7, %v6027_v4  ;;  %v5548_v62 = vrot.slane %v5254_v10, %v7532_v8  ;;  %v5255_v23 = vadd.f32 %v8465_v14, %v4895_v17  ;;  %5101 = vadd.xlane.f32.xlu1 %v5100_v13  ;;  %v7205_v26 = vpop.f32.mrf.mxu0 }
 0x25b   : > { %v4678_v27 = vmax.f32 %v4376_v24, 0.0  ;;  %v4391_v31 = vadd.f32 %v8415_v18, %v7205_v26  ;;  %v4898_v11 = vpop.xlane.xlu1 %4897  ;;  %v5103_v30 = vsel %vm511_vm0, %v4811_v60, 0.0  ;;  %v4814_v32 = vmul.f32 %v8435_v47, %v4679_v43 }
 0x25c   : > { %v6029_v34 = vsel %vm6017_vm3, %v5548_v62, %v6028_v20  ;;  %v5552_v37 = vrot.slane %v5255_v23, %v7532_v8  ;;  %v5256_v38 = vadd.f32 %v8465_v14, %v4898_v11  ;;  %5104 = vadd.xlane.f32.xlu0 %v5103_v30  ;;  %v4385_v39 = vpop.f32.mrf.mxu0 }
 0x25d   : > { %v4681_v40 = vmax.f32 %v4391_v31, 0.0  ;;  %v4386_v58 = vadd.f32 %v8415_v18, %v4385_v39  ;;  %v4901_v25 = vpop.xlane.xlu0 %4900  ;;  %v4813_v5 = vmul.f32 %v8435_v47, %v4678_v27  ;;  %v5112_v36 = vsel %vm511_vm0, %v4814_v32, 0.0 }
 0x25e   : > { %v6030_v42 = vsel %vm6019_vm4, %v5552_v37, %v6029_v34  ;;  %v5556_v15 = vrot.slane %v5256_v38, %v7532_v8  ;;  %v5257_v45 = vadd.f32 %v8465_v14, %v4901_v25  ;;  %5107 = vadd.xlane.f32.xlu1 %v5106_v21  ;;  %v7208_v46 = vpop.f32.mrf.mxu0 }
 0x25f   : > { %v4680_v48 = vmax.f32 %v4386_v58, 0.0  ;;  %v4401_v28 = vadd.f32 %v8415_v18, %v7208_v46  ;;  %v4904_v22 = vpop.xlane.xlu1 %4903  ;;  %v5109_v50 = vsel %vm511_vm0, %v4813_v5, 0.0  ;;  %v4816_v55 = vmul.f32 %v8435_v47, %v4681_v40 }
 0x260   : > { %v5560_v33 = vrot.slane %v5257_v45, %v7532_v8  ;;  %v5258_v51 = vadd.f32 %v8465_v14, %v4904_v22  ;;  %5113 = vadd.xlane.f32.xlu0 %v5112_v36  ;;  %v4395_v63 = vpop.f32.mrf.mxu0  ;;  %v6031_v29 = vsel %vm6021_vm5, %v5556_v15, %v6030_v42 }
 0x261   : > { %v4683_v6 = vmax.f32 %v4401_v28, 0.0  ;;  %v4396_v35 = vadd.f32 %v8415_v18, %v4395_v63  ;;  %v4907_v52 = vpop.xlane.xlu0 %4906  ;;  %v4815_v16 = vmul.f32 %v8435_v47, %v4680_v48  ;;  %v5118_v10 = vsel %vm511_vm0, %v4816_v55, 0.0 }
 0x262   : > { %v5564_v0 = vrot.slane %v5258_v51, %v7532_v8  ;;  %v5259_v41 = vadd.f32 %v8465_v14, %v4907_v52  ;;  %5110 = vadd.xlane.f32.xlu1 %v5109_v50  ;;  %v7211_v53 = vpop.f32.mrf.mxu0  ;;  %v6032_v56 = vsel %vm6023_vm6, %v5560_v33, %v6031_v29 }
 0x263   : > { %v4682_v57 = vmax.f32 %v4396_v35, 0.0  ;;  %v4411_v9 = vadd.f32 %v8415_v18, %v7211_v53  ;;  %v4910_v54 = vpop.xlane.xlu1 %4909  ;;  %v5115_v59 = vsel %vm511_vm0, %v4815_v16, 0.0  ;;  %v4818_v61 = vmul.f32 %v8435_v47, %v4683_v6 }
 0x264   : > { %v5260_v3 = vadd.f32 %v8465_v14, %v4910_v54  ;;  %5116 = vadd.xlane.f32.xlu0 %v5115_v59  ;;  %v4405_v44 = vpop.f32.mrf.mxu0  ;;  %v8573_v1 = vsel %vm6025_vm7, %v5564_v0, %v6032_v56  ;;  %v5568_v13 = vrot.slane %v5259_v41, %v7532_v8 }
 0x265   : > { %v4685_v2 = vmax.f32 %v4411_v9, 0.0  ;;  %v4406_v4 = vadd.f32 %v8415_v18, %v4405_v44  ;;  %v4913_v7 = vpop.xlane.xlu0 %4912  ;;  %v4817_v12 = vmul.f32 %v8435_v47, %v4682_v57  ;;  %v5124_v11 = vsel %vm511_vm0, %v4818_v61, 0.0 }
 0x266   : > { %v5572_v43 = vrot.slane %v5260_v3, %v7532_v8  ;;  %v5261_v24 = vadd.f32 %v8465_v14, %v4913_v7  ;;  %5119 = vadd.xlane.f32.xlu1 %v5118_v10  ;;  %v7214_v17 = vpop.f32.mrf.mxu0 }
 0x267   : > { %v4684_v60 = vmax.f32 %v4406_v4, 0.0  ;;  %v4421_v19 = vadd.f32 %v8415_v18, %v7214_v17  ;;  %v4916_v20 = vpop.xlane.xlu1 %4915  ;;  %v5121_v62 = vsel %vm511_vm0, %v4817_v12, 0.0  ;;  %v4820_v38 = vmul.f32 %v8435_v47, %v4685_v2 }
 0x268   : > { %v6034_v23 = vsel %vm6013_vm1, %v5572_v43, %v5568_v13  ;;  %v5576_v26 = vrot.slane %v5261_v24, %v7532_v8  ;;  %v5262_v27 = vadd.f32 %v8465_v14, %v4916_v20  ;;  %5122 = vadd.xlane.f32.xlu0 %v5121_v62  ;;  %v4415_v31 = vpop.f32.mrf.mxu0 }
 0x269   : > { %v4687_v30 = vmax.f32 %v4421_v19, 0.0  ;;  %v4416_v32 = vadd.f32 %v8415_v18, %v4415_v31  ;;  %v4919_v34 = vpop.xlane.xlu0 %4918  ;;  %v4819_v37 = vmul.f32 %v8435_v47, %v4684_v60  ;;  %v5130_v63 = vsel %vm511_vm0, %v4820_v38, 0.0 }
 0x26a   : > { %v6035_v39 = vsel %vm6015_vm2, %v5576_v26, %v6034_v23  ;;  %v5580_v40 = vrot.slane %v5262_v27, %v7532_v8  ;;  %v5263_v58 = vadd.f32 %v8465_v14, %v4919_v34  ;;  %5125 = vadd.xlane.f32.xlu1 %v5124_v11  ;;  %v7217_v25 = vpop.f32.mrf.mxu0 }
 0x26b   : > { %v4686_v21 = vmax.f32 %v4416_v32, 0.0  ;;  %v4431_v5 = vadd.f32 %v8415_v18, %v7217_v25  ;;  %v4922_v42 = vpop.xlane.xlu1 %4921  ;;  %v5127_v15 = vsel %vm511_vm0, %v4819_v37, 0.0  ;;  %v4822_v45 = vmul.f32 %v8435_v47, %v4687_v30 }
 0x26c   : > { %v6036_v46 = vsel %vm6017_vm3, %v5580_v40, %v6035_v39  ;;  %v5584_v48 = vrot.slane %v5263_v58, %v7532_v8  ;;  %v5264_v28 = vadd.f32 %v8465_v14, %v4922_v42  ;;  %5128 = vadd.xlane.f32.xlu0 %v5127_v15  ;;  %v4425_v22 = vpop.f32.mrf.mxu0 }
 0x26d   : > { %v4689_v36 = vmax.f32 %v4431_v5, 0.0  ;;  %v4426_v33 = vadd.f32 %v8415_v18, %v4425_v22  ;;  %v4925_v51 = vpop.xlane.xlu0 %4924  ;;  %v4821_v50 = vmul.f32 %v8435_v47, %v4686_v21  ;;  %v5136_v41 = vsel %vm511_vm0, %v4822_v45, 0.0 }
 0x26e   : > { %v6037_v29 = vsel %vm6019_vm4, %v5584_v48, %v6036_v46  ;;  %v5588_v6 = vrot.slane %v5264_v28, %v7532_v8  ;;  %v5265_v35 = vadd.f32 %v8465_v14, %v4925_v51  ;;  %5131 = vadd.xlane.f32.xlu1 %v5130_v63  ;;  %v7220_v52 = vpop.f32.mrf.mxu0 }
 0x26f   : > { %v4688_v16 = vmax.f32 %v4426_v33, 0.0  ;;  %v4441_v55 = vadd.f32 %v8415_v18, %v7220_v52  ;;  %v4928_v0 = vpop.xlane.xlu1 %4927  ;;  %v5133_v9 = vsel %vm511_vm0, %v4821_v50, 0.0  ;;  %v4824_v2 = vmul.f32 %v8435_v47, %v4689_v36 }
 0x270   : > { %v5592_v53 = vrot.slane %v5265_v35, %v7532_v8  ;;  %v5266_v56 = vadd.f32 %v8465_v14, %v4928_v0  ;;  %5137 = vadd.xlane.f32.xlu0 %v5136_v41  ;;  %v4435_v57 = vpop.f32.mrf.mxu0  ;;  %v6038_v54 = vsel %vm6021_vm5, %v5588_v6, %v6037_v29 }
 0x271   : > { %v4691_v59 = vmax.f32 %v4441_v55, 0.0  ;;  %v4436_v3 = vadd.f32 %v8415_v18, %v4435_v57  ;;  %v4931_v44 = vpop.xlane.xlu0 %4930  ;;  %v4823_v61 = vmul.f32 %v8435_v47, %v4688_v16  ;;  %v5142_v31 = vsel %vm511_vm0, %v4824_v2, 0.0 }
 0x272   : > { %v5596_v4 = vrot.slane %v5266_v56, %v7532_v8  ;;  %v5267_v7 = vadd.f32 %v8465_v14, %v4931_v44  ;;  %5134 = vadd.xlane.f32.xlu1 %v5133_v9  ;;  %v7223_v10 = vpop.f32.mrf.mxu0  ;;  %v6039_v12 = vsel %vm6023_vm6, %v5592_v53, %v6038_v54 }
 0x273   : > { %v4690_v13 = vmax.f32 %v4436_v3, 0.0  ;;  %v4451_v43 = vadd.f32 %v8415_v18, %v7223_v10  ;;  %v4934_v24 = vpop.xlane.xlu1 %4933  ;;  %v5139_v17 = vsel %vm511_vm0, %v4823_v61, 0.0  ;;  %v4826_v20 = vmul.f32 %v8435_v47, %v4691_v59 }
 0x274   : > { %v5268_v60 = vadd.f32 %v8465_v14, %v4934_v24  ;;  %5140 = vadd.xlane.f32.xlu0 %v5139_v17  ;;  %v4445_v19 = vpop.f32.mrf.mxu0  ;;  %v8622_v62 = vsel %vm6025_vm7, %v5596_v4, %v6039_v12  ;;  %v5600_v30 = vrot.slane %v5267_v7, %v7532_v8 }
 0x275   : > { %v4693_v23 = vmax.f32 %v4451_v43, 0.0  ;;  %v4446_v26 = vadd.f32 %v8415_v18, %v4445_v19  ;;  %v4937_v27 = vpop.xlane.xlu0 %4936  ;;  %v4825_v11 = vmul.f32 %v8435_v47, %v4690_v13  ;;  %v5148_v15 = vsel %vm511_vm0, %v4826_v20, 0.0 }
 0x276   : > { %v5604_v32 = vrot.slane %v5268_v60, %v7532_v8  ;;  %v5269_v34 = vadd.f32 %v8465_v14, %v4937_v27  ;;  %5143 = vadd.xlane.f32.xlu1 %v5142_v31  ;;  %v7226_v37 = vpop.f32.mrf.mxu0 }
 0x277   : > { %v4692_v38 = vmax.f32 %v4446_v26, 0.0  ;;  %v4461_v39 = vadd.f32 %v8415_v18, %v7226_v37  ;;  %v4940_v40 = vpop.xlane.xlu1 %4939  ;;  %v5145_v58 = vsel %vm511_vm0, %v4825_v11, 0.0  ;;  %v4828_v45 = vmul.f32 %v8435_v47, %v4693_v23 }
 0x278   : > { %v6041_v25 = vsel %vm6013_vm1, %v5604_v32, %v5600_v30  ;;  %v5608_v21 = vrot.slane %v5269_v34, %v7532_v8  ;;  %v5270_v5 = vadd.f32 %v8465_v14, %v4940_v40  ;;  %5146 = vadd.xlane.f32.xlu0 %v5145_v58  ;;  %v4455_v42 = vpop.f32.mrf.mxu0 }
 0x279   : > { %v4827_v46 = vmul.f32 %v8435_v47, %v4692_v38  ;;  %v4695_v48 = vmax.f32 %v4461_v39, 0.0  ;;  %v4456_v28 = vadd.f32 %v8415_v18, %v4455_v42  ;;  %v4943_v22 = vpop.xlane.xlu0 %4942  ;;  %v5154_v54 = vsel %vm511_vm0, %v4828_v45, 0.0 }
 0x27a   : > { %v6042_v36 = vsel %vm6015_vm2, %v5608_v21, %v6041_v25  ;;  %v5612_v33 = vrot.slane %v5270_v5, %v7532_v8  ;;  %v5271_v51 = vadd.f32 %v8465_v14, %v4943_v22  ;;  %5149 = vadd.xlane.f32.xlu1 %v5148_v15  ;;  %v7229_v63 = vpop.f32.mrf.mxu0 }
 0x27b   : > { %v4830_v50 = vmul.f32 %v8435_v47, %v4695_v48  ;;  %v4694_v29 = vmax.f32 %v4456_v28, 0.0  ;;  %v4471_v6 = vadd.f32 %v8415_v18, %v7229_v63  ;;  %v4946_v35 = vpop.xlane.xlu1 %4945  ;;  %v5151_v52 = vsel %vm511_vm0, %v4827_v46, 0.0 }
 0x27c   : > { %v6043_v16 = vsel %vm6017_vm3, %v5612_v33, %v6042_v36  ;;  %v5616_v55 = vrot.slane %v5271_v51, %v7532_v8  ;;  %v5272_v0 = vadd.f32 %v8465_v14, %v4946_v35  ;;  %5152 = vadd.xlane.f32.xlu0 %v5151_v52  ;;  %v4465_v41 = vpop.f32.mrf.mxu0 }
 0x27d   : > { %v4829_v53 = vmul.f32 %v8435_v47, %v4694_v29  ;;  %v4697_v56 = vmax.f32 %v4471_v6, 0.0  ;;  %v4466_v57 = vadd.f32 %v8415_v18, %v4465_v41  ;;  %v4949_v9 = vpop.xlane.xlu0 %4948  ;;  %v5160_v10 = vsel %vm511_vm0, %v4830_v50, 0.0 }
 0x27e   : > { %v6044_v59 = vsel %vm6019_vm4, %v5616_v55, %v6043_v16  ;;  %v5620_v3 = vrot.slane %v5272_v0, %v7532_v8  ;;  %v5273_v44 = vadd.f32 %v8465_v14, %v4949_v9  ;;  %5155 = vadd.xlane.f32.xlu1 %v5154_v54  ;;  %v7232_v61 = vpop.f32.mrf.mxu0 }
 0x27f   : > { %v4696_v2 = vmax.f32 %v4466_v57, 0.0  ;;  %v4481_v4 = vadd.f32 %v8415_v18, %v7232_v61  ;;  %v4952_v7 = vpop.xlane.xlu1 %4951  ;;  %v4832_v12 = vmul.f32 %v8435_v47, %v4697_v56  ;;  %v5157_v26 = vsel %vm511_vm0, %v4829_v53, 0.0 }
 0x280   : > { %v5624_v13 = vrot.slane %v5273_v44, %v7532_v8  ;;  %v5274_v43 = vadd.f32 %v8465_v14, %v4952_v7  ;;  %5161 = vadd.xlane.f32.xlu0 %v5160_v10  ;;  %v4475_v24 = vpop.f32.mrf.mxu0  ;;  %v6045_v17 = vsel %vm6021_vm5, %v5620_v3, %v6044_v59 }
 0x281   : > { %v4831_v60 = vmul.f32 %v8435_v47, %v4696_v2  ;;  %v4699_v19 = vmax.f32 %v4481_v4, 0.0  ;;  %v4476_v20 = vadd.f32 %v8415_v18, %v4475_v24  ;;  %v4955_v23 = vpop.xlane.xlu0 %4954  ;;  %v5166_v45 = vsel %vm511_vm0, %v4832_v12, 0.0 }
 0x282   : > { %v5628_v27 = vrot.slane %v5274_v43, %v7532_v8  ;;  %v5275_v31 = vadd.f32 %v8465_v14, %v4955_v23  ;;  %5158 = vadd.xlane.f32.xlu1 %v5157_v26  ;;  %v7235_v11 = vpop.f32.mrf.mxu0  ;;  %v6046_v30 = vsel %vm6023_vm6, %v5624_v13, %v6045_v17 }
 0x283   : > { %v4698_v32 = vmax.f32 %v4476_v20, 0.0  ;;  %v4491_v34 = vadd.f32 %v8415_v18, %v7235_v11  ;;  %v4958_v37 = vpop.xlane.xlu1 %4957  ;;  %v5163_v38 = vsel %vm511_vm0, %v4831_v60, 0.0  ;;  %v4834_v39 = vmul.f32 %v8435_v47, %v4699_v19 }
 0x284   : > { %v5276_v40 = vadd.f32 %v8465_v14, %v4958_v37  ;;  %5164 = vadd.xlane.f32.xlu0 %v5163_v38  ;;  %v4485_v58 = vpop.f32.mrf.mxu0  ;;  %v8671_v25 = vsel %vm6025_vm7, %v5628_v27, %v6046_v30  ;;  %v5632_v46 = vrot.slane %v5275_v31, %v7532_v8 }
 0x285   : > { %v4833_v21 = vmul.f32 %v8435_v47, %v4698_v32  ;;  %v4701_v5 = vmax.f32 %v4491_v34, 0.0  ;;  %v4486_v42 = vadd.f32 %v8415_v18, %v4485_v58  ;;  %v4961_v15 = vpop.xlane.xlu0 %4960  ;;  %v5172_v52 = vsel %vm511_vm0, %v4834_v39, 0.0 }
 0x286   : > { %v5636_v48 = vrot.slane %v5276_v40, %v7532_v8  ;;  %v5277_v28 = vadd.f32 %v8465_v14, %v4961_v15  ;;  %5167 = vadd.xlane.f32.xlu1 %v5166_v45  ;;  %v7238_v22 = vpop.f32.mrf.mxu0 }
 0x287   : > { %v4700_v36 = vmax.f32 %v4486_v42, 0.0  ;;  %v4501_v33 = vadd.f32 %v8415_v18, %v7238_v22  ;;  %v4964_v51 = vpop.xlane.xlu1 %4963  ;;  %v5169_v63 = vsel %vm511_vm0, %v4833_v21, 0.0  ;;  %v4836_v16 = vmul.f32 %v8435_v47, %v4701_v5 }
 0x288   : > { %v6048_v50 = vsel %vm6013_vm1, %v5636_v48, %v5632_v46  ;;  %v5640_v29 = vrot.slane %v5277_v28, %v7532_v8  ;;  %v5278_v6 = vadd.f32 %v8465_v14, %v4964_v51  ;;  %5170 = vadd.xlane.f32.xlu0 %v5169_v63  ;;  %v4495_v35 = vpop.f32.mrf.mxu0 }
 0x289   : > { %v4835_v55 = vmul.f32 %v8435_v47, %v4700_v36  ;;  %v4703_v0 = vmax.f32 %v4501_v33, 0.0  ;;  %v4496_v41 = vadd.f32 %v8415_v18, %v4495_v35  ;;  %v4967_v53 = vpop.xlane.xlu0 %4966  ;;  %v5178_v60 = vsel %vm511_vm0, %v4836_v16, 0.0 }
 0x28a   : > { %v6049_v56 = vsel %vm6015_vm2, %v5640_v29, %v6048_v50  ;;  %v5644_v57 = vrot.slane %v5278_v6, %v7532_v8  ;;  %v5279_v9 = vadd.f32 %v8465_v14, %v4967_v53  ;;  %5173 = vadd.xlane.f32.xlu1 %v5172_v52  ;;  %v7241_v54 = vpop.f32.mrf.mxu0 }
 0x28b   : > { %v4838_v59 = vmul.f32 %v8435_v47, %v4703_v0  ;;  %v4702_v3 = vmax.f32 %v4496_v41, 0.0  ;;  %v4511_v44 = vadd.f32 %v8415_v18, %v7241_v54  ;;  %v4970_v61 = vpop.xlane.xlu1 %4969  ;;  %v5175_v2 = vsel %vm511_vm0, %v4835_v55, 0.0 }
 0x28c   : > { %v6050_v4 = vsel %vm6017_vm3, %v5644_v57, %v6049_v56  ;;  %v5648_v7 = vrot.slane %v5279_v9, %v7532_v8  ;;  %v5280_v10 = vadd.f32 %v8465_v14, %v4970_v61  ;;  %5176 = vadd.xlane.f32.xlu0 %v5175_v2  ;;  %v4505_v12 = vpop.f32.mrf.mxu0  ;;  %v8731_v9 = vld [vmem:[%s9077_s6] ss:$0 sm:$0xff] }
 0x28d   : > { %v4837_v13 = vmul.f32 %v8435_v47, %v4702_v3  ;;  %v4705_v43 = vmax.f32 %v4511_v44, 0.0  ;;  %v4506_v24 = vadd.f32 %v8415_v18, %v4505_v12  ;;  %v4973_v17 = vpop.xlane.xlu0 %4972  ;;  %v5184_v30 = vsel %vm511_vm0, %v4838_v59, 0.0 }
 0x28e   : > { %v6051_v19 = vsel %vm6019_vm4, %v5648_v7, %v6050_v4  ;;  %v5652_v20 = vrot.slane %v5280_v10, %v7532_v8  ;;  %v5281_v23 = vadd.f32 %v8465_v14, %v4973_v17  ;;  %5179 = vadd.xlane.f32.xlu1 %v5178_v60  ;;  %v7244_v26 = vpop.f32.mrf.mxu0 }
 0x28f   : > { %v4704_v27 = vmax.f32 %v4506_v24, 0.0  ;;  %v4521_v31 = vadd.f32 %v8415_v18, %v7244_v26  ;;  %v4976_v11 = vpop.xlane.xlu1 %4975  ;;  %v4840_v32 = vmul.f32 %v8435_v47, %v4705_v43  ;;  %v5181_v42 = vsel %vm511_vm0, %v4837_v13, 0.0 }
 0x290   : > { %v5656_v34 = vrot.slane %v5281_v23, %v7532_v8  ;;  %v5282_v37 = vadd.f32 %v8465_v14, %v4976_v11  ;;  %5185 = vadd.xlane.f32.xlu0 %v5184_v30  ;;  %v4515_v38 = vpop.f32.mrf.mxu0  ;;  %v6052_v39 = vsel %vm6021_vm5, %v5652_v20, %v6051_v19 }
 0x291   : > { %v4839_v40 = vmul.f32 %v8435_v47, %v4704_v27  ;;  %v4707_v58 = vmax.f32 %v4521_v31, 0.0  ;;  %v4516_v21 = vadd.f32 %v8415_v18, %v4515_v38  ;;  %v4979_v5 = vpop.xlane.xlu0 %4978  ;;  %v5190_v55 = vsel %vm511_vm0, %v4840_v32, 0.0 }
 0x292   : > { %v5660_v15 = vrot.slane %v5282_v37, %v7532_v8  ;;  %v5283_v45 = vadd.f32 %v8465_v14, %v4979_v5  ;;  %5182 = vadd.xlane.f32.xlu1 %v5181_v42  ;;  %v7247_v46 = vpop.f32.mrf.mxu0  ;;  %v6053_v48 = vsel %vm6023_vm6, %v5656_v34, %v6052_v39  ;;  %v8754_v37 = vld [vmem:[%s9078_s7] ss:$0 sm:$0xff] }
 0x293   : > { %v4706_v28 = vmax.f32 %v4516_v21, 0.0  ;;  %v4531_v22 = vadd.f32 %v8415_v18, %v7247_v46  ;;  %v4982_v36 = vpop.xlane.xlu1 %4981  ;;  %v5187_v33 = vsel %vm511_vm0, %v4839_v40, 0.0  ;;  %v4842_v51 = vmul.f32 %v8435_v47, %v4707_v58 }
 0x294   : > { %v5284_v63 = vadd.f32 %v8465_v14, %v4982_v36  ;;  %5188 = vadd.xlane.f32.xlu0 %v5187_v33  ;;  %v4525_v50 = vpop.f32.mrf.mxu0  ;;  %v8720_v29 = vsel %vm6025_vm7, %v5660_v15, %v6053_v48  ;;  %v5664_v0 = vrot.slane %v5283_v45, %v7532_v8 }
 0x295   : > { %v4841_v6 = vmul.f32 %v8435_v47, %v4706_v28  ;;  %v4709_v35 = vmax.f32 %v4531_v22, 0.0  ;;  %v4526_v52 = vadd.f32 %v8415_v18, %v4525_v50  ;;  %v4985_v16 = vpop.xlane.xlu0 %4984  ;;  %v5196_v4 = vsel %vm511_vm0, %v4842_v51, 0.0 }
 0x296   : > { %v5668_v41 = vrot.slane %v5284_v63, %v7532_v8  ;;  %v5285_v53 = vadd.f32 %v8465_v14, %v4985_v16  ;;  %5191 = vadd.xlane.f32.xlu1 %v5190_v55  ;;  %v7250_v56 = vpop.f32.mrf.mxu0 }
 0x297   : > { %v4708_v57 = vmax.f32 %v4526_v52, 0.0  ;;  %v4541_v54 = vadd.f32 %v8731_v9, %v7250_v56  ;;  %v4988_v18 = vpop.xlane.xlu1 %4987  ;;  %v5193_v59 = vsel %vm511_vm0, %v4841_v6, 0.0  ;;  %v4844_v7 = vmul.f32 %v8435_v47, %v4709_v35 }
 0x298   : > { %v6055_v3 = vsel %vm6013_vm1, %v5668_v41, %v5664_v0  ;;  %v5672_v44 = vrot.slane %v5285_v53, %v7532_v8  ;;  %v5286_v61 = vadd.f32 %v8465_v14, %v4988_v18  ;;  %5194 = vadd.xlane.f32.xlu0 %v5193_v59  ;;  %v4535_v2 = vpop.f32.mrf.mxu0 }
 0x299   : > { %v4843_v10 = vmul.f32 %v8435_v47, %v4708_v57  ;;  %v4711_v12 = vmax.f32 %v4541_v54, 0.0  ;;  %v4536_v13 = vadd.f32 %v8731_v9, %v4535_v2  ;;  %v4991_v43 = vpop.xlane.xlu0 %4990  ;;  %v5202_v58 = vsel %vm511_vm0, %v4844_v7, 0.0 }
 0x29a   : > { %v6056_v24 = vsel %vm6015_vm2, %v5672_v44, %v6055_v3  ;;  %v5676_v17 = vrot.slane %v5286_v61, %v7532_v8  ;;  %v5287_v60 = vadd.f32 %v8465_v14, %v4991_v43  ;;  %5197 = vadd.xlane.f32.xlu1 %v5196_v4  ;;  %v7253_v19 = vpop.f32.mrf.mxu0 }
 0x29b   : > { %v4846_v20 = vmul.f32 %v8435_v47, %v4711_v12  ;;  %v4710_v23 = vmax.f32 %v4536_v13, 0.0  ;;  %v4551_v26 = vadd.f32 %v8731_v9, %v7253_v19  ;;  %v4994_v27 = vpop.xlane.xlu1 %4993  ;;  %v5199_v31 = vsel %vm511_vm0, %v4843_v10, 0.0 }
 0x29c   : > { %v6057_v11 = vsel %vm6017_vm3, %v5676_v17, %v6056_v24  ;;  %v5680_v30 = vrot.slane %v5287_v60, %v7532_v8  ;;  %v5288_v32 = vadd.f32 %v8465_v14, %v4994_v27  ;;  %5200 = vadd.xlane.f32.xlu0 %v5199_v31  ;;  %v4545_v34 = vpop.f32.mrf.mxu0 }
 0x29d   : > { %v4845_v47 = vmul.f32 %v8754_v37, %v4710_v23  ;;  %v4713_v38 = vmax.f32 %v4551_v26, 0.0  ;;  %v4546_v39 = vadd.f32 %v8731_v9, %v4545_v34  ;;  %v4997_v40 = vpop.xlane.xlu0 %4996  ;;  %v5208_v22 = vsel %vm511_vm0, %v4846_v20, 0.0 }
 0x29e   : > { %v6058_v21 = vsel %vm6019_vm4, %v5680_v30, %v6057_v11  ;;  %v5684_v5 = vrot.slane %v5288_v32, %v7532_v8  ;;  %v5289_v42 = vadd.f32 %v8465_v14, %v4997_v40  ;;  %5203 = vadd.xlane.f32.xlu1 %v5202_v58  ;;  %v7256_v15 = vpop.f32.mrf.mxu0 }
 0x29f   : > { %v4848_v45 = vmul.f32 %v8754_v37, %v4713_v38  ;;  %v4712_v46 = vmax.f32 %v4546_v39, 0.0  ;;  %v4561_v48 = vadd.f32 %v8731_v9, %v7256_v15  ;;  %v5000_v28 = vpop.xlane.xlu1 %4999  ;;  %v5205_v52 = vsel %vm511_vm0, %v4845_v47, 0.0 }
 0x2a0   : > { %v5688_v36 = vrot.slane %v5289_v42, %v7532_v8  ;;  %v5290_v33 = vadd.f32 %v8465_v14, %v5000_v28  ;;  %5209 = vadd.xlane.f32.xlu0 %v5208_v22  ;;  %v4555_v51 = vpop.f32.mrf.mxu0  ;;  %v6059_v63 = vsel %vm6021_vm5, %v5684_v5, %v6058_v21 }
 0x2a1   : > { %v4715_v50 = vmax.f32 %v4561_v48, 0.0  ;;  %v4556_v6 = vadd.f32 %v8731_v9, %v4555_v51  ;;  %v5003_v35 = vpop.xlane.xlu0 %5002  ;;  %v4847_v16 = vmul.f32 %v8754_v37, %v4712_v46  ;;  %v5214_v59 = vsel %vm511_vm0, %v4848_v45, 0.0 }
 0x2a2   : > { %v5692_v55 = vrot.slane %v5290_v33, %v7532_v8  ;;  %v5291_v0 = vadd.f32 %v8465_v14, %v5003_v35  ;;  %5206 = vadd.xlane.f32.xlu1 %v5205_v52  ;;  %v7259_v41 = vpop.f32.mrf.mxu0  ;;  %v6060_v53 = vsel %vm6023_vm6, %v5688_v36, %v6059_v63 }
 0x2a3   : > { %v4850_v56 = vmul.f32 %v8754_v37, %v4715_v50  ;;  %v4714_v57 = vmax.f32 %v4556_v6, 0.0  ;;  %v4571_v54 = vadd.f32 %v8731_v9, %v7259_v41  ;;  %v5006_v18 = vpop.xlane.xlu1 %5005  ;;  %v5211_v26 = vsel %vm511_vm0, %v4847_v16, 0.0 }
 0x2a4   : > { %v5292_v3 = vadd.f32 %v8465_v14, %v5006_v18  ;;  %5215 = vadd.xlane.f32.xlu0 %v5214_v59  ;;  %v4565_v44 = vpop.f32.mrf.mxu0  ;;  %v8779_v61 = vsel %vm6025_vm7, %v5692_v55, %v6060_v53  ;;  %v5696_v13 = vrot.slane %v5291_v0, %v7532_v8 }
 0x2a5   : > { %v4717_v2 = vmax.f32 %v4571_v54, 0.0  ;;  %v4566_v4 = vadd.f32 %v8731_v9, %v4565_v44  ;;  %v5009_v7 = vpop.xlane.xlu0 %5008  ;;  %v5220_v10 = vsel %vm511_vm0, %v4850_v56, 0.0  ;;  %v4849_v12 = vmul.f32 %v8754_v37, %v4714_v57 }
 0x2a6   : > { %v5700_v43 = vrot.slane %v5292_v3, %v7532_v8  ;;  %v5293_v24 = vadd.f32 %v8465_v14, %v5009_v7  ;;  %5221 = vadd.xlane.f32.xlu1 %v5220_v10  ;;  %v7262_v17 = vpop.f32.mrf.mxu0 }
 0x2a7   : > { %v4852_v60 = vmul.f32 %v8754_v37, %v4717_v2  ;;  %v4716_v19 = vmax.f32 %v4566_v4, 0.0  ;;  %v4581_v20 = vadd.f32 %v8731_v9, %v7262_v17  ;;  %v5012_v23 = vpop.xlane.xlu1 %5011  ;;  %v5217_v5 = vsel %vm511_vm0, %v4849_v12, 0.0 }
 0x2a8   : > { %v6062_v27 = vsel %vm6013_vm1, %v5700_v43, %v5696_v13  ;;  %v5704_v31 = vrot.slane %v5293_v24, %v7532_v8  ;;  %v5294_v11 = vadd.f32 %v8465_v14, %v5012_v23  ;;  %5212 = vadd.xlane.f32.xlu0 %v5211_v26  ;;  %v4575_v30 = vpop.f32.mrf.mxu0 }
 0x2a9   : > { %v4719_v32 = vmax.f32 %v4581_v20, 0.0  ;;  %v4576_v34 = vadd.f32 %v8731_v9, %v4575_v30  ;;  %v5015_v47 = vpop.xlane.xlu0 %5014  ;;  %v5226_v38 = vsel %vm511_vm0, %v4852_v60, 0.0  ;;  %v4851_v42 = vmul.f32 %v8754_v37, %v4716_v19 }
 0x2aa   : > { %v6063_v39 = vsel %vm6015_vm2, %v5704_v31, %v6062_v27  ;;  %v5708_v40 = vrot.slane %v5294_v11, %v7532_v8  ;;  %v5295_v58 = vadd.f32 %v8465_v14, %v5015_v47  ;;  %5227 = vadd.xlane.f32.xlu1 %v5226_v38  ;;  %v7265_v21 = vpop.f32.mrf.mxu0 }
 0x2ab   : > { %v4854_v15 = vmul.f32 %v8754_v37, %v4719_v32  ;;  %v4718_v45 = vmax.f32 %v4576_v34, 0.0  ;;  %v4591_v46 = vadd.f32 %v8731_v9, %v7265_v21  ;;  %v5018_v48 = vpop.xlane.xlu1 %5017  ;;  %v5223_v53 = vsel %vm511_vm0, %v4851_v42, 0.0 }
 0x2ac   : > { %v6064_v28 = vsel %vm6017_vm3, %v5708_v40, %v6063_v39  ;;  %v5712_v22 = vrot.slane %v5295_v58, %v7532_v8  ;;  %v5296_v36 = vadd.f32 %v8465_v14, %v5018_v48  ;;  %5218 = vadd.xlane.f32.xlu0 %v5217_v5  ;;  %v4585_v33 = vpop.f32.mrf.mxu0 }
 0x2ad   : > { %v4853_v51 = vmul.f32 %v8754_v37, %v4718_v45  ;;  %v4721_v63 = vmax.f32 %v4591_v46, 0.0  ;;  %v4586_v50 = vadd.f32 %v8731_v9, %v4585_v33  ;;  %v5021_v6 = vpop.xlane.xlu0 %5020  ;;  %v5232_v35 = vsel %vm511_vm0, %v4854_v15, 0.0 }
 0x2ae   : > { %v6065_v52 = vsel %vm6019_vm4, %v5712_v22, %v6064_v28  ;;  %v5716_v16 = vrot.slane %v5296_v36, %v7532_v8  ;;  %v5297_v55 = vadd.f32 %v8465_v14, %v5021_v6  ;;  %5233 = vadd.xlane.f32.xlu1 %v5232_v35 }
 0x2af   : > { %v4720_v0 = vmax.f32 %v4586_v50, 0.0  ;;  %v5024_v41 = vpop.xlane.xlu1 %5023  ;;  %v4856_v54 = vmul.f32 %v8754_v37, %v4721_v63  ;;  %v5229_v3 = vsel %vm511_vm0, %v4853_v51, 0.0 }
 0x2b0   : > { %v5720_v56 = vrot.slane %v5297_v55, %v7532_v8  ;;  %v5298_v57 = vadd.f32 %v8465_v14, %v5024_v41  ;;  %5224 = vadd.xlane.f32.xlu0 %v5223_v53  ;;  %v6066_v9 = vsel %vm6021_vm5, %v5716_v16, %v6065_v52 }
 0x2b1   : > { %v4855_v18 = vmul.f32 %v8754_v37, %v4720_v0  ;;  %v5027_v59 = vpop.xlane.xlu0 %5026  ;;  %v5238_v13 = vsel %vm511_vm0, %v4856_v54, 0.0 }
 0x2b2   : > { %v5724_v44 = vrot.slane %v5298_v57, %v7532_v8  ;;  %5230 = vadd.xlane.f32.xlu1 %v5229_v3  ;;  %v6067_v2 = vsel %vm6023_vm6, %v5720_v56, %v6066_v9  ;;  %v5299_v5 = vadd.f32 %v8465_v14, %v5027_v59 }
 0x2b3   : > { %v5030_v4 = vpop.xlane.xlu1 %5029  ;;  %v5235_v7 = vsel %vm511_vm0, %v4855_v18, 0.0 }
 0x2b4   : > { %5236 = vadd.xlane.f32.xlu0 %v5235_v7  ;;  %v8822_v10 = vsel %vm6025_vm7, %v5724_v44, %v6067_v2  ;;  %v5300_v58 = vadd.f32 %v8465_v14, %v5030_v4  ;;  %v5728_v48 = vrot.slane %v5299_v5, %v7532_v8 }
 0x2b5   : > { %v5033_v12 = vpop.xlane.xlu0 %5032 }
 0x2b6   : > { %5239 = vadd.xlane.f32.xlu1 %v5238_v13  ;;  %v5301_v42 = vadd.f32 %v8465_v14, %v5033_v12  ;;  %v5732_v45 = vrot.slane %v5300_v58, %v7532_v8 }
 0x2b7   : > { %v5036_v37 = vpop.xlane.xlu1 %5035 }
 0x2b8   : > { %v5302_v28 = vadd.f32 %v8465_v14, %v5036_v37  ;;  %v5736_v22 = vrot.slane %v5301_v42, %v7532_v8  ;;  %v6069_v51 = vsel %vm6013_vm1, %v5732_v45, %v5728_v48 }
 0x2b9   : > { %v5039_v43 = vpop.xlane.xlu0 %5038 }
 0x2ba   : > { %v5303_v63 = vadd.f32 %v8465_v14, %v5039_v43  ;;  %v6070_v52 = vsel %vm6015_vm2, %v5736_v22, %v6069_v51 }
 0x2bb   : > { %v5042_v24 = vpop.xlane.xlu1 %5041 }
 0x2bc   : > { %v5304_v0 = vadd.f32 %v8465_v14, %v5042_v24  ;;  %v5744_v41 = vrot.slane %v5303_v63, %v7532_v8 }
 0x2bd   : > { %v5045_v17 = vpop.xlane.xlu0 %5044 }
 0x2be   : > { %v5305_v59 = vadd.f32 %v8465_v14, %v5045_v17  ;;  %v5748_v2 = vrot.slane %v5304_v0, %v7532_v8 }
 0x2bf   : > { %v5048_v60 = vpop.xlane.xlu1 %5047 }
 0x2c0   : > { %v5752_v17 = vrot.slane %v5305_v59, %v7532_v8 }
 0x2c1   : > { %v5051_v19 = vpop.xlane.xlu0 %5050 }
 0x2c2   : > { %v5307_v50 = vadd.f32 %v8465_v14, %v5051_v19  ;;  %v5306_v19 = vadd.f32 %v8465_v14, %v5048_v60 }
 0x2c3   : > { %v5054_v20 = vpop.xlane.xlu1 %5053 }
 0x2c4   : > { %v5308_v36 = vadd.f32 %v8465_v14, %v5054_v20  ;;  %v5760_v53 = vrot.slane %v5307_v50, %v7532_v8  ;;  %v5756_v45 = vrot.slane %v5306_v19, %v7532_v8 }
 0x2c5   : > { %v5057_v23 = vpop.xlane.xlu0 %5056 }
 0x2c6   : > { %v5309_v35 = vadd.f32 %v8465_v14, %v5057_v23  ;;  %v5764_v16 = vrot.slane %v5308_v36, %v7532_v8 }
 0x2c7   : > { %v5060_v26 = vpop.xlane.xlu1 %5059 }
 0x2c8   : > { %v5310_v56 = vadd.f32 %v8465_v14, %v5060_v26  ;;  %v5768_v9 = vrot.slane %v5309_v35, %v7532_v8  ;;  %v6076_v3 = vsel %vm6013_vm1, %v5764_v16, %v5760_v53 }
 0x2c9   : > { %v5066_v27 = vpop.xlane.xlu0 %5065 }
 0x2ca   : > { %v6077_v37 = vsel %vm6015_vm2, %v5768_v9, %v6076_v3  ;;  %v5312_v20 = vadd.f32 %v8465_v14, %v5066_v27 }
 0x2cb   : > { %v5063_v31 = vpop.xlane.xlu1 %5062 }
 0x2cc   : > { %v5311_v54 = vadd.f32 %v8465_v14, %v5063_v31  ;;  %v5780_v48 = vrot.slane %v5312_v20, %v7532_v8 }
 0x2cd   : > { %v5069_v11 = vpop.xlane.xlu0 %5068 }
 0x2ce   : > { %v5776_v43 = vrot.slane %v5311_v54, %v7532_v8  ;;  %v5313_v26 = vadd.f32 %v8465_v14, %v5069_v11 }
 0x2cf   : > { %v8825_v30 = vpop.xlane.xlu1 %5071 }
 0x2d0   : > { %v5314_v36 = vadd.f32 %v8465_v14, %v8825_v30 }
 0x2d1   : > { %v5075_v32 = vpop.xlane.xlu0 %5074 }
 0x2d2   : > { %v5315_v4 = vadd.f32 %v8465_v14, %v5075_v32 }
 0x2d3   : > { %v5078_v34 = vpop.xlane.xlu1 %5077 }
 0x2d4   : > { %v5316_v18 = vadd.f32 %v8465_v14, %v5078_v34  ;;  %v5792_v31 = vrot.slane %v5315_v4, %v7532_v8 }
 0x2d5   : > { %v5081_v47 = vpop.xlane.xlu0 %5080 }
 0x2d6   : > { %v5317_v12 = vadd.f32 %v8465_v14, %v5081_v47  ;;  %v5796_v24 = vrot.slane %v5316_v18, %v7532_v8 }
 0x2d7   : > { %v5084_v38 = vpop.xlane.xlu1 %5083 }
 0x2d8   : > { %v5800_v47 = vrot.slane %v5317_v12, %v7532_v8  ;;  %v5318_v58 = vadd.f32 %v8465_v14, %v5084_v38  ;;  %v6083_v27 = vsel %vm6013_vm1, %v5796_v24, %v5792_v31 }
 0x2d9   : > { %v8827_v39 = vpop.xlane.xlu0 %5089 }
 0x2da   : > { %v5804_v51 = vrot.slane %v5318_v58, %v7532_v8  ;;  %v5320_v63 = vadd.f32 %v8465_v14, %v8827_v39 }
 0x2db   : > { %v8829_v40 = vpop.xlane.xlu1 %5086 }
 0x2dc   : > { %v5319_v11 = vadd.f32 %v8465_v14, %v8829_v40  ;;  %v5812_v54 = vrot.slane %v5320_v63, %v7532_v8 }
 0x2dd   : > { %v8832_v21 = vpop.xlane.xlu0 %5092 }
 0x2df   : > { %v8836_v15 = vpop.xlane.xlu1 %5095 }
 0x2e0   : > { %v5322_v4 = vadd.f32 %v8465_v14, %v8836_v15 }
 0x2e1   : > { %v5099_v46 = vpop.xlane.xlu0 %5098  ;;  %6148 = vxpose.xlu0.b32.start [1/16] (narrow) %v8524_v49, 8  ;;  %v5740_v49 = vrot.slane %v5302_v28, %v7532_v8 }
 0x2e2   : > { %v5323_v42 = vadd.f32 %v8465_v14, %v5099_v46  ;;  %v6084_v46 = vsel %vm6015_vm2, %v5800_v47, %v6083_v27 }
 0x2e3   : > { %v5102_v33 = vpop.xlane.xlu1 %5101  ;;  %v6085_v9 = vsel %vm6017_vm3, %v5804_v51, %v6084_v46 }
 0x2e4   : > { %v5824_v30 = vrot.slane %v5323_v42, %v7532_v8 }
 0x2e5   : > { %v5105_v6 = vpop.xlane.xlu0 %5104  ;;  %6149 = vxpose.xlu0.b32.cont [2/16] (narrow) %v8573_v1, 8  ;;  %v6071_v1 = vsel %vm6017_vm3, %v5740_v49, %v6070_v52  ;;  %v5808_v49 = vrot.slane %v5319_v11, %v7532_v8 }
 0x2e6   : > { %v6072_v7 = vsel %vm6019_vm4, %v5744_v41, %v6071_v1  ;;  %v5325_v28 = vadd.f32 %v8465_v14, %v5105_v6 }
 0x2e7   : > { %v5108_v55 = vpop.xlane.xlu1 %5107  ;;  %v6073_v32 = vsel %vm6021_vm5, %v5748_v2, %v6072_v7  ;;  %v6086_v3 = vsel %vm6019_vm4, %v5808_v49, %v6085_v9 }
 0x2e8   : > { %v6074_v38 = vsel %vm6023_vm6, %v5752_v17, %v6073_v32  ;;  %v5326_v35 = vadd.f32 %v8465_v14, %v5108_v55  ;;  %v5832_v16 = vrot.slane %v5325_v28, %v7532_v8  ;;  %v5788_v55 = vrot.slane %v5314_v36, %v7532_v8 }
 0x2e9   : > { %v8856_v57 = vpop.xlane.xlu0 %5113  ;;  %6150 = vxpose.xlu0.b32.cont [3/16] (narrow) %v8622_v62, 8  ;;  %v5772_v62 = vrot.slane %v5310_v56, %v7532_v8  ;;  %v6075_v1 = vsel %vm6025_vm7, %v5756_v45, %v6074_v38  ;;  %v6087_v20 = vsel %vm6021_vm5, %v5812_v54, %v6086_v3  ;;  %v5820_v32 = vrot.slane %v5322_v4, %v7532_v8 }
 0x2eb   : > { %v5111_v44 = vpop.xlane.xlu1 %5110  ;;  %v6078_v34 = vsel %vm6017_vm3, %v5772_v62, %v6077_v37 }
 0x2ec   : > { %v6079_v60 = vsel %vm6019_vm4, %v5776_v43, %v6078_v34  ;;  %v5327_v0 = vadd.f32 %v8465_v14, %v5111_v44  ;;  %v5328_v43 = vadd.f32 %v8465_v14, %v8856_v57 }
 0x2ed   : > { %v8870_v13 = vpop.xlane.xlu0 %5116  ;;  %6151 = vxpose.xlu0.b32.cont [4/16] (narrow) %v8671_v25, 8  ;;  %v5324_v25 = vadd.f32 %v8465_v14, %v5102_v33  ;;  %v6080_v6 = vsel %vm6021_vm5, %v5780_v48, %v6079_v60 }
 0x2ee   : > { %v5840_v62 = vrot.slane %v5327_v0, %v7532_v8  ;;  %v5329_v19 = vadd.f32 %v8465_v14, %v8870_v13  ;;  %v5844_v13 = vrot.slane %v5328_v43, %v7532_v8 }
 0x2ef   : > { %v8879_v23 = vpop.xlane.xlu1 %5119  ;;  %v5828_v33 = vrot.slane %v5324_v25, %v7532_v8 }
 0x2f0   : > { %v5848_v11 = vrot.slane %v5329_v19, %v7532_v8 }
 0x2f1   : > { %v5123_v5 = vpop.xlane.xlu0 %5122  ;;  %6152 = vxpose.xlu0.b32.cont [5/16] (narrow) %v8720_v29, 8  ;;  %v5784_v29 = vrot.slane %v5313_v26, %v7532_v8  ;;  %v6090_v53 = vsel %vm6013_vm1, %v5828_v33, %v5824_v30 }
 0x2f2   : > { %v5331_v52 = vadd.f32 %v8465_v14, %v5123_v5  ;;  %v6091_v7 = vsel %vm6015_vm2, %v5832_v16, %v6090_v53  ;;  %v5330_v5 = vadd.f32 %v8465_v14, %v8879_v23 }
 0x2f3   : > { %v5126_v22 = vpop.xlane.xlu1 %5125  ;;  %v6081_v59 = vsel %vm6023_vm6, %v5784_v29, %v6080_v6 }
 0x2f4   : > { %v5332_v40 = vadd.f32 %v8465_v14, %v5126_v22  ;;  %v5856_v44 = vrot.slane %v5331_v52, %v7532_v8  ;;  %v6082_v25 = vsel %vm6025_vm7, %v5788_v55, %v6081_v59  ;;  %v5852_v36 = vrot.slane %v5330_v5, %v7532_v8 }
 0x2f5   : > { %v5129_v50 = vpop.xlane.xlu0 %5128  ;;  %6153 = vxpose.xlu0.b32.cont [6/16] (narrow) %v8779_v61, 8  ;;  %v5321_v61 = vadd.f32 %v8465_v14, %v8832_v21  ;;  %v5836_v21 = vrot.slane %v5326_v35, %v7532_v8 }
 0x2f6   : > { %v5333_v41 = vadd.f32 %v8465_v14, %v5129_v50  ;;  %v5860_v56 = vrot.slane %v5332_v40, %v7532_v8 }
 0x2f7   : > { %v5132_v39 = vpop.xlane.xlu1 %5131  ;;  %v5816_v37 = vrot.slane %v5321_v61, %v7532_v8  ;;  %v6092_v26 = vsel %vm6017_vm3, %v5836_v21, %v6091_v7 }
 0x2f8   : > { %v5334_v2 = vadd.f32 %v8465_v14, %v5132_v39  ;;  %v5864_v12 = vrot.slane %v5333_v41, %v7532_v8  ;;  %v6097_v24 = vsel %vm6013_vm1, %v5860_v56, %v5856_v44  ;;  %v6093_v57 = vsel %vm6019_vm4, %v5840_v62, %v6092_v26 }
 0x2f9   : > { %v5138_v18 = vpop.xlane.xlu0 %5137  ;;  %6154 = vxpose.xlu0.b32.cont [7/16] (narrow) %v8822_v10, 8  ;;  %v6088_v27 = vsel %vm6023_vm6, %v5816_v37, %v6087_v20  ;;  %v6094_v28 = vsel %vm6021_vm5, %v5844_v13, %v6093_v57 }
 0x2fa   : > { %v5868_v31 = vrot.slane %v5334_v2, %v7532_v8  ;;  %v6098_v34 = vsel %vm6015_vm2, %v5864_v12, %v6097_v24  ;;  %v5336_v60 = vadd.f32 %v8465_v14, %v5138_v18  ;;  %v6089_v23 = vsel %vm6025_vm7, %v5820_v32, %v6088_v27 }
 0x2fb   : > { %v5135_v10 = vpop.xlane.xlu1 %5134  ;;  %v6095_v50 = vsel %vm6023_vm6, %v5848_v11, %v6094_v28 }
 0x2fc   : > { %v5335_v17 = vadd.f32 %v8465_v14, %v5135_v10  ;;  %v6099_v48 = vsel %vm6017_vm3, %v5868_v31, %v6098_v34  ;;  %v5876_v33 = vrot.slane %v5336_v60, %v7532_v8  ;;  %v6096_v39 = vsel %vm6025_vm7, %v5852_v36, %v6095_v50 }
 0x2fd   : > { %v5141_v15 = vpop.xlane.xlu0 %5140  ;;  %6155 = vxpose.xlu0.b32.cont [8/16] (narrow) %v6075_v1, 8 }
 0x2fe   : > { %v5872_v47 = vrot.slane %v5335_v17, %v7532_v8  ;;  %v5337_v42 = vadd.f32 %v8465_v14, %v5141_v15 }
 0x2ff   : > { %v5144_v58 = vpop.xlane.xlu1 %5143 }
 0x300   : > { %v6100_v22 = vsel %vm6019_vm4, %v5872_v47, %v6099_v48  ;;  %v5338_v40 = vadd.f32 %v8465_v14, %v5144_v58  ;;  %v5880_v51 = vrot.slane %v5337_v42, %v7532_v8 }
 0x301   : > { %v5147_v45 = vpop.xlane.xlu0 %5146  ;;  %6156 = vxpose.xlu0.b32.cont [9/16] (narrow) %v6082_v25, 8  ;;  %v6101_v30 = vsel %vm6021_vm5, %v5876_v33, %v6100_v22 }
 0x302   : > { %v5339_v38 = vadd.f32 %v8465_v14, %v5147_v45  ;;  %v5884_v16 = vrot.slane %v5338_v40, %v7532_v8  ;;  %v6102_v56 = vsel %vm6023_vm6, %v5880_v51, %v6101_v30 }
 0x303   : > { %v5150_v29 = vpop.xlane.xlu1 %5149 }
 0x304   : > { %v5340_v46 = vadd.f32 %v8465_v14, %v5150_v29  ;;  %v5888_v35 = vrot.slane %v5339_v38, %v7532_v8  ;;  %v6103_v59 = vsel %vm6025_vm7, %v5884_v16, %v6102_v56 }
 0x305   : > { %v5153_v63 = vpop.xlane.xlu0 %5152  ;;  %6157 = vxpose.xlu0.b32.cont [10/16] (narrow) %v6089_v23, 8 }
 0x306   : > { %v5892_v6 = vrot.slane %v5340_v46, %v7532_v8  ;;  %v5341_v49 = vadd.f32 %v8465_v14, %v5153_v63 }
 0x307   : > { %v5156_v52 = vpop.xlane.xlu1 %5155 }
 0x308   : > { %v5896_v0 = vrot.slane %v5341_v49, %v7532_v8  ;;  %v5342_v41 = vadd.f32 %v8465_v14, %v5156_v52  ;;  %v6104_v61 = vsel %vm6013_vm1, %v5892_v6, %v5888_v35 }
 0x309   : > { %v5162_v53 = vpop.xlane.xlu0 %5161  ;;  %6158 = vxpose.xlu0.b32.cont [11/16] (narrow) %v6096_v39, 8 }
 0x30a   : > { %v5900_v1 = vrot.slane %v5342_v41, %v7532_v8  ;;  %v5344_v55 = vadd.f32 %v8465_v14, %v5162_v53  ;;  %v6105_v54 = vsel %vm6015_vm2, %v5896_v0, %v6104_v61 }
 0x30b   : > { %v5159_v9 = vpop.xlane.xlu1 %5158 }
 0x30c   : > { %v5343_v18 = vadd.f32 %v8465_v14, %v5159_v9  ;;  %v6106_v2 = vsel %vm6017_vm3, %v5900_v1, %v6105_v54  ;;  %v5908_v4 = vrot.slane %v5344_v55, %v7532_v8 }
 0x30d   : > { %v5165_v3 = vpop.xlane.xlu0 %5164  ;;  %6159 = vxpose.xlu0.b32.cont [12/16] (narrow) %v6103_v59, 8 }
 0x30e   : > { %v5904_v21 = vrot.slane %v5343_v18, %v7532_v8  ;;  %v5345_v44 = vadd.f32 %v8465_v14, %v5165_v3 }
 0x30f   : > { %v5168_v7 = vpop.xlane.xlu1 %5167 }
 0x310   : > { %v6107_v62 = vsel %vm6019_vm4, %v5904_v21, %v6106_v2  ;;  %v5912_v12 = vrot.slane %v5345_v44, %v7532_v8  ;;  %v5346_v10 = vadd.f32 %v8465_v14, %v5168_v7 }
 0x311   : > { %v5171_v37 = vpop.xlane.xlu0 %5170  ;;  %v6108_v43 = vsel %vm6021_vm5, %v5908_v4, %v6107_v62 }
 0x312   : > { %v5916_v24 = vrot.slane %v5346_v10, %v7532_v8  ;;  %v6109_v17 = vsel %vm6023_vm6, %v5912_v12, %v6108_v43  ;;  %v5347_v19 = vadd.f32 %v8465_v14, %v5171_v37 }
 0x313   : > { %v5174_v15 = vpop.xlane.xlu1 %5173 }
 0x314   : > { %v5348_v20 = vadd.f32 %v8465_v14, %v5174_v15  ;;  %v6110_v26 = vsel %vm6025_vm7, %v5916_v24, %v6109_v17  ;;  %v5920_v57 = vrot.slane %v5347_v19, %v7532_v8 }
 0x315   : > { %v5177_v31 = vpop.xlane.xlu0 %5176  ;;  %6160 = vxpose.xlu0.b32.cont [13/16] (narrow) %v6110_v26, 8 }
 0x316   : > { %v5924_v25 = vrot.slane %v5348_v20, %v7532_v8  ;;  %v5349_v32 = vadd.f32 %v8465_v14, %v5177_v31 }
 0x317   : > { %v5180_v34 = vpop.xlane.xlu1 %5179 }
 0x318   : > { %v5928_v47 = vrot.slane %v5349_v32, %v7532_v8  ;;  %v5350_v58 = vadd.f32 %v8465_v14, %v5180_v34  ;;  %v6111_v13 = vsel %vm6013_vm1, %v5924_v25, %v5920_v57 }
 0x319   : > { %v5186_v5 = vpop.xlane.xlu0 %5185 }
 0x31a   : > { %v5932_v60 = vrot.slane %v5350_v58, %v7532_v8  ;;  %v5352_v27 = vadd.f32 %v8465_v14, %v5186_v5  ;;  %v6112_v42 = vsel %vm6015_vm2, %v5928_v47, %v6111_v13 }
 0x31b   : > { %v5183_v11 = vpop.xlane.xlu1 %5182 }
 0x31c   : > { %v5351_v45 = vadd.f32 %v8465_v14, %v5183_v11  ;;  %v6113_v38 = vsel %vm6017_vm3, %v5932_v60, %v6112_v42  ;;  %v5940_v29 = vrot.slane %v5352_v27, %v7532_v8 }
 0x31d   : > { %v5189_v48 = vpop.xlane.xlu0 %5188 }
 0x31e   : > { %v5936_v28 = vrot.slane %v5351_v45, %v7532_v8  ;;  %v5353_v22 = vadd.f32 %v8465_v14, %v5189_v48 }
 0x31f   : > { %v5192_v23 = vpop.xlane.xlu1 %5191 }
 0x320   : > { %v6114_v36 = vsel %vm6019_vm4, %v5936_v28, %v6113_v38  ;;  %v5944_v33 = vrot.slane %v5353_v22, %v7532_v8  ;;  %v5354_v40 = vadd.f32 %v8465_v14, %v5192_v23 }
 0x321   : > { %v5195_v46 = vpop.xlane.xlu0 %5194  ;;  %v6115_v51 = vsel %vm6021_vm5, %v5940_v29, %v6114_v36 }
 0x322   : > { %v5948_v63 = vrot.slane %v5354_v40, %v7532_v8  ;;  %v6116_v50 = vsel %vm6023_vm6, %v5944_v33, %v6115_v51  ;;  %v5355_v35 = vadd.f32 %v8465_v14, %v5195_v46 }
 0x323   : > { %v5198_v6 = vpop.xlane.xlu1 %5197 }
 0x324   : > { %v5356_v49 = vadd.f32 %v8465_v14, %v5198_v6  ;;  %v6117_v30 = vsel %vm6025_vm7, %v5948_v63, %v6116_v50  ;;  %v5952_v39 = vrot.slane %v5355_v35, %v7532_v8 }
 0x325   : > { %v5201_v52 = vpop.xlane.xlu0 %5200  ;;  %6161 = vxpose.xlu0.b32.cont [14/16] (narrow) %v6117_v30, 8 }
 0x326   : > { %v5357_v16 = vadd.f32 %v8465_v14, %v5201_v52  ;;  %v5956_v0 = vrot.slane %v5356_v49, %v7532_v8 }
 0x327   : > { %v5204_v41 = vpop.xlane.xlu1 %5203 }
 0x328   : > { %v5358_v61 = vadd.f32 %v8465_v14, %v5204_v41  ;;  %v5960_v56 = vrot.slane %v5357_v16, %v7532_v8  ;;  %v6118_v1 = vsel %vm6013_vm1, %v5956_v0, %v5952_v39 }
 0x329   : > { %v5210_v53 = vpop.xlane.xlu0 %5209 }
 0x32a   : > { %v5964_v54 = vrot.slane %v5358_v61, %v7532_v8  ;;  %v6119_v59 = vsel %vm6015_vm2, %v5960_v56, %v6118_v1  ;;  %v5360_v21 = vadd.f32 %v8465_v14, %v5210_v53 }
 0x32b   : > { %v5207_v55 = vpop.xlane.xlu1 %5206 }
 0x32c   : > { %v5359_v9 = vadd.f32 %v8465_v14, %v5207_v55  ;;  %v6120_v2 = vsel %vm6017_vm3, %v5964_v54, %v6119_v59  ;;  %v5972_v10 = vrot.slane %v5360_v21, %v7532_v8 }
 0x32d   : > { %v5216_v18 = vpop.xlane.xlu0 %5215 }
 0x32e   : > { %v5968_v3 = vrot.slane %v5359_v9, %v7532_v8  ;;  %v5362_v4 = vadd.f32 %v8465_v14, %v5216_v18 }
 0x32f   : > { %v5222_v44 = vpop.xlane.xlu1 %5221 }
 0x330   : > { %v6121_v62 = vsel %vm6019_vm4, %v5968_v3, %v6120_v2  ;;  %v5980_v24 = vrot.slane %v5362_v4, %v7532_v8  ;;  %v5364_v26 = vadd.f32 %v8465_v14, %v5222_v44 }
 0x331   : > { %v5213_v7 = vpop.xlane.xlu0 %5212  ;;  %v6122_v19 = vsel %vm6021_vm5, %v5972_v10, %v6121_v62 }
 0x332   : > { %v5361_v12 = vadd.f32 %v8465_v14, %v5213_v7  ;;  %v5988_v58 = vrot.slane %v5364_v26, %v7532_v8 }
 0x333   : > { %v5228_v37 = vpop.xlane.xlu1 %5227 }
 0x334   : > { %v5976_v43 = vrot.slane %v5361_v12, %v7532_v8  ;;  %v5366_v32 = vadd.f32 %v8465_v14, %v5228_v37 }
 0x335   : > { %v5219_v17 = vpop.xlane.xlu0 %5218 }
 0x336   : > { %v5363_v15 = vadd.f32 %v8465_v14, %v5219_v17  ;;  %v6123_v20 = vsel %vm6023_vm6, %v5976_v43, %v6122_v19  ;;  %v5996_v11 = vrot.slane %v5366_v32, %v7532_v8 }
 0x337   : > { %v5234_v31 = vpop.xlane.xlu1 %5233  ;;  %v6124_v25 = vsel %vm6025_vm7, %v5980_v24, %v6123_v20 }
 0x338   : > { %6162 = vxpose.xlu0.b32.cont [15/16] (narrow) %v6124_v25, 8  ;;  %v5984_v57 = vrot.slane %v5363_v15, %v7532_v8  ;;  %v5368_v13 = vadd.f32 %v8465_v14, %v5234_v31 }
 0x339   : > { %v5225_v34 = vpop.xlane.xlu0 %5224 }
 0x33a   : > { %v5365_v47 = vadd.f32 %v8465_v14, %v5225_v34  ;;  %v6125_v42 = vsel %vm6013_vm1, %v5988_v58, %v5984_v57  ;;  %v6004_v38 = vrot.slane %v5368_v13, %v7532_v8 }
 0x33b   : > { %v5231_v5 = vpop.xlane.xlu1 %5230 }
 0x33c   : > { %v5992_v60 = vrot.slane %v5365_v47, %v7532_v8  ;;  %v5367_v27 = vadd.f32 %v8465_v14, %v5231_v5 }
 0x33d   : > { %v5237_v45 = vpop.xlane.xlu0 %5236 }
 0x33e   : > { %v6126_v48 = vsel %vm6015_vm2, %v5992_v60, %v6125_v42  ;;  %v6000_v28 = vrot.slane %v5367_v27, %v7532_v8  ;;  %v5369_v22 = vadd.f32 %v8465_v14, %v5237_v45 }
 0x33f   : > { %v6127_v29 = vsel %vm6017_vm3, %v5996_v11, %v6126_v48  ;;  %v5240_v23 = vpop.xlane.xlu1 %5239 }
 0x340   : > { %v6128_v36 = vsel %vm6019_vm4, %v6000_v28, %v6127_v29  ;;  %v6008_v33 = vrot.slane %v5369_v22, %v7532_v8  ;;  %v5370_v40 = vadd.f32 %v8465_v14, %v5240_v23 }
 0x341   : > { %v6129_v46 = vsel %vm6021_vm5, %v6004_v38, %v6128_v36 }
 0x342   : > { %v6012_v51 = vrot.slane %v5370_v40, %v7532_v8  ;;  %v6130_v63 = vsel %vm6023_vm6, %v6008_v33, %v6129_v46 }
 0x344   : > { %v6131_v50 = vsel %vm6025_vm7, %v6012_v51, %v6130_v63 }
 0x345   : > { %6163 = vxpose.xlu0.b32.end [16/16] (narrow) %v6131_v50, 8 }
 0x385   : > { %v6164_v6 = vpop.trf.xlu0 }
 0x386   : > { %v6180_v49 = vrot.slane %v6164_v6, 4 }
 0x388   : > { %v6181_v30 = vmax.f32 %v6164_v6, %v6180_v49 }
 0x38a   : > { %v6182_v35 = vrot.slane %v6181_v30, 2 }
 0x38c   : > { %v6183_v52 = vmax.f32 %v6181_v30, %v6182_v35 }
 0x38e   : > { %v6184_v16 = vrot.slane %v6183_v52, 1 }
 0x390   : > { %v6185_v0 = vmax.f32 %v6183_v52, %v6184_v16 }
 0x392   : > { %v6186_v41 = vsub.f32 %v6164_v6, %v6185_v0 }
 0x394   : > { %v6187_v14 = vmul.f32 1.442695, %v6186_v41 }
 0x396   : > { %7283 = vpow2.f32 %v6187_v14 }
 0x3a3   : > { %v7284_v39 = vpop.eup %7283 }
 0x3a4   : > { %v6189_v61 = vrot.slane %v7284_v39, 4 }
 0x3a6   : > { %v6190_v8 = vadd.f32 %v7284_v39, %v6189_v61 }
 0x3a8   : > { %v6191_v53 = vrot.slane %v6190_v8, 2 }
 0x3aa   : > { %v6192_v56 = vadd.f32 %v6191_v53, %v6190_v8 }
 0x3ac   : > { %v6193_v1 = vrot.slane %v6192_v56, 1 }
 0x3ae   : > { %v6194_v55 = vadd.f32 %v6193_v1, %v6192_v56 }
 0x3b0   : > { %7285 = vrcp.f32 %v6194_v55 }
 0x3bd   : > { %v7286_v9 = vpop.eup %7285 }
 0x3be   : > { %v6196_v54 = vmul.f32 %v7286_v9, %v7284_v39 }
 0x3c0   : > { %6197 = vst [vmem:[%s355_s25] sm:$0xff] %v6196_v54 }
 0x3c1 PF: > { %s20_s11 = sadd.s32 1, %s7297_s11  }
 0x3c2   : > { %p17_p6 = scmp.ge.s32.totalorder %s20_s11, 4  }
 0x3c4   :  { %19 = sbr.rel (!%p17_p6) target bundleno = 2 (0x2), region = 89 }

</bundles_post_ra>
